<compile_context>
chip_gen: v6e
topology: v6e:2x2x1
jax: 0.10.0
libtpu: 0.0.40
codegen_flags: <defaults>
</compile_context>

<pallas_src>
import jax
import jax.numpy as jnp
from jax.experimental import pallas as pl
from jax.experimental.pallas import tpu as pltpu


def _make_primal_kernel(W, L, PAD, cmax, compute_dtype):
    """Builds the kernel body with static shape parameters baked in.

    Kernel refs:
      mask_ref: (9, L)        per-tap validity mask (compute dtype, {0,1})
      x_ref   : (C0, L)       input, channels-first, lanes = block_b*H*W
      wX_ref  : (9, Cout, Cin) per-tap weights
      bX_ref  : (Cout, 1)     biases (f32)
      aX_ref  : (1, 1)        PReLU slopes (SMEM scalars)
      out_ref : (Cout, L)     lane-dense channels-first output
      xpad_ref: (cmax, 2*PAD+L) lane-padded row scratch (compute dtype)
    """

    def kernel(mask_ref, x_ref, w1_ref, b1_ref, a1_ref,
               w2_ref, b2_ref, a2_ref, w3_ref, b3_ref, out_ref, xpad_ref):
        cdt = compute_dtype

        # Zero the halo strips every step: the scratch persists across grid
        # steps (and each core of a multi-core part starts at a different
        # step), and the interior store below never touches the strips.
        zstrip = jnp.zeros((cmax, PAD), cdt)
        xpad_ref[:, 0:PAD] = zstrip
        xpad_ref[:, PAD + L:PAD + L + PAD] = zstrip

        def conv3x3(x, w_ref, b_ref):
            """x: (cin, L) compute dtype -> (cout, L) float32 (bias added)."""
            cin = x.shape[0]
            # Single lane-aligned dense store per conv (PAD is a multiple of
            # 128).  Rows cin..cmax of the interior may hold stale data from
            # a previous conv/step; they are never read (loads slice [:cin]).
            xpad_ref[:cin, PAD:PAD + L] = x
            acc = None
            for dy in range(3):
                for dx in range(3):
                    t = dy * 3 + dx
                    off = (dy - 1) * W + (dx - 1)
                    # Shifted tap window: unaligned *load* (cheap), then mask
                    # positions whose (y+dy-1, x+dx-1) falls outside the
                    # image (covers halo reads and cross-image leakage).
                    xt = xpad_ref[:cin, PAD + off:PAD + off + L]
                    xt = xt * mask_ref[t:t + 1, :]
                    d = jnp.dot(w_ref[t], xt,
                                preferred_element_type=jnp.float32)
                    acc = d if acc is None else acc + d
            return acc + b_ref[...]                 # (cout, L) + (cout, 1)

        def prelu(y, a_ref):
            a = a_ref[0, 0]                         # scalar slope from SMEM
            return jnp.where(y > 0, y, a * y)

        x0 = x_ref[...]                                            # (C0, L)
        h1 = prelu(conv3x3(x0, w1_ref, b1_ref), a1_ref)            # f32
        h2 = prelu(conv3x3(h1.astype(cdt), w2_ref, b2_ref), a2_ref)
        h3 = conv3x3(h2.astype(cdt), w3_ref, b3_ref)               # (Cout, L)
        out_ref[...] = h3.astype(out_ref.dtype)

    return kernel


def _pick_block_b(B, HW, max_block=8):
    """Largest block_b <= max_block that divides B, keeps the lane dim
    block_b*HW a multiple of 128 (or covers the whole batch) and leaves at
    least 2 grid steps so both v7x TensorCores get work."""
    valid = [c for c in range(1, B + 1)
             if B % c == 0 and ((c * HW) % 128 == 0 or c == B)]
    pref = [c for c in valid if B // c >= 2 and c <= max_block]
    if pref:
        return max(pref)
    return min(valid)


def primal_net_pallas(f, backward_h, params, *, block_b=None,
                      compute_dtype=jnp.float32):
    """f: (B,H,W,2*num_primal) f32, backward_h: (B,H,W,2) f32 -> NHWC out.

    compute_dtype controls MXU operands + scratch (use jnp.bfloat16 on
    v6e/v7x); bias, PReLU and accumulation stay float32.
    """
    w1, b1, a1, w2, b2, a2, w3, b3 = params
    inp = jnp.concatenate([f, backward_h], axis=-1)          # (B, H, W, C0)
    B, H, W, C0 = inp.shape
    Ch = w1.shape[-1]
    Cout = w3.shape[-1]
    HW = H * W
    if block_b is None:
        block_b = _pick_block_b(B, HW)
    if B % block_b != 0:
        raise ValueError("batch must be divisible by block_b")
    L = block_b * HW
    cmax = max(C0, Ch)
    # Halo width >= W+1, rounded up to a lane tile so the interior store of
    # the padded-row scratch stays 128-lane aligned.
    PAD = ((W + 1 + 127) // 128) * 128

    # Channels-first with (b, y, x) flattened onto lanes: every in-kernel
    # tensor is lane-dense and the kernel output needs no transpose.  These
    # transposes/reshapes are XLA-side layout plumbing.
    x = inp.transpose(3, 0, 1, 2).reshape(C0, B * HW).astype(compute_dtype)

    # Per-tap validity masks (periodic per image, tiled over the batch):
    # mask[t, y*W + x] == 1 iff (y+dy-1, x+dx-1) is inside the image.
    ys = jnp.arange(H).reshape(H, 1)
    xs = jnp.arange(W).reshape(1, W)
    mrows = []
    for dy in range(3):
        for dx in range(3):
            valid = ((ys + dy - 1 >= 0) & (ys + dy - 1 < H) &
                     (xs + dx - 1 >= 0) & (xs + dx - 1 < W))
            mrows.append(valid.reshape(HW))
    mask = jnp.tile(jnp.stack(mrows, 0).astype(compute_dtype), (1, B))

    # Weights as (tap, Cout, Cin): each tap is a plain (Cout,Cin)@(Cin,L)
    # matmul producing the channels-first (Cout, L) output directly.
    w1m = w1.transpose(0, 1, 3, 2).reshape(9, Ch, C0).astype(compute_dtype)
    w2m = w2.transpose(0, 1, 3, 2).reshape(9, Ch, Ch).astype(compute_dtype)
    w3m = w3.transpose(0, 1, 3, 2).reshape(9, Cout, Ch).astype(compute_dtype)
    b1r = b1.reshape(Ch, 1).astype(jnp.float32)
    b2r = b2.reshape(Ch, 1).astype(jnp.float32)
    b3r = b3.reshape(Cout, 1).astype(jnp.float32)
    a1r = a1.reshape(1, 1).astype(jnp.float32)
    a2r = a2.reshape(1, 1).astype(jnp.float32)

    smem_spec = pl.BlockSpec(memory_space=pltpu.MemorySpace.SMEM)
    kernel = _make_primal_kernel(W, L, PAD, cmax, compute_dtype)

    grid_spec = pltpu.PrefetchScalarGridSpec(
        num_scalar_prefetch=0,
        grid=(B // block_b,),
        in_specs=[
            pl.BlockSpec((9, L), lambda b: (0, b)),            # tap masks
            pl.BlockSpec((C0, L), lambda b: (0, b)),           # input
            pl.BlockSpec((9, Ch, C0), lambda b: (0, 0, 0)),    # w1
            pl.BlockSpec((Ch, 1), lambda b: (0, 0)),           # b1
            smem_spec,                                         # a1 (PReLU)
            pl.BlockSpec((9, Ch, Ch), lambda b: (0, 0, 0)),    # w2
            pl.BlockSpec((Ch, 1), lambda b: (0, 0)),           # b2
            smem_spec,                                         # a2 (PReLU)
            pl.BlockSpec((9, Cout, Ch), lambda b: (0, 0, 0)),  # w3
            pl.BlockSpec((Cout, 1), lambda b: (0, 0)),         # b3
        ],
        out_specs=pl.BlockSpec((Cout, L), lambda b: (0, b)),
        scratch_shapes=[pltpu.VMEM((cmax, 2 * PAD + L), compute_dtype)],
    )

    out = pl.pallas_call(
        kernel,
        out_shape=jax.ShapeDtypeStruct((Cout, B * HW), jnp.float32),
        grid_spec=grid_spec,
        compiler_params=pltpu.CompilerParams(
            dimension_semantics=("parallel",),     # batch elems independent
            vmem_limit_bytes=64 * 1024 * 1024),
    )(mask, x, w1m, b1r, a1r, w2m, b2r, a2r, w3m, b3r)

    # (Cout, B*HW) -> NHWC (pure layout plumbing, outside the kernel).
    return out.reshape(Cout, B, H, W).transpose(1, 2, 3, 0)


def primal_net_reference(f, backward_h, params):
    """Pure-JAX reference (NHWC conv) mirroring the PyTorch forward."""
    w1, b1, a1, w2, b2, a2, w3, b3 = params
    x = jnp.concatenate([f, backward_h], axis=-1)

    def conv(x, w, b):
        y = jax.lax.conv_general_dilated(
            x, w, window_strides=(1, 1), padding="SAME",
            dimension_numbers=("NHWC", "HWIO", "NHWC"))
        return y + b.reshape(1, 1, 1, -1)

    def prelu(x, a):
        return jnp.where(x > 0, x, a[0, 0] * x)

    h = prelu(conv(x, w1, b1), a1)
    h = prelu(conv(h, w2, b2), a2)
    return conv(h, w3, b3)


def init_params(key, num_primal, n_hidden):
    c0 = 2 * (num_primal + 1)
    cout = 2 * num_primal
    ks = jax.random.split(key, 6)
    w1 = 0.1 * jax.random.normal(ks[0], (3, 3, c0, n_hidden), jnp.float32)
    b1 = 0.1 * jax.random.normal(ks[1], (1, n_hidden), jnp.float32)
    w2 = 0.1 * jax.random.normal(ks[2], (3, 3, n_hidden, n_hidden), jnp.float32)
    b2 = 0.1 * jax.random.normal(ks[3], (1, n_hidden), jnp.float32)
    w3 = 0.1 * jax.random.normal(ks[4], (3, 3, n_hidden, cout), jnp.float32)
    b3 = 0.1 * jax.random.normal(ks[5], (1, cout), jnp.float32)
    # PReLU default: single learnable slope initialized to 0.25
    a1 = jnp.full((1, 1), 0.25, jnp.float32)
    a2 = jnp.full((1, 1), 0.25, jnp.float32)
    return (w1, b1, a1, w2, b2, a2, w3, b3)


if __name__ == "__main__":
    num_primal = 4
    n_hidden = 32
    B, H, W = 2, 16, 16

    key = jax.random.PRNGKey(0)
    k_f, k_h, k_p = jax.random.split(key, 3)
    f = jax.random.normal(k_f, (B, H, W, 2 * num_primal), jnp.float32)
    backward_h = jax.random.normal(k_h, (B, H, W, 2), jnp.float32)
    params = init_params(k_p, num_primal, n_hidden)

    out = primal_net_pallas(f, backward_h, params)
    out = jax.block_until_ready(out)

    ref = primal_net_reference(f, backward_h, params)
    assert out.shape == (B, H, W, 2 * num_primal)
    max_err = float(jnp.max(jnp.abs(out - ref)))
    assert jnp.allclose(out, ref, atol=1e-4, rtol=1e-4), max_err

    print("KERNEL_OK")
</pallas_src>

<mosaic_0001>
module attributes {stable_mosaic.version = 11 : i64} {
  func.func @kernel(%arg0: i32, %arg1: memref<9x256xf32, #tpu.memory_space<vmem>>, %arg2: memref<10x256xf32, #tpu.memory_space<vmem>>, %arg3: memref<9x32x10xf32, #tpu.memory_space<vmem>>, %arg4: memref<32x1xf32, #tpu.memory_space<vmem>>, %arg5: memref<1x1xf32, #tpu.memory_space<smem>>, %arg6: memref<9x32x32xf32, #tpu.memory_space<vmem>>, %arg7: memref<32x1xf32, #tpu.memory_space<vmem>>, %arg8: memref<1x1xf32, #tpu.memory_space<smem>>, %arg9: memref<9x8x32xf32, #tpu.memory_space<vmem>>, %arg10: memref<8x1xf32, #tpu.memory_space<vmem>>, %arg11: memref<8x256xf32, #tpu.memory_space<vmem>>, %arg12: memref<32x512xf32, #tpu.memory_space<vmem>>) attributes {dimension_semantics = [#tpu.dimension_semantics<parallel>], iteration_bounds = array<i64: 2>, scalar_prefetch = 0 : i64, scratch_operands = 1 : i64, tpu.core_type = #tpu.core_type<tc>, window_params = [{transform_indices = @transform_0, window_bounds = array<i64: 9, 256>}, {transform_indices = @transform_1, window_bounds = array<i64: 10, 256>}, {pipeline_mode = #tpu.pipeline_mode<synchronous>, transform_indices = @transform_2, window_bounds = array<i64: 9, 32, 10>}, {pipeline_mode = #tpu.pipeline_mode<synchronous>, transform_indices = @transform_3, window_bounds = array<i64: 32, 1>}, {transform_indices = @transform_4, window_bounds = array<i64: 1, 1>}, {pipeline_mode = #tpu.pipeline_mode<synchronous>, transform_indices = @transform_5, window_bounds = array<i64: 9, 32, 32>}, {pipeline_mode = #tpu.pipeline_mode<synchronous>, transform_indices = @transform_6, window_bounds = array<i64: 32, 1>}, {transform_indices = @transform_7, window_bounds = array<i64: 1, 1>}, {pipeline_mode = #tpu.pipeline_mode<synchronous>, transform_indices = @transform_8, window_bounds = array<i64: 9, 8, 32>}, {pipeline_mode = #tpu.pipeline_mode<synchronous>, transform_indices = @transform_9, window_bounds = array<i64: 8, 1>}, {transform_indices = @transform_10, window_bounds = array<i64: 8, 256>}]} {
    %cst = arith.constant 0.000000e+00 : f32
    %0 = vector.broadcast %cst : f32 to vector<32x128xf32>
    %c0 = arith.constant 0 : index
    %c0_0 = arith.constant 0 : index
    %1 = vector.load %arg12[%c0, %c0_0] : memref<32x512xf32, #tpu.memory_space<vmem>>, vector<32x128xf32>
    tpu.vector_store %arg12[%c0, %c0_0], %0 {strides = array<i32>} : memref<32x512xf32, #tpu.memory_space<vmem>>, vector<32x128xf32>,
    %c0_1 = arith.constant 0 : index
    %c384 = arith.constant 384 : index
    %2 = vector.load %arg12[%c0_1, %c384] : memref<32x512xf32, #tpu.memory_space<vmem>>, vector<32x128xf32>
    tpu.vector_store %arg12[%c0_1, %c384], %0 {strides = array<i32>} : memref<32x512xf32, #tpu.memory_space<vmem>>, vector<32x128xf32>,
    %c0_2 = arith.constant 0 : index
    %c0_3 = arith.constant 0 : index
    %3 = vector.load %arg2[%c0_2, %c0_3] : memref<10x256xf32, #tpu.memory_space<vmem>>, vector<10x256xf32>
    %c0_4 = arith.constant 0 : index
    %c128 = arith.constant 128 : index
    %4 = vector.load %arg12[%c0_4, %c128] : memref<32x512xf32, #tpu.memory_space<vmem>>, vector<10x256xf32>
    tpu.vector_store %arg12[%c0_4, %c128], %3 {strides = array<i32>} : memref<32x512xf32, #tpu.memory_space<vmem>>, vector<10x256xf32>,
    %c0_5 = arith.constant 0 : index
    %c111 = arith.constant 111 : index
    %5 = vector.load %arg12[%c0_5, %c111] : memref<32x512xf32, #tpu.memory_space<vmem>>, vector<10x256xf32>
    %c0_6 = arith.constant 0 : index
    %c0_7 = arith.constant 0 : index
    %6 = vector.load %arg1[%c0_6, %c0_7] : memref<9x256xf32, #tpu.memory_space<vmem>>, vector<1x256xf32>
    %7 = vector.broadcast %6 : vector<1x256xf32> to vector<10x256xf32>
    %8 = arith.mulf %5, %7 : vector<10x256xf32>
    %c0_8 = arith.constant 0 : index
    %c0_9 = arith.constant 0 : index
    %c0_10 = arith.constant 0 : index
    %9 = vector.load %arg3[%c0_8, %c0_9, %c0_10] : memref<9x32x10xf32, #tpu.memory_space<vmem>>, vector<1x32x10xf32>
    %10 = vector.shape_cast %9 : vector<1x32x10xf32> to vector<32x10xf32>
    %cst_11 = arith.constant dense<0.000000e+00> : vector<32x256xf32>
    %11 = tpu.matmul %10, %8, %cst_11 {dimension_numbers = #tpu.dot_dimension_numbers<[1], [0], [0], [1], [0, 0, 1, 1], [], []>} : vector<32x10xf32>, vector<10x256xf32>, vector<32x256xf32> -> vector<32x256xf32>
    %c0_12 = arith.constant 0 : index
    %c112 = arith.constant 112 : index
    %12 = vector.load %arg12[%c0_12, %c112] : memref<32x512xf32, #tpu.memory_space<vmem>>, vector<10x256xf32>
    %c1 = arith.constant 1 : index
    %c0_13 = arith.constant 0 : index
    %13 = vector.load %arg1[%c1, %c0_13] : memref<9x256xf32, #tpu.memory_space<vmem>>, vector<1x256xf32>
    %14 = vector.broadcast %13 : vector<1x256xf32> to vector<10x256xf32>
    %15 = arith.mulf %12, %14 : vector<10x256xf32>
    %c1_14 = arith.constant 1 : index
    %c0_15 = arith.constant 0 : index
    %c0_16 = arith.constant 0 : index
    %16 = vector.load %arg3[%c1_14, %c0_15, %c0_16] : memref<9x32x10xf32, #tpu.memory_space<vmem>>, vector<1x32x10xf32>
    %17 = vector.shape_cast %16 : vector<1x32x10xf32> to vector<32x10xf32>
    %cst_17 = arith.constant dense<0.000000e+00> : vector<32x256xf32>
    %18 = tpu.matmul %17, %15, %cst_17 {dimension_numbers = #tpu.dot_dimension_numbers<[1], [0], [0], [1], [0, 0, 1, 1], [], []>} : vector<32x10xf32>, vector<10x256xf32>, vector<32x256xf32> -> vector<32x256xf32>
    %19 = arith.addf %11, %18 : vector<32x256xf32>
    %c0_18 = arith.constant 0 : index
    %c113 = arith.constant 113 : index
    %20 = vector.load %arg12[%c0_18, %c113] : memref<32x512xf32, #tpu.memory_space<vmem>>, vector<10x256xf32>
    %c2 = arith.constant 2 : index
    %c0_19 = arith.constant 0 : index
    %21 = vector.load %arg1[%c2, %c0_19] : memref<9x256xf32, #tpu.memory_space<vmem>>, vector<1x256xf32>
    %22 = vector.broadcast %21 : vector<1x256xf32> to vector<10x256xf32>
    %23 = arith.mulf %20, %22 : vector<10x256xf32>
    %c2_20 = arith.constant 2 : index
    %c0_21 = arith.constant 0 : index
    %c0_22 = arith.constant 0 : index
    %24 = vector.load %arg3[%c2_20, %c0_21, %c0_22] : memref<9x32x10xf32, #tpu.memory_space<vmem>>, vector<1x32x10xf32>
    %25 = vector.shape_cast %24 : vector<1x32x10xf32> to vector<32x10xf32>
    %cst_23 = arith.constant dense<0.000000e+00> : vector<32x256xf32>
    %26 = tpu.matmul %25, %23, %cst_23 {dimension_numbers = #tpu.dot_dimension_numbers<[1], [0], [0], [1], [0, 0, 1, 1], [], []>} : vector<32x10xf32>, vector<10x256xf32>, vector<32x256xf32> -> vector<32x256xf32>
    %27 = arith.addf %19, %26 : vector<32x256xf32>
    %c0_24 = arith.constant 0 : index
    %c127 = arith.constant 127 : index
    %28 = vector.load %arg12[%c0_24, %c127] : memref<32x512xf32, #tpu.memory_space<vmem>>, vector<10x256xf32>
    %c3 = arith.constant 3 : index
    %c0_25 = arith.constant 0 : index
    %29 = vector.load %arg1[%c3, %c0_25] : memref<9x256xf32, #tpu.memory_space<vmem>>, vector<1x256xf32>
    %30 = vector.broadcast %29 : vector<1x256xf32> to vector<10x256xf32>
    %31 = arith.mulf %28, %30 : vector<10x256xf32>
    %c3_26 = arith.constant 3 : index
    %c0_27 = arith.constant 0 : index
    %c0_28 = arith.constant 0 : index
    %32 = vector.load %arg3[%c3_26, %c0_27, %c0_28] : memref<9x32x10xf32, #tpu.memory_space<vmem>>, vector<1x32x10xf32>
    %33 = vector.shape_cast %32 : vector<1x32x10xf32> to vector<32x10xf32>
    %cst_29 = arith.constant dense<0.000000e+00> : vector<32x256xf32>
    %34 = tpu.matmul %33, %31, %cst_29 {dimension_numbers = #tpu.dot_dimension_numbers<[1], [0], [0], [1], [0, 0, 1, 1], [], []>} : vector<32x10xf32>, vector<10x256xf32>, vector<32x256xf32> -> vector<32x256xf32>
    %35 = arith.addf %27, %34 : vector<32x256xf32>
    %c0_30 = arith.constant 0 : index
    %c128_31 = arith.constant 128 : index
    %36 = vector.load %arg12[%c0_30, %c128_31] : memref<32x512xf32, #tpu.memory_space<vmem>>, vector<10x256xf32>
    %c4 = arith.constant 4 : index
    %c0_32 = arith.constant 0 : index
    %37 = vector.load %arg1[%c4, %c0_32] : memref<9x256xf32, #tpu.memory_space<vmem>>, vector<1x256xf32>
    %38 = vector.broadcast %37 : vector<1x256xf32> to vector<10x256xf32>
    %39 = arith.mulf %36, %38 : vector<10x256xf32>
    %c4_33 = arith.constant 4 : index
    %c0_34 = arith.constant 0 : index
    %c0_35 = arith.constant 0 : index
    %40 = vector.load %arg3[%c4_33, %c0_34, %c0_35] : memref<9x32x10xf32, #tpu.memory_space<vmem>>, vector<1x32x10xf32>
    %41 = vector.shape_cast %40 : vector<1x32x10xf32> to vector<32x10xf32>
    %cst_36 = arith.constant dense<0.000000e+00> : vector<32x256xf32>
    %42 = tpu.matmul %41, %39, %cst_36 {dimension_numbers = #tpu.dot_dimension_numbers<[1], [0], [0], [1], [0, 0, 1, 1], [], []>} : vector<32x10xf32>, vector<10x256xf32>, vector<32x256xf32> -> vector<32x256xf32>
    %43 = arith.addf %35, %42 : vector<32x256xf32>
    %c0_37 = arith.constant 0 : index
    %c129 = arith.constant 129 : index
    %44 = vector.load %arg12[%c0_37, %c129] : memref<32x512xf32, #tpu.memory_space<vmem>>, vector<10x256xf32>
    %c5 = arith.constant 5 : index
    %c0_38 = arith.constant 0 : index
    %45 = vector.load %arg1[%c5, %c0_38] : memref<9x256xf32, #tpu.memory_space<vmem>>, vector<1x256xf32>
    %46 = vector.broadcast %45 : vector<1x256xf32> to vector<10x256xf32>
    %47 = arith.mulf %44, %46 : vector<10x256xf32>
    %c5_39 = arith.constant 5 : index
    %c0_40 = arith.constant 0 : index
    %c0_41 = arith.constant 0 : index
    %48 = vector.load %arg3[%c5_39, %c0_40, %c0_41] : memref<9x32x10xf32, #tpu.memory_space<vmem>>, vector<1x32x10xf32>
    %49 = vector.shape_cast %48 : vector<1x32x10xf32> to vector<32x10xf32>
    %cst_42 = arith.constant dense<0.000000e+00> : vector<32x256xf32>
    %50 = tpu.matmul %49, %47, %cst_42 {dimension_numbers = #tpu.dot_dimension_numbers<[1], [0], [0], [1], [0, 0, 1, 1], [], []>} : vector<32x10xf32>, vector<10x256xf32>, vector<32x256xf32> -> vector<32x256xf32>
    %51 = arith.addf %43, %50 : vector<32x256xf32>
    %c0_43 = arith.constant 0 : index
    %c143 = arith.constant 143 : index
    %52 = vector.load %arg12[%c0_43, %c143] : memref<32x512xf32, #tpu.memory_space<vmem>>, vector<10x256xf32>
    %c6 = arith.constant 6 : index
    %c0_44 = arith.constant 0 : index
    %53 = vector.load %arg1[%c6, %c0_44] : memref<9x256xf32, #tpu.memory_space<vmem>>, vector<1x256xf32>
    %54 = vector.broadcast %53 : vector<1x256xf32> to vector<10x256xf32>
    %55 = arith.mulf %52, %54 : vector<10x256xf32>
    %c6_45 = arith.constant 6 : index
    %c0_46 = arith.constant 0 : index
    %c0_47 = arith.constant 0 : index
    %56 = vector.load %arg3[%c6_45, %c0_46, %c0_47] : memref<9x32x10xf32, #tpu.memory_space<vmem>>, vector<1x32x10xf32>
    %57 = vector.shape_cast %56 : vector<1x32x10xf32> to vector<32x10xf32>
    %cst_48 = arith.constant dense<0.000000e+00> : vector<32x256xf32>
    %58 = tpu.matmul %57, %55, %cst_48 {dimension_numbers = #tpu.dot_dimension_numbers<[1], [0], [0], [1], [0, 0, 1, 1], [], []>} : vector<32x10xf32>, vector<10x256xf32>, vector<32x256xf32> -> vector<32x256xf32>
    %59 = arith.addf %51, %58 : vector<32x256xf32>
    %c0_49 = arith.constant 0 : index
    %c144 = arith.constant 144 : index
    %60 = vector.load %arg12[%c0_49, %c144] : memref<32x512xf32, #tpu.memory_space<vmem>>, vector<10x256xf32>
    %c7 = arith.constant 7 : index
    %c0_50 = arith.constant 0 : index
    %61 = vector.load %arg1[%c7, %c0_50] : memref<9x256xf32, #tpu.memory_space<vmem>>, vector<1x256xf32>
    %62 = vector.broadcast %61 : vector<1x256xf32> to vector<10x256xf32>
    %63 = arith.mulf %60, %62 : vector<10x256xf32>
    %c7_51 = arith.constant 7 : index
    %c0_52 = arith.constant 0 : index
    %c0_53 = arith.constant 0 : index
    %64 = vector.load %arg3[%c7_51, %c0_52, %c0_53] : memref<9x32x10xf32, #tpu.memory_space<vmem>>, vector<1x32x10xf32>
    %65 = vector.shape_cast %64 : vector<1x32x10xf32> to vector<32x10xf32>
    %cst_54 = arith.constant dense<0.000000e+00> : vector<32x256xf32>
    %66 = tpu.matmul %65, %63, %cst_54 {dimension_numbers = #tpu.dot_dimension_numbers<[1], [0], [0], [1], [0, 0, 1, 1], [], []>} : vector<32x10xf32>, vector<10x256xf32>, vector<32x256xf32> -> vector<32x256xf32>
    %67 = arith.addf %59, %66 : vector<32x256xf32>
    %c0_55 = arith.constant 0 : index
    %c145 = arith.constant 145 : index
    %68 = vector.load %arg12[%c0_55, %c145] : memref<32x512xf32, #tpu.memory_space<vmem>>, vector<10x256xf32>
    %c8 = arith.constant 8 : index
    %c0_56 = arith.constant 0 : index
    %69 = vector.load %arg1[%c8, %c0_56] : memref<9x256xf32, #tpu.memory_space<vmem>>, vector<1x256xf32>
    %70 = vector.broadcast %69 : vector<1x256xf32> to vector<10x256xf32>
    %71 = arith.mulf %68, %70 : vector<10x256xf32>
    %c8_57 = arith.constant 8 : index
    %c0_58 = arith.constant 0 : index
    %c0_59 = arith.constant 0 : index
    %72 = vector.load %arg3[%c8_57, %c0_58, %c0_59] : memref<9x32x10xf32, #tpu.memory_space<vmem>>, vector<1x32x10xf32>
    %73 = vector.shape_cast %72 : vector<1x32x10xf32> to vector<32x10xf32>
    %cst_60 = arith.constant dense<0.000000e+00> : vector<32x256xf32>
    %74 = tpu.matmul %73, %71, %cst_60 {dimension_numbers = #tpu.dot_dimension_numbers<[1], [0], [0], [1], [0, 0, 1, 1], [], []>} : vector<32x10xf32>, vector<10x256xf32>, vector<32x256xf32> -> vector<32x256xf32>
    %75 = arith.addf %67, %74 : vector<32x256xf32>
    %c0_61 = arith.constant 0 : index
    %c0_62 = arith.constant 0 : index
    %76 = vector.load %arg4[%c0_61, %c0_62] : memref<32x1xf32, #tpu.memory_space<vmem>>, vector<32x1xf32>
    %77 = vector.broadcast %76 : vector<32x1xf32> to vector<32x256xf32>
    %78 = arith.addf %75, %77 : vector<32x256xf32>
    %c0_63 = arith.constant 0 : index
    %c0_64 = arith.constant 0 : index
    %79 = memref.load %arg5[%c0_63, %c0_64] : memref<1x1xf32, #tpu.memory_space<smem>>
    %cst_65 = arith.constant 0.000000e+00 : f32
    %80 = vector.broadcast %cst_65 : f32 to vector<32x256xf32>
    %81 = arith.cmpf ogt, %78, %80 : vector<32x256xf32>
    %82 = vector.broadcast %79 : f32 to vector<32x256xf32>
    %83 = arith.mulf %82, %78 : vector<32x256xf32>
    %84 = arith.select %81, %78, %83 : vector<32x256xi1>, vector<32x256xf32>
    %c0_66 = arith.constant 0 : index
    %c128_67 = arith.constant 128 : index
    %85 = vector.load %arg12[%c0_66, %c128_67] : memref<32x512xf32, #tpu.memory_space<vmem>>, vector<32x256xf32>
    tpu.vector_store %arg12[%c0_66, %c128_67], %84 {strides = array<i32>} : memref<32x512xf32, #tpu.memory_space<vmem>>, vector<32x256xf32>,
    %c0_68 = arith.constant 0 : index
    %c111_69 = arith.constant 111 : index
    %86 = vector.load %arg12[%c0_68, %c111_69] : memref<32x512xf32, #tpu.memory_space<vmem>>, vector<32x256xf32>
    %c0_70 = arith.constant 0 : index
    %c0_71 = arith.constant 0 : index
    %87 = vector.load %arg1[%c0_70, %c0_71] : memref<9x256xf32, #tpu.memory_space<vmem>>, vector<1x256xf32>
    %88 = vector.broadcast %87 : vector<1x256xf32> to vector<32x256xf32>
    %89 = arith.mulf %86, %88 : vector<32x256xf32>
    %c0_72 = arith.constant 0 : index
    %c0_73 = arith.constant 0 : index
    %c0_74 = arith.constant 0 : index
    %90 = vector.load %arg6[%c0_72, %c0_73, %c0_74] : memref<9x32x32xf32, #tpu.memory_space<vmem>>, vector<1x32x32xf32>
    %91 = vector.shape_cast %90 : vector<1x32x32xf32> to vector<32x32xf32>
    %cst_75 = arith.constant dense<0.000000e+00> : vector<32x256xf32>
    %92 = tpu.matmul %91, %89, %cst_75 {dimension_numbers = #tpu.dot_dimension_numbers<[1], [0], [0], [1], [0, 0, 1, 1], [], []>} : vector<32x32xf32>, vector<32x256xf32>, vector<32x256xf32> -> vector<32x256xf32>
    %c0_76 = arith.constant 0 : index
    %c112_77 = arith.constant 112 : index
    %93 = vector.load %arg12[%c0_76, %c112_77] : memref<32x512xf32, #tpu.memory_space<vmem>>, vector<32x256xf32>
    %c1_78 = arith.constant 1 : index
    %c0_79 = arith.constant 0 : index
    %94 = vector.load %arg1[%c1_78, %c0_79] : memref<9x256xf32, #tpu.memory_space<vmem>>, vector<1x256xf32>
    %95 = vector.broadcast %94 : vector<1x256xf32> to vector<32x256xf32>
    %96 = arith.mulf %93, %95 : vector<32x256xf32>
    %c1_80 = arith.constant 1 : index
    %c0_81 = arith.constant 0 : index
    %c0_82 = arith.constant 0 : index
    %97 = vector.load %arg6[%c1_80, %c0_81, %c0_82] : memref<9x32x32xf32, #tpu.memory_space<vmem>>, vector<1x32x32xf32>
    %98 = vector.shape_cast %97 : vector<1x32x32xf32> to vector<32x32xf32>
    %cst_83 = arith.constant dense<0.000000e+00> : vector<32x256xf32>
    %99 = tpu.matmul %98, %96, %cst_83 {dimension_numbers = #tpu.dot_dimension_numbers<[1], [0], [0], [1], [0, 0, 1, 1], [], []>} : vector<32x32xf32>, vector<32x256xf32>, vector<32x256xf32> -> vector<32x256xf32>
    %100 = arith.addf %92, %99 : vector<32x256xf32>
    %c0_84 = arith.constant 0 : index
    %c113_85 = arith.constant 113 : index
    %101 = vector.load %arg12[%c0_84, %c113_85] : memref<32x512xf32, #tpu.memory_space<vmem>>, vector<32x256xf32>
    %c2_86 = arith.constant 2 : index
    %c0_87 = arith.constant 0 : index
    %102 = vector.load %arg1[%c2_86, %c0_87] : memref<9x256xf32, #tpu.memory_space<vmem>>, vector<1x256xf32>
    %103 = vector.broadcast %102 : vector<1x256xf32> to vector<32x256xf32>
    %104 = arith.mulf %101, %103 : vector<32x256xf32>
    %c2_88 = arith.constant 2 : index
    %c0_89 = arith.constant 0 : index
    %c0_90 = arith.constant 0 : index
    %105 = vector.load %arg6[%c2_88, %c0_89, %c0_90] : memref<9x32x32xf32, #tpu.memory_space<vmem>>, vector<1x32x32xf32>
    %106 = vector.shape_cast %105 : vector<1x32x32xf32> to vector<32x32xf32>
    %cst_91 = arith.constant dense<0.000000e+00> : vector<32x256xf32>
    %107 = tpu.matmul %106, %104, %cst_91 {dimension_numbers = #tpu.dot_dimension_numbers<[1], [0], [0], [1], [0, 0, 1, 1], [], []>} : vector<32x32xf32>, vector<32x256xf32>, vector<32x256xf32> -> vector<32x256xf32>
    %108 = arith.addf %100, %107 : vector<32x256xf32>
    %c0_92 = arith.constant 0 : index
    %c127_93 = arith.constant 127 : index
    %109 = vector.load %arg12[%c0_92, %c127_93] : memref<32x512xf32, #tpu.memory_space<vmem>>, vector<32x256xf32>
    %c3_94 = arith.constant 3 : index
    %c0_95 = arith.constant 0 : index
    %110 = vector.load %arg1[%c3_94, %c0_95] : memref<9x256xf32, #tpu.memory_space<vmem>>, vector<1x256xf32>
    %111 = vector.broadcast %110 : vector<1x256xf32> to vector<32x256xf32>
    %112 = arith.mulf %109, %111 : vector<32x256xf32>
    %c3_96 = arith.constant 3 : index
    %c0_97 = arith.constant 0 : index
    %c0_98 = arith.constant 0 : index
    %113 = vector.load %arg6[%c3_96, %c0_97, %c0_98] : memref<9x32x32xf32, #tpu.memory_space<vmem>>, vector<1x32x32xf32>
    %114 = vector.shape_cast %113 : vector<1x32x32xf32> to vector<32x32xf32>
    %cst_99 = arith.constant dense<0.000000e+00> : vector<32x256xf32>
    %115 = tpu.matmul %114, %112, %cst_99 {dimension_numbers = #tpu.dot_dimension_numbers<[1], [0], [0], [1], [0, 0, 1, 1], [], []>} : vector<32x32xf32>, vector<32x256xf32>, vector<32x256xf32> -> vector<32x256xf32>
    %116 = arith.addf %108, %115 : vector<32x256xf32>
    %c0_100 = arith.constant 0 : index
    %c128_101 = arith.constant 128 : index
    %117 = vector.load %arg12[%c0_100, %c128_101] : memref<32x512xf32, #tpu.memory_space<vmem>>, vector<32x256xf32>
    %c4_102 = arith.constant 4 : index
    %c0_103 = arith.constant 0 : index
    %118 = vector.load %arg1[%c4_102, %c0_103] : memref<9x256xf32, #tpu.memory_space<vmem>>, vector<1x256xf32>
    %119 = vector.broadcast %118 : vector<1x256xf32> to vector<32x256xf32>
    %120 = arith.mulf %117, %119 : vector<32x256xf32>
    %c4_104 = arith.constant 4 : index
    %c0_105 = arith.constant 0 : index
    %c0_106 = arith.constant 0 : index
    %121 = vector.load %arg6[%c4_104, %c0_105, %c0_106] : memref<9x32x32xf32, #tpu.memory_space<vmem>>, vector<1x32x32xf32>
    %122 = vector.shape_cast %121 : vector<1x32x32xf32> to vector<32x32xf32>
    %cst_107 = arith.constant dense<0.000000e+00> : vector<32x256xf32>
    %123 = tpu.matmul %122, %120, %cst_107 {dimension_numbers = #tpu.dot_dimension_numbers<[1], [0], [0], [1], [0, 0, 1, 1], [], []>} : vector<32x32xf32>, vector<32x256xf32>, vector<32x256xf32> -> vector<32x256xf32>
    %124 = arith.addf %116, %123 : vector<32x256xf32>
    %c0_108 = arith.constant 0 : index
    %c129_109 = arith.constant 129 : index
    %125 = vector.load %arg12[%c0_108, %c129_109] : memref<32x512xf32, #tpu.memory_space<vmem>>, vector<32x256xf32>
    %c5_110 = arith.constant 5 : index
    %c0_111 = arith.constant 0 : index
    %126 = vector.load %arg1[%c5_110, %c0_111] : memref<9x256xf32, #tpu.memory_space<vmem>>, vector<1x256xf32>
    %127 = vector.broadcast %126 : vector<1x256xf32> to vector<32x256xf32>
    %128 = arith.mulf %125, %127 : vector<32x256xf32>
    %c5_112 = arith.constant 5 : index
    %c0_113 = arith.constant 0 : index
    %c0_114 = arith.constant 0 : index
    %129 = vector.load %arg6[%c5_112, %c0_113, %c0_114] : memref<9x32x32xf32, #tpu.memory_space<vmem>>, vector<1x32x32xf32>
    %130 = vector.shape_cast %129 : vector<1x32x32xf32> to vector<32x32xf32>
    %cst_115 = arith.constant dense<0.000000e+00> : vector<32x256xf32>
    %131 = tpu.matmul %130, %128, %cst_115 {dimension_numbers = #tpu.dot_dimension_numbers<[1], [0], [0], [1], [0, 0, 1, 1], [], []>} : vector<32x32xf32>, vector<32x256xf32>, vector<32x256xf32> -> vector<32x256xf32>
    %132 = arith.addf %124, %131 : vector<32x256xf32>
    %c0_116 = arith.constant 0 : index
    %c143_117 = arith.constant 143 : index
    %133 = vector.load %arg12[%c0_116, %c143_117] : memref<32x512xf32, #tpu.memory_space<vmem>>, vector<32x256xf32>
    %c6_118 = arith.constant 6 : index
    %c0_119 = arith.constant 0 : index
    %134 = vector.load %arg1[%c6_118, %c0_119] : memref<9x256xf32, #tpu.memory_space<vmem>>, vector<1x256xf32>
    %135 = vector.broadcast %134 : vector<1x256xf32> to vector<32x256xf32>
    %136 = arith.mulf %133, %135 : vector<32x256xf32>
    %c6_120 = arith.constant 6 : index
    %c0_121 = arith.constant 0 : index
    %c0_122 = arith.constant 0 : index
    %137 = vector.load %arg6[%c6_120, %c0_121, %c0_122] : memref<9x32x32xf32, #tpu.memory_space<vmem>>, vector<1x32x32xf32>
    %138 = vector.shape_cast %137 : vector<1x32x32xf32> to vector<32x32xf32>
    %cst_123 = arith.constant dense<0.000000e+00> : vector<32x256xf32>
    %139 = tpu.matmul %138, %136, %cst_123 {dimension_numbers = #tpu.dot_dimension_numbers<[1], [0], [0], [1], [0, 0, 1, 1], [], []>} : vector<32x32xf32>, vector<32x256xf32>, vector<32x256xf32> -> vector<32x256xf32>
    %140 = arith.addf %132, %139 : vector<32x256xf32>
    %c0_124 = arith.constant 0 : index
    %c144_125 = arith.constant 144 : index
    %141 = vector.load %arg12[%c0_124, %c144_125] : memref<32x512xf32, #tpu.memory_space<vmem>>, vector<32x256xf32>
    %c7_126 = arith.constant 7 : index
    %c0_127 = arith.constant 0 : index
    %142 = vector.load %arg1[%c7_126, %c0_127] : memref<9x256xf32, #tpu.memory_space<vmem>>, vector<1x256xf32>
    %143 = vector.broadcast %142 : vector<1x256xf32> to vector<32x256xf32>
    %144 = arith.mulf %141, %143 : vector<32x256xf32>
    %c7_128 = arith.constant 7 : index
    %c0_129 = arith.constant 0 : index
    %c0_130 = arith.constant 0 : index
    %145 = vector.load %arg6[%c7_128, %c0_129, %c0_130] : memref<9x32x32xf32, #tpu.memory_space<vmem>>, vector<1x32x32xf32>
    %146 = vector.shape_cast %145 : vector<1x32x32xf32> to vector<32x32xf32>
    %cst_131 = arith.constant dense<0.000000e+00> : vector<32x256xf32>
    %147 = tpu.matmul %146, %144, %cst_131 {dimension_numbers = #tpu.dot_dimension_numbers<[1], [0], [0], [1], [0, 0, 1, 1], [], []>} : vector<32x32xf32>, vector<32x256xf32>, vector<32x256xf32> -> vector<32x256xf32>
    %148 = arith.addf %140, %147 : vector<32x256xf32>
    %c0_132 = arith.constant 0 : index
    %c145_133 = arith.constant 145 : index
    %149 = vector.load %arg12[%c0_132, %c145_133] : memref<32x512xf32, #tpu.memory_space<vmem>>, vector<32x256xf32>
    %c8_134 = arith.constant 8 : index
    %c0_135 = arith.constant 0 : index
    %150 = vector.load %arg1[%c8_134, %c0_135] : memref<9x256xf32, #tpu.memory_space<vmem>>, vector<1x256xf32>
    %151 = vector.broadcast %150 : vector<1x256xf32> to vector<32x256xf32>
    %152 = arith.mulf %149, %151 : vector<32x256xf32>
    %c8_136 = arith.constant 8 : index
    %c0_137 = arith.constant 0 : index
    %c0_138 = arith.constant 0 : index
    %153 = vector.load %arg6[%c8_136, %c0_137, %c0_138] : memref<9x32x32xf32, #tpu.memory_space<vmem>>, vector<1x32x32xf32>
    %154 = vector.shape_cast %153 : vector<1x32x32xf32> to vector<32x32xf32>
    %cst_139 = arith.constant dense<0.000000e+00> : vector<32x256xf32>
    %155 = tpu.matmul %154, %152, %cst_139 {dimension_numbers = #tpu.dot_dimension_numbers<[1], [0], [0], [1], [0, 0, 1, 1], [], []>} : vector<32x32xf32>, vector<32x256xf32>, vector<32x256xf32> -> vector<32x256xf32>
    %156 = arith.addf %148, %155 : vector<32x256xf32>
    %c0_140 = arith.constant 0 : index
    %c0_141 = arith.constant 0 : index
    %157 = vector.load %arg7[%c0_140, %c0_141] : memref<32x1xf32, #tpu.memory_space<vmem>>, vector<32x1xf32>
    %158 = vector.broadcast %157 : vector<32x1xf32> to vector<32x256xf32>
    %159 = arith.addf %156, %158 : vector<32x256xf32>
    %c0_142 = arith.constant 0 : index
    %c0_143 = arith.constant 0 : index
    %160 = memref.load %arg8[%c0_142, %c0_143] : memref<1x1xf32, #tpu.memory_space<smem>>
    %cst_144 = arith.constant 0.000000e+00 : f32
    %161 = vector.broadcast %cst_144 : f32 to vector<32x256xf32>
    %162 = arith.cmpf ogt, %159, %161 : vector<32x256xf32>
    %163 = vector.broadcast %160 : f32 to vector<32x256xf32>
    %164 = arith.mulf %163, %159 : vector<32x256xf32>
    %165 = arith.select %162, %159, %164 : vector<32x256xi1>, vector<32x256xf32>
    %c0_145 = arith.constant 0 : index
    %c128_146 = arith.constant 128 : index
    %166 = vector.load %arg12[%c0_145, %c128_146] : memref<32x512xf32, #tpu.memory_space<vmem>>, vector<32x256xf32>
    tpu.vector_store %arg12[%c0_145, %c128_146], %165 {strides = array<i32>} : memref<32x512xf32, #tpu.memory_space<vmem>>, vector<32x256xf32>,
    %c0_147 = arith.constant 0 : index
    %c111_148 = arith.constant 111 : index
    %167 = vector.load %arg12[%c0_147, %c111_148] : memref<32x512xf32, #tpu.memory_space<vmem>>, vector<32x256xf32>
    %c0_149 = arith.constant 0 : index
    %c0_150 = arith.constant 0 : index
    %168 = vector.load %arg1[%c0_149, %c0_150] : memref<9x256xf32, #tpu.memory_space<vmem>>, vector<1x256xf32>
    %169 = vector.broadcast %168 : vector<1x256xf32> to vector<32x256xf32>
    %170 = arith.mulf %167, %169 : vector<32x256xf32>
    %c0_151 = arith.constant 0 : index
    %c0_152 = arith.constant 0 : index
    %c0_153 = arith.constant 0 : index
    %171 = vector.load %arg9[%c0_151, %c0_152, %c0_153] : memref<9x8x32xf32, #tpu.memory_space<vmem>>, vector<1x8x32xf32>
    %172 = vector.shape_cast %171 : vector<1x8x32xf32> to vector<8x32xf32>
    %cst_154 = arith.constant dense<0.000000e+00> : vector<8x256xf32>
    %173 = tpu.matmul %172, %170, %cst_154 {dimension_numbers = #tpu.dot_dimension_numbers<[1], [0], [0], [1], [0, 0, 1, 1], [], []>} : vector<8x32xf32>, vector<32x256xf32>, vector<8x256xf32> -> vector<8x256xf32>
    %c0_155 = arith.constant 0 : index
    %c112_156 = arith.constant 112 : index
    %174 = vector.load %arg12[%c0_155, %c112_156] : memref<32x512xf32, #tpu.memory_space<vmem>>, vector<32x256xf32>
    %c1_157 = arith.constant 1 : index
    %c0_158 = arith.constant 0 : index
    %175 = vector.load %arg1[%c1_157, %c0_158] : memref<9x256xf32, #tpu.memory_space<vmem>>, vector<1x256xf32>
    %176 = vector.broadcast %175 : vector<1x256xf32> to vector<32x256xf32>
    %177 = arith.mulf %174, %176 : vector<32x256xf32>
    %c1_159 = arith.constant 1 : index
    %c0_160 = arith.constant 0 : index
    %c0_161 = arith.constant 0 : index
    %178 = vector.load %arg9[%c1_159, %c0_160, %c0_161] : memref<9x8x32xf32, #tpu.memory_space<vmem>>, vector<1x8x32xf32>
    %179 = vector.shape_cast %178 : vector<1x8x32xf32> to vector<8x32xf32>
    %cst_162 = arith.constant dense<0.000000e+00> : vector<8x256xf32>
    %180 = tpu.matmul %179, %177, %cst_162 {dimension_numbers = #tpu.dot_dimension_numbers<[1], [0], [0], [1], [0, 0, 1, 1], [], []>} : vector<8x32xf32>, vector<32x256xf32>, vector<8x256xf32> -> vector<8x256xf32>
    %181 = arith.addf %173, %180 : vector<8x256xf32>
    %c0_163 = arith.constant 0 : index
    %c113_164 = arith.constant 113 : index
    %182 = vector.load %arg12[%c0_163, %c113_164] : memref<32x512xf32, #tpu.memory_space<vmem>>, vector<32x256xf32>
    %c2_165 = arith.constant 2 : index
    %c0_166 = arith.constant 0 : index
    %183 = vector.load %arg1[%c2_165, %c0_166] : memref<9x256xf32, #tpu.memory_space<vmem>>, vector<1x256xf32>
    %184 = vector.broadcast %183 : vector<1x256xf32> to vector<32x256xf32>
    %185 = arith.mulf %182, %184 : vector<32x256xf32>
    %c2_167 = arith.constant 2 : index
    %c0_168 = arith.constant 0 : index
    %c0_169 = arith.constant 0 : index
    %186 = vector.load %arg9[%c2_167, %c0_168, %c0_169] : memref<9x8x32xf32, #tpu.memory_space<vmem>>, vector<1x8x32xf32>
    %187 = vector.shape_cast %186 : vector<1x8x32xf32> to vector<8x32xf32>
    %cst_170 = arith.constant dense<0.000000e+00> : vector<8x256xf32>
    %188 = tpu.matmul %187, %185, %cst_170 {dimension_numbers = #tpu.dot_dimension_numbers<[1], [0], [0], [1], [0, 0, 1, 1], [], []>} : vector<8x32xf32>, vector<32x256xf32>, vector<8x256xf32> -> vector<8x256xf32>
    %189 = arith.addf %181, %188 : vector<8x256xf32>
    %c0_171 = arith.constant 0 : index
    %c127_172 = arith.constant 127 : index
    %190 = vector.load %arg12[%c0_171, %c127_172] : memref<32x512xf32, #tpu.memory_space<vmem>>, vector<32x256xf32>
    %c3_173 = arith.constant 3 : index
    %c0_174 = arith.constant 0 : index
    %191 = vector.load %arg1[%c3_173, %c0_174] : memref<9x256xf32, #tpu.memory_space<vmem>>, vector<1x256xf32>
    %192 = vector.broadcast %191 : vector<1x256xf32> to vector<32x256xf32>
    %193 = arith.mulf %190, %192 : vector<32x256xf32>
    %c3_175 = arith.constant 3 : index
    %c0_176 = arith.constant 0 : index
    %c0_177 = arith.constant 0 : index
    %194 = vector.load %arg9[%c3_175, %c0_176, %c0_177] : memref<9x8x32xf32, #tpu.memory_space<vmem>>, vector<1x8x32xf32>
    %195 = vector.shape_cast %194 : vector<1x8x32xf32> to vector<8x32xf32>
    %cst_178 = arith.constant dense<0.000000e+00> : vector<8x256xf32>
    %196 = tpu.matmul %195, %193, %cst_178 {dimension_numbers = #tpu.dot_dimension_numbers<[1], [0], [0], [1], [0, 0, 1, 1], [], []>} : vector<8x32xf32>, vector<32x256xf32>, vector<8x256xf32> -> vector<8x256xf32>
    %197 = arith.addf %189, %196 : vector<8x256xf32>
    %c0_179 = arith.constant 0 : index
    %c128_180 = arith.constant 128 : index
    %198 = vector.load %arg12[%c0_179, %c128_180] : memref<32x512xf32, #tpu.memory_space<vmem>>, vector<32x256xf32>
    %c4_181 = arith.constant 4 : index
    %c0_182 = arith.constant 0 : index
    %199 = vector.load %arg1[%c4_181, %c0_182] : memref<9x256xf32, #tpu.memory_space<vmem>>, vector<1x256xf32>
    %200 = vector.broadcast %199 : vector<1x256xf32> to vector<32x256xf32>
    %201 = arith.mulf %198, %200 : vector<32x256xf32>
    %c4_183 = arith.constant 4 : index
    %c0_184 = arith.constant 0 : index
    %c0_185 = arith.constant 0 : index
    %202 = vector.load %arg9[%c4_183, %c0_184, %c0_185] : memref<9x8x32xf32, #tpu.memory_space<vmem>>, vector<1x8x32xf32>
    %203 = vector.shape_cast %202 : vector<1x8x32xf32> to vector<8x32xf32>
    %cst_186 = arith.constant dense<0.000000e+00> : vector<8x256xf32>
    %204 = tpu.matmul %203, %201, %cst_186 {dimension_numbers = #tpu.dot_dimension_numbers<[1], [0], [0], [1], [0, 0, 1, 1], [], []>} : vector<8x32xf32>, vector<32x256xf32>, vector<8x256xf32> -> vector<8x256xf32>
    %205 = arith.addf %197, %204 : vector<8x256xf32>
    %c0_187 = arith.constant 0 : index
    %c129_188 = arith.constant 129 : index
    %206 = vector.load %arg12[%c0_187, %c129_188] : memref<32x512xf32, #tpu.memory_space<vmem>>, vector<32x256xf32>
    %c5_189 = arith.constant 5 : index
    %c0_190 = arith.constant 0 : index
    %207 = vector.load %arg1[%c5_189, %c0_190] : memref<9x256xf32, #tpu.memory_space<vmem>>, vector<1x256xf32>
    %208 = vector.broadcast %207 : vector<1x256xf32> to vector<32x256xf32>
    %209 = arith.mulf %206, %208 : vector<32x256xf32>
    %c5_191 = arith.constant 5 : index
    %c0_192 = arith.constant 0 : index
    %c0_193 = arith.constant 0 : index
    %210 = vector.load %arg9[%c5_191, %c0_192, %c0_193] : memref<9x8x32xf32, #tpu.memory_space<vmem>>, vector<1x8x32xf32>
    %211 = vector.shape_cast %210 : vector<1x8x32xf32> to vector<8x32xf32>
    %cst_194 = arith.constant dense<0.000000e+00> : vector<8x256xf32>
    %212 = tpu.matmul %211, %209, %cst_194 {dimension_numbers = #tpu.dot_dimension_numbers<[1], [0], [0], [1], [0, 0, 1, 1], [], []>} : vector<8x32xf32>, vector<32x256xf32>, vector<8x256xf32> -> vector<8x256xf32>
    %213 = arith.addf %205, %212 : vector<8x256xf32>
    %c0_195 = arith.constant 0 : index
    %c143_196 = arith.constant 143 : index
    %214 = vector.load %arg12[%c0_195, %c143_196] : memref<32x512xf32, #tpu.memory_space<vmem>>, vector<32x256xf32>
    %c6_197 = arith.constant 6 : index
    %c0_198 = arith.constant 0 : index
    %215 = vector.load %arg1[%c6_197, %c0_198] : memref<9x256xf32, #tpu.memory_space<vmem>>, vector<1x256xf32>
    %216 = vector.broadcast %215 : vector<1x256xf32> to vector<32x256xf32>
    %217 = arith.mulf %214, %216 : vector<32x256xf32>
    %c6_199 = arith.constant 6 : index
    %c0_200 = arith.constant 0 : index
    %c0_201 = arith.constant 0 : index
    %218 = vector.load %arg9[%c6_199, %c0_200, %c0_201] : memref<9x8x32xf32, #tpu.memory_space<vmem>>, vector<1x8x32xf32>
    %219 = vector.shape_cast %218 : vector<1x8x32xf32> to vector<8x32xf32>
    %cst_202 = arith.constant dense<0.000000e+00> : vector<8x256xf32>
    %220 = tpu.matmul %219, %217, %cst_202 {dimension_numbers = #tpu.dot_dimension_numbers<[1], [0], [0], [1], [0, 0, 1, 1], [], []>} : vector<8x32xf32>, vector<32x256xf32>, vector<8x256xf32> -> vector<8x256xf32>
    %221 = arith.addf %213, %220 : vector<8x256xf32>
    %c0_203 = arith.constant 0 : index
    %c144_204 = arith.constant 144 : index
    %222 = vector.load %arg12[%c0_203, %c144_204] : memref<32x512xf32, #tpu.memory_space<vmem>>, vector<32x256xf32>
    %c7_205 = arith.constant 7 : index
    %c0_206 = arith.constant 0 : index
    %223 = vector.load %arg1[%c7_205, %c0_206] : memref<9x256xf32, #tpu.memory_space<vmem>>, vector<1x256xf32>
    %224 = vector.broadcast %223 : vector<1x256xf32> to vector<32x256xf32>
    %225 = arith.mulf %222, %224 : vector<32x256xf32>
    %c7_207 = arith.constant 7 : index
    %c0_208 = arith.constant 0 : index
    %c0_209 = arith.constant 0 : index
    %226 = vector.load %arg9[%c7_207, %c0_208, %c0_209] : memref<9x8x32xf32, #tpu.memory_space<vmem>>, vector<1x8x32xf32>
    %227 = vector.shape_cast %226 : vector<1x8x32xf32> to vector<8x32xf32>
    %cst_210 = arith.constant dense<0.000000e+00> : vector<8x256xf32>
    %228 = tpu.matmul %227, %225, %cst_210 {dimension_numbers = #tpu.dot_dimension_numbers<[1], [0], [0], [1], [0, 0, 1, 1], [], []>} : vector<8x32xf32>, vector<32x256xf32>, vector<8x256xf32> -> vector<8x256xf32>
    %229 = arith.addf %221, %228 : vector<8x256xf32>
    %c0_211 = arith.constant 0 : index
    %c145_212 = arith.constant 145 : index
    %230 = vector.load %arg12[%c0_211, %c145_212] : memref<32x512xf32, #tpu.memory_space<vmem>>, vector<32x256xf32>
    %c8_213 = arith.constant 8 : index
    %c0_214 = arith.constant 0 : index
    %231 = vector.load %arg1[%c8_213, %c0_214] : memref<9x256xf32, #tpu.memory_space<vmem>>, vector<1x256xf32>
    %232 = vector.broadcast %231 : vector<1x256xf32> to vector<32x256xf32>
    %233 = arith.mulf %230, %232 : vector<32x256xf32>
    %c8_215 = arith.constant 8 : index
    %c0_216 = arith.constant 0 : index
    %c0_217 = arith.constant 0 : index
    %234 = vector.load %arg9[%c8_215, %c0_216, %c0_217] : memref<9x8x32xf32, #tpu.memory_space<vmem>>, vector<1x8x32xf32>
    %235 = vector.shape_cast %234 : vector<1x8x32xf32> to vector<8x32xf32>
    %cst_218 = arith.constant dense<0.000000e+00> : vector<8x256xf32>
    %236 = tpu.matmul %235, %233, %cst_218 {dimension_numbers = #tpu.dot_dimension_numbers<[1], [0], [0], [1], [0, 0, 1, 1], [], []>} : vector<8x32xf32>, vector<32x256xf32>, vector<8x256xf32> -> vector<8x256xf32>
    %237 = arith.addf %229, %236 : vector<8x256xf32>
    %c0_219 = arith.constant 0 : index
    %c0_220 = arith.constant 0 : index
    %238 = vector.load %arg10[%c0_219, %c0_220] : memref<8x1xf32, #tpu.memory_space<vmem>>, vector<8x1xf32>
    %239 = vector.broadcast %238 : vector<8x1xf32> to vector<8x256xf32>
    %240 = arith.addf %237, %239 : vector<8x256xf32>
    %c0_221 = arith.constant 0 : index
    %c0_222 = arith.constant 0 : index
    %241 = vector.load %arg11[%c0_221, %c0_222] : memref<8x256xf32, #tpu.memory_space<vmem>>, vector<8x256xf32>
    tpu.vector_store %arg11[%c0_221, %c0_222], %240 {strides = array<i32>} : memref<8x256xf32, #tpu.memory_space<vmem>>, vector<8x256xf32>,
    return
  }
  func.func @transform_0(%arg0: i32) -> (i32, i32) {
    %c0_i32 = arith.constant 0 : i32
    %c0_i32_0 = arith.constant 0 : i32
    return %c0_i32, %arg0 : i32, i32
  }
  func.func @transform_1(%arg0: i32) -> (i32, i32) {
    %c0_i32 = arith.constant 0 : i32
    %c0_i32_0 = arith.constant 0 : i32
    return %c0_i32, %arg0 : i32, i32
  }
  func.func @transform_2(%arg0: i32) -> (i32, i32, i32) {
    %c0_i32 = arith.constant 0 : i32
    %c0_i32_0 = arith.constant 0 : i32
    %c0_i32_1 = arith.constant 0 : i32
    %c0_i32_2 = arith.constant 0 : i32
    return %c0_i32, %c0_i32_0, %c0_i32_1 : i32, i32, i32
  }
  func.func @transform_3(%arg0: i32) -> (i32, i32) {
    %c0_i32 = arith.constant 0 : i32
    %c0_i32_0 = arith.constant 0 : i32
    %c0_i32_1 = arith.constant 0 : i32
    return %c0_i32, %c0_i32_0 : i32, i32
  }
  func.func @transform_4(%arg0: i32) -> (i32, i32) {
    %c0_i32 = arith.constant 0 : i32
    %c0_i32_0 = arith.constant 0 : i32
    %c0_i32_1 = arith.constant 0 : i32
    return %c0_i32, %c0_i32_0 : i32, i32
  }
  func.func @transform_5(%arg0: i32) -> (i32, i32, i32) {
    %c0_i32 = arith.constant 0 : i32
    %c0_i32_0 = arith.constant 0 : i32
    %c0_i32_1 = arith.constant 0 : i32
    %c0_i32_2 = arith.constant 0 : i32
    return %c0_i32, %c0_i32_0, %c0_i32_1 : i32, i32, i32
  }
  func.func @transform_6(%arg0: i32) -> (i32, i32) {
    %c0_i32 = arith.constant 0 : i32
    %c0_i32_0 = arith.constant 0 : i32
    %c0_i32_1 = arith.constant 0 : i32
    return %c0_i32, %c0_i32_0 : i32, i32
  }
  func.func @transform_7(%arg0: i32) -> (i32, i32) {
    %c0_i32 = arith.constant 0 : i32
    %c0_i32_0 = arith.constant 0 : i32
    %c0_i32_1 = arith.constant 0 : i32
    return %c0_i32, %c0_i32_0 : i32, i32
  }
  func.func @transform_8(%arg0: i32) -> (i32, i32, i32) {
    %c0_i32 = arith.constant 0 : i32
    %c0_i32_0 = arith.constant 0 : i32
    %c0_i32_1 = arith.constant 0 : i32
    %c0_i32_2 = arith.constant 0 : i32
    return %c0_i32, %c0_i32_0, %c0_i32_1 : i32, i32, i32
  }
  func.func @transform_9(%arg0: i32) -> (i32, i32) {
    %c0_i32 = arith.constant 0 : i32
    %c0_i32_0 = arith.constant 0 : i32
    %c0_i32_1 = arith.constant 0 : i32
    return %c0_i32, %c0_i32_0 : i32, i32
  }
  func.func @transform_10(%arg0: i32) -> (i32, i32) {
    %c0_i32 = arith.constant 0 : i32
    %c0_i32_0 = arith.constant 0 : i32
    return %c0_i32, %arg0 : i32, i32
  }
}

</mosaic_0001>

<bundles_post_ra>
// kernel: tpu_custom_call.1
= control target key start
LH: loop header
LB: loop body
LE: loop exit
PB: predicated region body
PF: predicated region fallthrough
CT: control target
= control target key end

     0   :  { %s8046_s0 = inlined_call_operand.vmem [shape: f32[9,512], index: 0, kind: input, shape index: {}]   ;;  %s8047_s1 = inlined_call_operand.vmem [shape: f32[10,512], index: 1, kind: input, shape index: {}]   ;;  %s8048_s2 = inlined_call_operand.vmem [shape: f32[9,32,10], index: 2, kind: input, shape index: {}]   ;;  %s8049_s3 = inlined_call_operand.vmem [shape: f32[32,1], index: 3, kind: input, shape index: {}]   ;;  %s8050_s4 = inlined_call_operand.<no memory space> [shape: f32[1,1], index: 4, kind: input, shape index: {}]   ;;  %s8051_s5 = inlined_call_operand.vmem [shape: f32[9,32,32], index: 5, kind: input, shape index: {}]   ;;  %s8052_s6 = inlined_call_operand.vmem [shape: f32[32,1], index: 6, kind: input, shape index: {}]   ;;  %s8053_s7 = inlined_call_operand.<no memory space> [shape: f32[1,1], index: 7, kind: input, shape index: {}]   ;;  %s8054_s8 = inlined_call_operand.vmem [shape: f32[9,8,32], index: 8, kind: input, shape index: {}]   ;;  %s8055_s9 = inlined_call_operand.vmem [shape: f32[8,1], index: 9, kind: input, shape index: {}]   ;;  %s8056_s10 = inlined_call_operand.hbm [shape: f32[8,512], index: 10, kind: output, shape index: {}]  }
   0x1   :  { %15 = sst [smem:[#allocation3]] %s8050_s4 }
   0x2   :  { %16 = sst [smem:[#allocation4]] %s8053_s7 }
   0x3   :  { %17 = vsyncpa [#allocation8], 0 }
   0x4   :  { %19 = vsyncpa [#allocation8 + $0x1], 0  ;;  %s5683_s17 = smov 0   ;;  %s5685_s18 = smov 0  }
   0x5   :  { %s5687_s19 = smov 0   ;;  %s5689_s20 = smov 0  }
   0x6 LB: > { %s8057_s4 = sadd.s32 4294967295, %s5609_s20   ;;  %s5275_s7 = sadd.s32 4294967294, %s5609_s20   ;;  %s5609_s20 = sphi %s5689_s20, %s8268_s20   ;;  %s5605_s19 = sphi %s5687_s19, %s8267_s19   ;;  %s5601_s18 = sphi %s5685_s18, %s8266_s18   ;;  %s5597_s17 = sphi %s5683_s17, %s8265_s17  }
   0x7   : > { %s5706_s21 = sadd.s32 1, %s5609_s20   ;;  %s32_s22 = sadd.s32 1, %s5605_s19 }
   0x8   : > { %s29_s23 = ssub.s32 %s5609_s20, %s5706_s21  ;;  %p39_p0 = scmp.ne.s32.totalorder %s5605_s19, %s5601_s18 }
   0x9   : > { %p30_p1 = scmp.eq.s32.totalorder %s29_s23, 0  ;;  %p40_p2 = scmp.eq.s32.totalorder %s5609_s20, 0 }
   0xa   : > { %p263_p3 = scmp.eq.s32.totalorder %s8057_s4, 1  ;;  %p268_p4 = scmp.ne.s32.totalorder %s5601_s18, %s5597_s17 }
   0xb   : > { %s5719_s24 = scalar_select %p30_p1, %s5605_s19, %s32_s22  }
   0xc   : > { %p5721_p5 = por %p40_p2, %p39_p0  ;;  %p5725_p6 = por %p263_p3, %p39_p0 }
   0xd   : > { %p269_p7 = scmp.eq.s32.totalorder %s5275_s7, 1  ;;  %p8114_p9 = scmp.ge.s32.totalorder %s5609_s20, 2 }
   0xf   : > { %p5729_p8 = por %p269_p7, %p268_p4  ;;  %309 = sbr.rel (%p8114_p9) target bundleno = 32 (0x20), region = 48 }
  0x14   : > { %312 = sbr.rel (!%p5721_p5) target bundleno = 26 (0x1a), region = 52  ;;  %s314_s28 = sand.u32 (%p5721_p5), 1, %s5605_s19  }
  0x15   : > { %s5488_s29 = sshll.u32 (%p5721_p5), %s5609_s20, 4  ;;  %s5278_s30 = sshll.u32 (%p5721_p5), %s314_s28, 5 }
  0x16   : > { %s319_s13 = scalar_lea.vmem (%p5721_p5), %s8046_s0, %s5488_s29  ;;  %s316_s14 = scalar_lea.vmem (%p5721_p5), [#allocation5], %s5278_s30 }
  0x17   : > { %v332_v0 = vld [vmem:[%s319_s13] sm:$0xff] (%p5721_p5)  ;;  %v334_v1 = vld [vmem:[%s319_s13 + $0x8] sm:$0xff] (%p5721_p5) }
  0x18   : > { %v336_v2 = vld [vmem:[%s319_s13 + $0x20] sm:$0xff] (%p5721_p5)  ;;  %333 = vst [vmem:[%s316_s14] sm:$0xff] (%p5721_p5), %v332_v0  ;;  %335 = vst [vmem:[%s316_s14 + $0x8] sm:$0xff] (%p5721_p5), %v334_v1  ;;  %v338_v3 = vld [vmem:[%s319_s13 + $0x28] sm:$0xff] (%p5721_p5) }
  0x19   : > { %337 = vst [vmem:[%s316_s14 + $0x10] sm:$0xff] %v336_v2  ;;  %339 = vst [vmem:[%s316_s14 + $0x18] sm:$0xff] %v338_v3 }
  0x1a PF: > { %345 = sbr.rel (!%p5721_p5) target bundleno = 32 (0x20), region = 75  ;;  %s347_s15 = sand.u32 (%p5721_p5), 1, %s5605_s19  }
  0x1b   : > { %s5489_s16 = sshll.u32 (%p5721_p5), %s5609_s20, 4  ;;  %s5281_s7 = sshll.u32 (%p5721_p5), %s347_s15, 5 }
  0x1c   : > { %s352_s28 = scalar_lea.vmem (%p5721_p5), %s8047_s1, %s5489_s16  ;;  %s349_s29 = scalar_lea.vmem (%p5721_p5), [#allocation6], %s5281_s7 }
  0x1d   : > { %v365_v4 = vld [vmem:[%s352_s28] sm:$0xff] (%p5721_p5)  ;;  %v367_v5 = vld [vmem:[%s352_s28 + $0x8] sm:$0xff] (%p5721_p5) }
  0x1e   : > { %v369_v6 = vld [vmem:[%s352_s28 + $0x20] sm:$0xff] (%p5721_p5)  ;;  %366 = vst [vmem:[%s349_s29] sm:$0xff] (%p5721_p5), %v365_v4  ;;  %368 = vst [vmem:[%s349_s29 + $0x8] sm:$0xff] (%p5721_p5), %v367_v5  ;;  %v371_v7 = vld [vmem:[%s352_s28 + $0x28] sm:$0xff] (%p5721_p5) }
  0x1f   : > { %370 = vst [vmem:[%s349_s29 + $0x10] sm:$0xff] %v369_v6  ;;  %372 = vst [vmem:[%s349_s29 + $0x18] sm:$0xff] %v371_v7 }
  0x20 PF: > { %p5284_p10 = scmp.ge.s32.totalorder %s5609_s20, 1  ;;  %p377_p11 = scmp.lt.s32.totalorder %s5609_s20, 3 }
  0x22   : > { %p378_p12 = pnand %p5284_p10, %p377_p11 }
  0x24   : > { %381 = sbr.rel (%p378_p12) target bundleno = 1536 (0x600), region = 98 }
  0x29   : > { %s5753_s25 = sand.u32 1, %s5601_s18   ;;  %v459_v8 = vlaneseq  ;;  %v5611_v9 = vmov 0.0   ;;  %s8081_s12 = smov 112   ;;  %vm501_vm0 = vcmask 916480   ;;  %vm471_vm1 = vcmask 908288  }
  0x2a   : > { %s5285_s30 = sshll.u32 %s5753_s25, 5  ;;  %436 = vst [vmem:[#allocation2] sm:$0xff] %v5611_v9  ;;  %440 = vst [vmem:[#allocation2 + $0x50] sm:$0xff] %v5611_v9  ;;  %624 = vmatprep.mubr.f32.mxu0 %v5611_v9  ;;  %642 = vmatprep.mubr.f32.mxu1 %v5611_v9  ;;  %s8066_s13 = smov 111   ;;  %v5620_v4 = vmov 0   ;;  %vm794_vm2 = vcmask 924672  }
  0x2b   : > { %v460_v10 = vshrl.u32 %v459_v8, 7  ;;  %s5760_s11 = scalar_lea.vmem [#allocation5], %s5285_s30  ;;  %s5775_s14 = scalar_lea.vmem [#allocation6], %s5285_s30  ;;  %5545 = vset.pattern.permute.xlu1 %v5620_v4  ;;  %5544 = vset.pattern.permute.xlu0 %v5620_v4  ;;  %vm963_vm3 = vcmask 1039360   ;;  %vm997_vm4 = vcmask 7168   ;;  %vm828_vm5 = vcmask 121856  }
  0x2c   : > { %v5288_v11 = vld [vmem:[%s5760_s11 + $0x1] ss:$8 sm:$0x3]  ;;  %v457_v12 = vld [vmem:[%s5760_s11] ss:$8 sm:$0x3] }
  0x2d   : > { %v5764_v13 = vsub.s32 0, %v460_v10  ;;  %v5766_v14 = vsub.s32 1, %v460_v10  ;;  %v5305_v19 = vld [vmem:[%s5760_s11 + $0x2] ss:$8 sm:$0x3]  ;;  %s8083_s15 = smov 113  }
  0x2e   : > { %v446_v20 = vld [vmem:[%s5775_s14 + $0x18] sm:$0x3]  ;;  %v445_v21 = vld [vmem:[%s5775_s14 + $0x10] sm:$0x3]  ;;  %s5615_s16 = smov 127   ;;  %s8064_s7 = smov 1  }
  0x2f   : > { %8118 = vst [vmem:[#allocation10_spill] sm:$0xff] %v5764_v13  ;;  %8119 = vst [vmem:[#allocation11_spill] sm:$0xff] %v5766_v14  ;;  %v492_v15 = vrot.slane %v5288_v11, %v5764_v13  ;;  %v462_v16 = vrot.slane %v457_v12, %v5764_v13  ;;  %v496_v17 = vrot.slane %v5288_v11, %v5766_v14  ;;  %v5316_v24 = vld [vmem:[%s5760_s11 + $0x3] ss:$8 sm:$0x3]  ;;  %s8062_s22 = smov 15  }
  0x30   : > { %v466_v18 = vrot.slane %v457_v12, %v5766_v14  ;;  %450 = vst [vmem:[#allocation2 + $0x78] sm:$0x3] %v446_v20  ;;  %449 = vst [vmem:[#allocation2 + $0x40] sm:$0x3] %v445_v21  ;;  %v785_v22 = vrot.slane %v5305_v19, %v5764_v13  ;;  %v789_v23 = vrot.slane %v5305_v19, %v5766_v14  ;;  %s8060_s23 = smov 16   ;;  %s8058_s28 = smov 17  }
  0x31   : > { %497 = vrot.lane.b32.xlu0 %v492_v15, %s8081_s12  ;;  %467 = vrot.lane.b32.xlu1 %v462_v16, %s8066_s13  ;;  %v958_v25 = vrot.slane %v5316_v24, %v5766_v14  ;;  %v954_v26 = vrot.slane %v5316_v24, %v5764_v13  ;;  %v5338_v27 = vld [vmem:[%s5760_s11 + $0x5] ss:$8 sm:$0x3]  ;;  %v5349_v30 = vld [vmem:[%s5760_s11 + $0x6] ss:$8 sm:$0x3] }
  0x32   : > { %v1266_v28 = vrot.slane %v5338_v27, %v5764_v13  ;;  %v1270_v29 = vrot.slane %v5338_v27, %v5766_v14  ;;  %v1433_v31 = vrot.slane %v5349_v30, %v5764_v13  ;;  %v1437_v32 = vrot.slane %v5349_v30, %v5766_v14  ;;  %v5360_v33 = vld [vmem:[%s5760_s11 + $0x7] ss:$8 sm:$0x3]  ;;  %v5371_v36 = vld [vmem:[%s5760_s11 + $0x10] ss:$8 sm:$0x3] }
  0x33   : > { %v1604_v34 = vrot.slane %v5360_v33, %v5766_v14  ;;  %v1600_v35 = vrot.slane %v5360_v33, %v5764_v13  ;;  %v1767_v37 = vrot.slane %v5371_v36, %v5764_v13  ;;  %v1771_v38 = vrot.slane %v5371_v36, %v5766_v14  ;;  %v454_v39 = vld [vmem:[#allocation2] sm:$0x3]  ;;  %v5811_v43 = vld [vmem:[%s5775_s14 + $0x8] sm:$0xff]  ;;  %v1259_v20 = vld [vmem:[#allocation2 + $0x50] sm:$0x3]  ;;  %s8120_s4 = smov 1  }
  0x34   : > { %v5840_v3 = vld [vmem:[%s5775_s14] sm:$0xff]  ;;  %vm535_vm6 = vcmask 130048   ;;  %vm667_vm7 = vcmask 138240   ;;  %vm555_vm8 = vcmask 1041408   ;;  %vm542_vm9 = vcmask 80896   ;;  %s1960_s30 = sld [smem:[#allocation3]] }
  0x35   : > { %499 = vrot.lane.b32.xlu0 %v496_v17, %s8081_s12  ;;  %469 = vrot.lane.b32.xlu1 %v466_v18, %s8066_s13  ;;  %s8133_s14 = smov 111   ;;  %s5287_s29 = sshll.u32 %s5753_s25, 4 }
  0x37   : > { %v5813_v44 = vld [vmem:[#allocation2 + $0x78] sm:$0x3]  ;;  %v5833_v63 = vld [vmem:[#allocation2 + $0x40] sm:$0x3] }
  0x38   : > { %v1257_v15 = vld [vmem:[#allocation2 + $0x40] sm:$0x3] }
  0x39   : > { %790 = vrot.lane.b32.xlu0 %v785_v22, %s8083_s15  ;;  %792 = vrot.lane.b32.xlu1 %v789_v23, %s8083_s15 }
  0x3d   : > { %961 = vrot.lane.b32.xlu1 %v958_v25, %s5615_s16  ;;  %959 = vrot.lane.b32.xlu0 %v954_v26, %s5615_s16 }
  0x41   : > { %1271 = vrot.lane.b32.xlu0 %v1266_v28, %s8064_s7  ;;  %1273 = vrot.lane.b32.xlu1 %v1270_v29, %s8064_s7 }
  0x45   : > { %1438 = vrot.lane.b32.xlu0 %v1433_v31, %s8062_s22  ;;  %1440 = vrot.lane.b32.xlu1 %v1437_v32, %s8062_s22 }
  0x49   : > { %1607 = vrot.lane.b32.xlu1 %v1604_v34, %s8060_s23  ;;  %1605 = vrot.lane.b32.xlu0 %v1600_v35, %s8060_s23 }
  0x4d   : > { %1772 = vrot.lane.b32.xlu0 %v1767_v37, %s8058_s28  ;;  %1774 = vrot.lane.b32.xlu1 %v1771_v38, %s8058_s28 }
  0xa3   : > { %v498_v40 = vpop.permute.xlu0 %497  ;;  %v468_v42 = vpop.permute.xlu1 %467 }
  0xa4   : > { %v509_v41 = vmul.f32 %v498_v40, %v454_v39  ;;  %v479_v48 = vmul.f32 %v468_v42, %v454_v39  ;;  %v506_v50 = vmul.f32 0.0, %v498_v40  ;;  %v476_v56 = vmul.f32 0.0, %v468_v42 }
  0xa6   : > { %529 = vrot.lane.b32.xlu0 %v509_v41, %s8060_s23 }
  0xa7   : > { %v500_v45 = vpop.permute.xlu0 %499  ;;  %v470_v49 = vpop.permute.xlu1 %469 }
  0xa8   : > { %v508_v46 = vmul.f32 %v500_v45, %v5811_v43  ;;  %v511_v47 = vmul.f32 %v500_v45, %v5813_v44  ;;  %v481_v51 = vmul.f32 %v470_v49, %v5813_v44  ;;  %v478_v52 = vmul.f32 %v470_v49, %v5811_v43 }
  0xa9   : > { %v502_v0 = vsel %vm501_vm0, %v498_v40, %v500_v45  ;;  %v472_v7 = vsel %vm471_vm1, %v468_v42, %v470_v49  ;;  %v1258_v40 = vld [vmem:[#allocation2 + $0x78] sm:$0x3] }
  0xaa   : > { %527 = vrot.lane.b32.xlu0 %v508_v46, %s8060_s23  ;;  %533 = vrot.lane.b32.xlu1 %v511_v47, %s8060_s23  ;;  %v510_v2 = vmul.f32 %v502_v0, %v5833_v63  ;;  %v507_v6 = vmul.f32 %v502_v0, %v5840_v3  ;;  %v477_v8 = vmul.f32 %v472_v7, %v5840_v3  ;;  %v1928_v0 = vld [vmem:[%s8049_s3] sm:$0xff] }
  0xab   : > { %v793_v53 = vpop.permute.xlu1 %792  ;;  %v791_v55 = vpop.permute.xlu0 %790  ;;  %v480_v17 = vmul.f32 %v472_v7, %v5833_v63 }
  0xac   : > { %v804_v54 = vmul.f32 %v793_v53, %v5813_v44  ;;  %v799_v57 = vmul.f32 0.0, %v791_v55  ;;  %v802_v58 = vmul.f32 %v791_v55, %v454_v39  ;;  %v801_v61 = vmul.f32 %v793_v53, %v5811_v43 }
  0xad   : > { %v795_v11 = vsel %vm794_vm2, %v791_v55, %v793_v53 }
  0xae   : > { %523 = vrot.lane.b32.xlu1 %v506_v50, %s8060_s23  ;;  %661 = vrot.lane.b32.xlu0 %v479_v48, %s8058_s28  ;;  %v803_v16 = vmul.f32 %v795_v11, %v5833_v63  ;;  %v800_v21 = vmul.f32 %v795_v11, %v5840_v3 }
  0xaf   : > { %v962_v59 = vpop.permute.xlu1 %961  ;;  %v960_v62 = vpop.permute.xlu0 %959 }
  0xb0   : > { %v973_v60 = vmul.f32 %v962_v59, %v5813_v44  ;;  %v968_v1 = vmul.f32 0.0, %v960_v62  ;;  %v971_v5 = vmul.f32 %v960_v62, %v454_v39  ;;  %v970_v10 = vmul.f32 %v962_v59, %v5811_v43 }
  0xb1   : > { %v964_v28 = vsel %vm963_vm3, %v960_v62, %v962_v59  ;;  %v1931_v62 = vld [vmem:[%s8049_s3 + $0x18] sm:$0xff] }
  0xb2   : > { %665 = vrot.lane.b32.xlu1 %v481_v51, %s8058_s28  ;;  %659 = vrot.lane.b32.xlu0 %v478_v52, %s8058_s28  ;;  %v972_v30 = vmul.f32 %v964_v28, %v5833_v63  ;;  %v969_v32 = vmul.f32 %v964_v28, %v5840_v3  ;;  %v5939_v28 = vld [vmem:[%s5760_s11 + $0x7] ss:$8 sm:$0x3] }
  0xb3   : > { %v1272_v12 = vpop.permute.xlu0 %1271  ;;  %v1274_v18 = vpop.permute.xlu1 %1273 }
  0xb4   : > { %v1282_v19 = vmul.f32 %v1272_v12, %v1257_v15  ;;  %v1284_v22 = vmul.f32 %v1274_v18, %v1259_v20  ;;  %v1281_v23 = vmul.f32 0.0, %v1274_v18  ;;  %v1279_v27 = vmul.f32 %v1272_v12, %v5840_v3 }
  0xb5   : > { %v1275_v37 = vsel %vm997_vm4, %v1272_v12, %v1274_v18  ;;  %v5422_v18 = vld [vmem:[%s5760_s11 + $0x5] ss:$8 sm:$0x3] }
  0xb6   : > { %655 = vrot.lane.b32.xlu1 %v476_v56, %s8058_s28  ;;  %826 = vrot.lane.b32.xlu0 %v804_v54, %s8062_s22  ;;  %v1280_v39 = vmul.f32 %v1275_v37, %v5811_v43  ;;  %v1283_v42 = vmul.f32 %v1275_v37, %v1258_v40 }
  0xb7   : > { %v1441_v24 = vpop.permute.xlu1 %1440  ;;  %v1439_v26 = vpop.permute.xlu0 %1438 }
  0xb8   : > { %v1451_v25 = vmul.f32 %v1441_v24, %v1259_v20  ;;  %v1446_v29 = vmul.f32 %v1439_v26, %v5840_v3  ;;  %v1449_v33 = vmul.f32 %v1439_v26, %v1257_v15  ;;  %v1448_v35 = vmul.f32 0.0, %v1441_v24 }
  0xb9   : > { %v1442_v41 = vsel %vm828_vm5, %v1439_v26, %v1441_v24  ;;  %v2925_v24 = vrot.slane %v5422_v18, %v5764_v13 }
  0xba   : > { %816 = vrot.lane.b32.xlu1 %v799_v57, %s8062_s22  ;;  %822 = vrot.lane.b32.xlu0 %v802_v58, %s8062_s22  ;;  %v1450_v45 = vmul.f32 %v1442_v41, %v1258_v40  ;;  %v1447_v47 = vmul.f32 %v1442_v41, %v5811_v43 }
  0xbb   : > { %v1608_v31 = vpop.permute.xlu1 %1607  ;;  %v1606_v36 = vpop.permute.xlu0 %1605 }
  0xbc   : > { %v1618_v34 = vmul.f32 %v1608_v31, %v1259_v20  ;;  %v1616_v38 = vmul.f32 %v1606_v36, %v1257_v15  ;;  %v1615_v48 = vmul.f32 0.0, %v1608_v31  ;;  %v1613_v51 = vmul.f32 %v1606_v36, %v5840_v3 }
  0xbd   : > { %v1609_v52 = vsel %vm535_vm6, %v1606_v36, %v1608_v31 }
  0xbe   : > { %820 = vrot.lane.b32.xlu0 %v801_v61, %s8062_s22  ;;  %995 = vrot.lane.b32.xlu1 %v973_v60, %s8064_s7  ;;  %v1614_v54 = vmul.f32 %v1609_v52, %v5811_v43  ;;  %v1617_v56 = vmul.f32 %v1609_v52, %v1258_v40  ;;  %v1930_v61 = vld [vmem:[%s8049_s3 + $0x10] sm:$0xff] }
  0xbf   : > { %v1775_v46 = vpop.permute.xlu1 %1774  ;;  %v1773_v50 = vpop.permute.xlu0 %1772 }
  0xc0   : > { %v1785_v49 = vmul.f32 %v1775_v46, %v1259_v20  ;;  %v1783_v53 = vmul.f32 %v1773_v50, %v1257_v15  ;;  %v1776_v55 = vsel %vm667_vm7, %v1773_v50, %v1775_v46  ;;  %v1782_v58 = vmul.f32 0.0, %v1775_v46  ;;  %v5404_v15 = vld [vmem:[%s5760_s11 + $0x3] ss:$8 sm:$0x3] }
  0xc1   : > { %v1784_v57 = vmul.f32 %v1776_v55, %v1258_v40  ;;  %v1781_v59 = vmul.f32 %v1776_v55, %v5811_v43  ;;  %v1780_v60 = vmul.f32 %v1773_v50, %v5840_v3  ;;  %v5292_v50 = vld [vmem:[%s8048_s2 + $0x38] sm:$0xff] }
  0xc2   : > { %531 = vrot.lane.b32.xlu0 %v510_v2, %s8060_s23  ;;  %985 = vrot.lane.b32.xlu1 %v968_v1, %s8064_s7  ;;  %v1929_v1 = vld [vmem:[%s8049_s3 + $0x8] sm:$0xff] }
  0xc3   : > { %v5382_v2 = vld [vmem:[%s5760_s11 + $0x1] ss:$8 sm:$0x3] }
  0xc4   : > { %v2049_v4 = vrot.slane %v5382_v2, %v5766_v14 }
  0xc6   : > { %991 = vrot.lane.b32.xlu0 %v971_v5, %s8064_s7  ;;  %525 = vrot.lane.b32.xlu1 %v507_v6, %s8060_s23  ;;  %v2045_v5 = vrot.slane %v5382_v2, %v5764_v13  ;;  %v2006_v6 = vld [vmem:[%s5760_s11] ss:$8 sm:$0x3]  ;;  %s8179_s23 = smov 113  }
  0xc7   : > { %v2015_v7 = vrot.slane %v2006_v6, %v5766_v14  ;;  %v482_v2 = vld [vmem:[%s8048_s2] sm:$0xff] }
  0xca   : > { %657 = vrot.lane.b32.xlu1 %v477_v8, %s8058_s28  ;;  %989 = vrot.lane.b32.xlu0 %v970_v10, %s8064_s7  ;;  %v2011_v8 = vrot.slane %v2006_v6, %v5764_v13  ;;  %v5395_v10 = vld [vmem:[%s5760_s11 + $0x2] ss:$8 sm:$0x3] }
  0xcb   : > { %v2391_v11 = vrot.slane %v5395_v10, %v5766_v14  ;;  %v2387_v12 = vrot.slane %v5395_v10, %v5764_v13 }
  0xce   : > { %824 = vrot.lane.b32.xlu1 %v803_v16, %s8062_s22  ;;  %663 = vrot.lane.b32.xlu0 %v480_v17, %s8058_s28  ;;  %v2587_v17 = vrot.slane %v5404_v15, %v5766_v14  ;;  %s8182_s28 = smov 112  }
  0xd2   : > { %818 = vrot.lane.b32.xlu1 %v800_v21, %s8062_s22  ;;  %1302 = vrot.lane.b32.xlu0 %v1282_v19, %s5615_s16  ;;  %v2583_v19 = vrot.slane %v5404_v15, %v5764_v13  ;;  %s8122_s22 = smov 16  }
  0xd6   : > { %1306 = vrot.lane.b32.xlu1 %v1284_v22, %s5615_s16  ;;  %1300 = vrot.lane.b32.xlu0 %v1281_v23, %s5615_s16  ;;  %v2929_v22 = vrot.slane %v5422_v18, %v5766_v14  ;;  %v5431_v23 = vld [vmem:[%s5760_s11 + $0x6] ss:$8 sm:$0x3] }
  0xda   : > { %1296 = vrot.lane.b32.xlu1 %v1279_v27, %s5615_s16  ;;  %1473 = vrot.lane.b32.xlu0 %v1451_v25, %s8083_s15  ;;  %v3125_v27 = vrot.slane %v5431_v23, %v5766_v14 }
  0xde   : > { %1463 = vrot.lane.b32.xlu1 %v1446_v29, %s8083_s15  ;;  %993 = vrot.lane.b32.xlu0 %v972_v30, %s8064_s7  ;;  %v3121_v29 = vrot.slane %v5431_v23, %v5764_v13 }
  0xe2   : > { %987 = vrot.lane.b32.xlu1 %v969_v32, %s8064_s7  ;;  %1469 = vrot.lane.b32.xlu0 %v1449_v33, %s8083_s15  ;;  %s8121_s7 = smov 15   ;;  %v3317_v32 = vrot.slane %v5939_v28, %v5764_v13 }
  0xe6   : > { %1467 = vrot.lane.b32.xlu0 %v1448_v35, %s8083_s15  ;;  %1640 = vrot.lane.b32.xlu1 %v1618_v34, %s8081_s12 }
  0xea   : > { %1636 = vrot.lane.b32.xlu0 %v1616_v38, %s8081_s12  ;;  %1298 = vrot.lane.b32.xlu1 %v1280_v39, %s5615_s16 }
  0xee   : > { %1304 = vrot.lane.b32.xlu0 %v1283_v42, %s5615_s16  ;;  %1471 = vrot.lane.b32.xlu1 %v1450_v45, %s8083_s15 }
  0xf2   : > { %1465 = vrot.lane.b32.xlu1 %v1447_v47, %s8083_s15  ;;  %1634 = vrot.lane.b32.xlu0 %v1615_v48, %s8081_s12 }
  0xf6   : > { %1630 = vrot.lane.b32.xlu1 %v1613_v51, %s8081_s12  ;;  %1807 = vrot.lane.b32.xlu0 %v1785_v49, %s8066_s13  ;;  %v5289_v49 = vld [vmem:[%s8048_s2 + $0x20] sm:$0xff] }
  0xfa   : > { %1632 = vrot.lane.b32.xlu1 %v1614_v54, %s8081_s12  ;;  %1803 = vrot.lane.b32.xlu0 %v1783_v53, %s8066_s13  ;;  %v5290_v53 = vld [vmem:[%s8048_s2 + $0x28] sm:$0xff] }
  0xfb   : > { %v5327_v54 = vld [vmem:[%s5760_s11 + $0x4] ss:$8 sm:$0x3] }
  0xfe   : > { %1638 = vrot.lane.b32.xlu0 %v1617_v56, %s8081_s12  ;;  %1805 = vrot.lane.b32.xlu1 %v1784_v57, %s8066_s13  ;;  %v1123_v57 = vrot.slane %v5327_v54, %v5764_v13 }
 0x102   : > { %1801 = vrot.lane.b32.xlu0 %v1782_v58, %s8066_s13  ;;  %1799 = vrot.lane.b32.xlu1 %v1781_v59, %s8066_s13  ;;  %v1127_v58 = vrot.slane %v5327_v54, %v5766_v14 }
 0x104   : > { %v1131_v15 = vmul.f32 %v1127_v58, %v5811_v43  ;;  %v5307_v43 = vld [vmem:[%s8048_s2 + $0x48] sm:$0xff] }
 0x106   : > { %1797 = vrot.lane.b32.xlu1 %v1780_v60, %s8066_s13  ;;  %1949 = vperm.xlu0 %5544, %v1931_v62  }
 0x10a   : > { %1944 = vperm.xlu1 %5545, %v1930_v61   ;;  %1934 = vperm.xlu0 %5544, %v1928_v0   ;;  %v5291_v0 = vld [vmem:[%s8048_s2 + $0x30] sm:$0xff] }
 0x10e   : > { %1939 = vperm.xlu1 %5545, %v1929_v1   ;;  %2052 = vrot.lane.b32.xlu0 %v2049_v4, %s8081_s12 }
 0x112   : > { %2050 = vrot.lane.b32.xlu1 %v2045_v5, %s8081_s12  ;;  %2018 = vrot.lane.b32.xlu0 %v2015_v7, %s8066_s13  ;;  %v1133_v7 = vmul.f32 %v1127_v58, %v5813_v44  ;;  %v483_v44 = vld [vmem:[%s8048_s2 + $0x8] sm:$0xff]  ;;  %v5339_v58 = vld [vmem:[%s8048_s2 + $0xa0] sm:$0xff] }
 0x116   : > { %2016 = vrot.lane.b32.xlu1 %v2011_v8, %s8066_s13  ;;  %2394 = vrot.lane.b32.xlu0 %v2391_v11, %s8083_s15  ;;  %v5306_v11 = vld [vmem:[%s8048_s2 + $0x40] sm:$0xff]  ;;  %s8124_s13 = smov 17  }
 0x118   : > { %v530_v16 = vpop.permute.xlu0 %529 }
 0x11a   : > { %2392 = vrot.lane.b32.xlu1 %v2387_v12, %s8083_s15  ;;  %2590 = vrot.lane.b32.xlu0 %v2587_v17, %s5615_s16  ;;  %v1132_v12 = vmul.f32 %v1123_v57, %v5833_v63  ;;  %v484_v63 = vld [vmem:[%s8048_s2 + $0x10] sm:$0xff] }
 0x11c   : > { %v528_v20 = vpop.permute.xlu0 %527  ;;  %v534_v21 = vpop.permute.xlu1 %533 }
 0x11e   : > { %2588 = vrot.lane.b32.xlu1 %v2583_v19, %s5615_s16  ;;  %2932 = vrot.lane.b32.xlu0 %v2929_v22, %s8120_s4 }
 0x120   : > { %v662_v25 = vpop.permute.xlu0 %661  ;;  %v524_v26 = vpop.permute.xlu1 %523 }
 0x122   : > { %2930 = vrot.lane.b32.xlu1 %v2925_v24, %s8120_s4  ;;  %3128 = vrot.lane.b32.xlu0 %v3125_v27, %s8121_s7 }
 0x124   : > { %v660_v30 = vpop.permute.xlu0 %659  ;;  %v666_v31 = vpop.permute.xlu1 %665 }
 0x126   : > { %3126 = vrot.lane.b32.xlu1 %v3121_v29, %s8121_s7  ;;  %3322 = vrot.lane.b32.xlu0 %v3317_v32, %s8122_s22  ;;  %v5317_v32 = vld [vmem:[%s8048_s2 + $0x60] sm:$0xff] }
 0x128   : > { %v827_v33 = vpop.permute.xlu0 %826  ;;  %v656_v34 = vpop.permute.xlu1 %655 }
 0x12c   : > { %v823_v35 = vpop.permute.xlu0 %822  ;;  %v817_v36 = vpop.permute.xlu1 %816 }
 0x130   : > { %v821_v37 = vpop.permute.xlu0 %820  ;;  %v5948_v38 = vpop.permute.xlu1 %995 }
 0x134   : > { %v532_v39 = vpop.permute.xlu0 %531  ;;  %v5950_v40 = vpop.permute.xlu1 %985 }
 0x135   : > { %v539_v41 = vsel %vm535_vm6, %v532_v39, %v534_v21  ;;  %v538_v42 = vsel %vm535_vm6, %v530_v16, %v532_v39  ;;  %v1130_v16 = vmul.f32 %v1123_v57, %v5840_v3  ;;  %v485_v21 = vld [vmem:[%s8048_s2 + $0x18] sm:$0xff] }
 0x136   : > { %5293 = vmatprep.subr.msk.mxu0 %vm555_vm8, %v539_v41  ;;  %5491 = vmatprep.subr.msk.mxu1 %vm555_vm8, %v539_v41  ;;  %v5330_v41 = vld [vmem:[%s8048_s2 + $0x90] sm:$0xff] }
 0x137   : > { %5294 = vmatpush1.msk.msra.mxu0 %vm555_vm8, %v538_v42  ;;  %5493 = vmatpush1.msk.msra.mxu1 %vm555_vm8, %v538_v42 }
 0x138   : > { %v5958_v45 = vpop.permute.xlu0 %991  ;;  %v526_v46 = vpop.permute.xlu1 %525 }
 0x139   : > { %v537_v47 = vsel %vm535_vm6, %v526_v46, %v528_v20  ;;  %v536_v48 = vsel %vm535_vm6, %v524_v26, %v526_v46  ;;  %v5308_v20 = vld [vmem:[%s8048_s2 + $0x50] sm:$0xff]  ;;  %v5309_v26 = vld [vmem:[%s8048_s2 + $0x58] sm:$0xff] }
 0x13a   : > { %590 = vmatprep.subr.mxu0 %v537_v47  ;;  %5492 = vmatprep.subr.mxu1 %v537_v47 }
 0x13b   : > { %591 = vmatpush1.msra.mxu0 %v536_v48  ;;  %5494 = vmatpush1.msra.mxu1 %v536_v48 }
 0x13c   : > { %v5968_v51 = vpop.permute.xlu0 %989  ;;  %5295 = vmatmul.mubr.msk.f32.vlgmr.msra.gmra.mxu0 %vm542_vm9, %v5289_v49  ;;  %v658_v52 = vpop.permute.xlu1 %657  ;;  %5298 = vmatmul.mubr.msk.f32.vlgmr.msra.gmra.mxu1 %vm542_vm9, %v5292_v50  ;;  %v5320_v50 = vld [vmem:[%s8048_s2 + $0x78] sm:$0xff] }
 0x13d   : > { %630 = vmatprep.mubr.f32.mxu0 %v5611_v9  ;;  %754 = vmatprep.mubr.f32.mxu1 %v5611_v9  ;;  %v669_v1 = vsel %vm667_vm7, %v658_v52, %v660_v30  ;;  %v668_v6 = vsel %vm667_vm7, %v656_v34, %v658_v52  ;;  %v5331_v52 = vld [vmem:[%s8048_s2 + $0x98] sm:$0xff] }
 0x140   : > { %v664_v55 = vpop.permute.xlu0 %663  ;;  %5296 = vmatmul.mubr.msk.f32.gmra.mxu0 %vm542_vm9, %v5290_v53  ;;  %v825_v56 = vpop.permute.xlu1 %824 }
 0x141   : > { %v670_v59 = vsel %vm667_vm7, %v662_v25, %v664_v55  ;;  %v831_v60 = vsel %vm828_vm5, %v823_v35, %v825_v56  ;;  %v671_v61 = vsel %vm667_vm7, %v664_v55, %v666_v31  ;;  %v832_v62 = vsel %vm828_vm5, %v825_v56, %v827_v33  ;;  %636 = vmatprep.mubr.f32.mxu0 %v5611_v9  ;;  %v5328_v33 = vld [vmem:[%s8048_s2 + $0x80] sm:$0xff] }
 0x142   : > { %5299 = vmatprep.subr.msk.mxu1 %vm555_vm8, %v671_v61  ;;  %5310 = vmatprep.subr.msk.mxu0 %vm555_vm8, %v832_v62  ;;  %v5340_v62 = vld [vmem:[%s8048_s2 + $0xa8] sm:$0xff] }
 0x143   : > { %5300 = vmatpush1.msk.msra.mxu1 %vm555_vm8, %v670_v59  ;;  %5311 = vmatpush1.msk.msra.mxu0 %vm555_vm8, %v831_v60  ;;  %v5350_v59 = vld [vmem:[%s8048_s2 + $0xc0] sm:$0xff] }
 0x144   : > { %v5997_v4 = vpop.permute.xlu0 %1302  ;;  %5297 = vmatmul.mubr.msk.f32.gmra.mxu0 %vm542_vm9, %v5291_v0  ;;  %720 = vmatprep.subr.mxu1 %v669_v1  ;;  %v819_v5 = vpop.permute.xlu1 %818  ;;  %v5351_v0 = vld [vmem:[%s8048_s2 + $0xc8] sm:$0xff] }
 0x145   : > { %721 = vmatpush1.msra.mxu1 %v668_v6  ;;  %v830_v8 = vsel %vm828_vm5, %v819_v5, %v821_v37  ;;  %v829_v10 = vsel %vm828_vm5, %v817_v36, %v819_v5  ;;  %915 = vmatprep.mubr.f32.mxu0 %v5611_v9  ;;  %v5318_v36 = vld [vmem:[%s8048_s2 + $0x68] sm:$0xff]  ;;  %v5352_v5 = vld [vmem:[%s8048_s2 + $0xd0] sm:$0xff] }
 0x146   : > { %5301 = vmatmul.mubr.msk.f32.vlgmr.msra.gmra.mxu1 %vm542_vm9, %v482_v2  ;;  %881 = vmatprep.subr.mxu0 %v830_v8  ;;  %v5329_v37 = vld [vmem:[%s8048_s2 + $0x88] sm:$0xff] }
 0x147   : > { %882 = vmatpush1.msra.mxu0 %v829_v10  ;;  %760 = vmatprep.mubr.f32.mxu1 %v5611_v9 }
 0x148   : > { %v6016_v17 = vpop.permute.xlu0 %1300  ;;  %5312 = vmatmul.mubr.msk.f32.vlgmr.msra.gmra.mxu0 %vm542_vm9, %v5306_v11  ;;  %v1307_v18 = vpop.permute.xlu1 %1306  ;;  %5332 = vmatprep.subr.msk.mxu0 %vm555_vm8, %v1133_v7 }
 0x149   : > { %921 = vmatprep.mubr.f32.mxu0 %v5611_v9  ;;  %5333 = vmatpush1.msk.msra.mxu0 %vm555_vm8, %v1132_v12 }
 0x14a   : > { %5302 = vmatmul.mubr.msk.f32.gmra.mxu1 %vm542_vm9, %v483_v44  ;;  %1187 = vmatprep.subr.mxu0 %v1131_v15  ;;  %v5342_v15 = vld [vmem:[%s8048_s2 + $0xb8] sm:$0xff] }
 0x14b   : > { %766 = vmatprep.mubr.f32.mxu1 %v5611_v9  ;;  %1188 = vmatpush1.msra.mxu0 %v1130_v16  ;;  %v5353_v44 = vld [vmem:[%s8048_s2 + $0xd8] sm:$0xff] }
 0x14c   : > { %v1474_v3 = vpop.permute.xlu0 %1473  ;;  %5313 = vmatmul.mubr.msk.f32.gmra.mxu0 %vm542_vm9, %v5307_v43  ;;  %v6031_v19 = vpop.permute.xlu1 %1296 }
 0x14d   : > { %927 = vmatprep.mubr.f32.mxu0 %v5611_v9 }
 0x14e   : > { %5303 = vmatmul.mubr.msk.f32.gmra.mxu1 %vm542_vm9, %v484_v63 }
 0x14f   : > { %772 = vmatprep.mubr.f32.mxu1 %v5611_v9 }
 0x150   : > { %v994_v22 = vpop.permute.xlu0 %993  ;;  %5314 = vmatmul.mubr.msk.f32.gmra.mxu0 %vm542_vm9, %v5308_v20  ;;  %v1464_v23 = vpop.permute.xlu1 %1463  ;;  %v5372_v20 = vld [vmem:[%s8048_s2 + $0x100] sm:$0xff] }
 0x151   : > { %v1000_v24 = vsel %vm997_vm4, %v5958_v45, %v994_v22  ;;  %v1001_v25 = vsel %vm997_vm4, %v994_v22, %v5948_v38  ;;  %933 = vmatprep.mubr.f32.mxu0 %v5611_v9  ;;  %v5362_v22 = vld [vmem:[%s8048_s2 + $0xe8] sm:$0xff] }
 0x152   : > { %5304 = vmatmul.mubr.msk.f32.gmra.mxu1 %vm542_vm9, %v485_v21  ;;  %5321 = vmatprep.subr.msk.mxu1 %vm555_vm8, %v1001_v25  ;;  %v5374_v25 = vld [vmem:[%s8048_s2 + $0x110] sm:$0xff] }
 0x153   : > { %5322 = vmatpush1.msk.msra.mxu1 %vm555_vm8, %v1000_v24  ;;  %1084 = vmatprep.mubr.f32.mxu1 %v5611_v9  ;;  %v5363_v24 = vld [vmem:[%s8048_s2 + $0xf0] sm:$0xff] }
 0x154   : > { %v1470_v27 = vpop.permute.xlu0 %1469  ;;  %5315 = vmatmul.mubr.msk.f32.gmra.mxu0 %vm542_vm9, %v5309_v26  ;;  %v988_v29 = vpop.permute.xlu1 %987  ;;  %v5364_v26 = vld [vmem:[%s8048_s2 + $0xf8] sm:$0xff] }
 0x155   : > { %v999_v30 = vsel %vm997_vm4, %v988_v29, %v5968_v51  ;;  %v998_v31 = vsel %vm997_vm4, %v5950_v40, %v988_v29  ;;  %1221 = vmatprep.mubr.f32.mxu0 %v5611_v9  ;;  %v5319_v40 = vld [vmem:[%s8048_s2 + $0x70] sm:$0xff] }
 0x156   : > { %1050 = vmatprep.subr.mxu1 %v999_v30 }
 0x157   : > { %1051 = vmatpush1.msra.mxu1 %v998_v31 }
 0x158   : > { %v1468_v34 = vpop.permute.xlu0 %1467  ;;  %5323 = vmatmul.mubr.msk.f32.vlgmr.msra.gmra.mxu1 %vm542_vm9, %v5317_v32  ;;  %v6068_v35 = vpop.permute.xlu1 %1640  ;;  %5334 = vmatmul.mubr.msk.f32.vlgmr.msra.gmra.mxu0 %vm542_vm9, %v5328_v33  ;;  %v5449_v32 = vld [vmem:[%s5760_s11 + $0x10] ss:$8 sm:$0x3] }
 0x159   : > { %1090 = vmatprep.mubr.f32.mxu1 %v5611_v9  ;;  %1227 = vmatprep.mubr.f32.mxu0 %v5611_v9 }
 0x15c   : > { %v1637_v38 = vpop.permute.xlu0 %1636  ;;  %5324 = vmatmul.mubr.msk.f32.gmra.mxu1 %vm542_vm9, %v5318_v36  ;;  %v1299_v39 = vpop.permute.xlu1 %1298  ;;  %5335 = vmatmul.mubr.msk.f32.gmra.mxu0 %vm542_vm9, %v5329_v37 }
 0x15d   : > { %1096 = vmatprep.mubr.f32.mxu1 %v5611_v9  ;;  %1233 = vmatprep.mubr.f32.mxu0 %v5611_v9  ;;  %v1309_v51 = vsel %vm963_vm3, %v1299_v39, %v6016_v17  ;;  %v1308_v55 = vsel %vm963_vm3, %v6031_v19, %v1299_v39 }
 0x160   : > { %v1305_v42 = vpop.permute.xlu0 %1304  ;;  %5325 = vmatmul.mubr.msk.f32.gmra.mxu1 %vm542_vm9, %v5319_v40  ;;  %v1472_v45 = vpop.permute.xlu1 %1471  ;;  %5336 = vmatmul.mubr.msk.f32.gmra.mxu0 %vm542_vm9, %v5330_v41 }
 0x161   : > { %v1310_v46 = vsel %vm963_vm3, %v5997_v4, %v1305_v42  ;;  %v1477_v47 = vsel %vm794_vm2, %v1470_v27, %v1472_v45  ;;  %v1311_v48 = vsel %vm963_vm3, %v1305_v42, %v1307_v18  ;;  %v1478_v49 = vsel %vm794_vm2, %v1472_v45, %v1474_v3  ;;  %1102 = vmatprep.mubr.f32.mxu1 %v5611_v9  ;;  %v5341_v4 = vld [vmem:[%s8048_s2 + $0xb0] sm:$0xff]  ;;  %v5361_v3 = vld [vmem:[%s8048_s2 + $0xe0] sm:$0xff]  ;;  %v5375_v27 = vld [vmem:[%s8048_s2 + $0x118] sm:$0xff] }
 0x162   : > { %5343 = vmatprep.subr.msk.mxu1 %vm555_vm8, %v1311_v48  ;;  %5354 = vmatprep.subr.msk.mxu0 %vm555_vm8, %v1478_v49  ;;  %v6257_v48 = vld [vmem:[#allocation2] sm:$0xff] }
 0x163   : > { %5344 = vmatpush1.msk.msra.mxu1 %vm555_vm8, %v1310_v46  ;;  %5355 = vmatpush1.msk.msra.mxu0 %vm555_vm8, %v1477_v47  ;;  %8125 = vst [vmem:[#allocation13_spill] sm:$0xff] %v6257_v48 }
 0x164   : > { %v1635_v53 = vpop.permute.xlu0 %1634  ;;  %5326 = vmatmul.mubr.msk.f32.gmra.mxu1 %vm542_vm9, %v5320_v50  ;;  %1360 = vmatprep.subr.mxu1 %v1309_v51  ;;  %v1466_v54 = vpop.permute.xlu1 %1465 }
 0x165   : > { %1239 = vmatprep.mubr.f32.mxu0 %v5611_v9  ;;  %1361 = vmatpush1.msra.mxu1 %v1308_v55  ;;  %v1476_v56 = vsel %vm794_vm2, %v1466_v54, %v1468_v34  ;;  %v1475_v57 = vsel %vm794_vm2, %v1464_v23, %v1466_v54  ;;  %v5373_v23 = vld [vmem:[%s8048_s2 + $0x108] sm:$0xff]  ;;  %v3321_v34 = vrot.slane %v5939_v28, %v5766_v14 }
 0x166   : > { %5337 = vmatmul.mubr.msk.f32.gmra.mxu0 %vm542_vm9, %v5331_v52  ;;  %1527 = vmatprep.subr.mxu0 %v1476_v56 }
 0x167   : > { %1394 = vmatprep.mubr.f32.mxu1 %v5611_v9  ;;  %1528 = vmatpush1.msra.mxu0 %v1475_v57 }
 0x168   : > { %v1808_v60 = vpop.permute.xlu0 %1807  ;;  %5345 = vmatmul.mubr.msk.f32.vlgmr.msra.gmra.mxu1 %vm542_vm9, %v5339_v58  ;;  %v1631_v61 = vpop.permute.xlu1 %1630  ;;  %1561 = vmatprep.mubr.f32.mxu0 %v5611_v9 }
 0x169   : > { %1400 = vmatprep.mubr.f32.mxu1 %v5611_v9 }
 0x16a   : > { %5356 = vmatmul.mubr.msk.f32.vlgmr.msra.gmra.mxu0 %vm542_vm9, %v5350_v59 }
 0x16b   : > { %1567 = vmatprep.mubr.f32.mxu0 %v5611_v9 }
 0x16c   : > { %v1804_v1 = vpop.permute.xlu0 %1803  ;;  %5346 = vmatmul.mubr.msk.f32.gmra.mxu1 %vm542_vm9, %v5340_v62  ;;  %v1633_v2 = vpop.permute.xlu1 %1632 }
 0x16d   : > { %1406 = vmatprep.mubr.f32.mxu1 %v5611_v9  ;;  %v1643_v17 = vsel %vm501_vm0, %v1633_v2, %v1635_v53  ;;  %v1642_v43 = vsel %vm501_vm0, %v1631_v61, %v1633_v2 }
 0x16e   : > { %5357 = vmatmul.mubr.msk.f32.gmra.mxu0 %vm542_vm9, %v5351_v0 }
 0x16f   : > { %1573 = vmatprep.mubr.f32.mxu0 %v5611_v9 }
 0x170   : > { %v1639_v6 = vpop.permute.xlu0 %1638  ;;  %5347 = vmatmul.mubr.msk.f32.gmra.mxu1 %vm542_vm9, %v5341_v4  ;;  %v1806_v7 = vpop.permute.xlu1 %1805 }
 0x171   : > { %v1644_v8 = vsel %vm501_vm0, %v1637_v38, %v1639_v6  ;;  %v1811_v10 = vsel %vm471_vm1, %v1804_v1, %v1806_v7  ;;  %v1645_v11 = vsel %vm501_vm0, %v1639_v6, %v6068_v35  ;;  %v1812_v12 = vsel %vm471_vm1, %v1806_v7, %v1808_v60  ;;  %1412 = vmatprep.mubr.f32.mxu1 %v5611_v9 }
 0x172   : > { %5358 = vmatmul.mubr.msk.f32.gmra.mxu0 %vm542_vm9, %v5352_v5  ;;  %5365 = vmatprep.subr.msk.mxu1 %vm555_vm8, %v1645_v11  ;;  %v3517_v35 = vrot.slane %v5449_v32, %v5766_v14 }
 0x173   : > { %5376 = vmatprep.subr.msk.mxu0 %vm555_vm8, %v1812_v12  ;;  %5366 = vmatpush1.msk.msra.mxu1 %vm555_vm8, %v1644_v8 }
 0x174   : > { %5377 = vmatpush1.msk.msra.mxu0 %vm555_vm8, %v1811_v10  ;;  %v1802_v16 = vpop.permute.xlu0 %1801  ;;  %5348 = vmatmul.mubr.msk.f32.gmra.mxu1 %vm542_vm9, %v5342_v15  ;;  %v1800_v18 = vpop.permute.xlu1 %1799 }
 0x175   : > { %1694 = vmatprep.subr.mxu1 %v1643_v17  ;;  %1579 = vmatprep.mubr.f32.mxu0 %v5611_v9  ;;  %v1810_v63 = vsel %vm471_vm1, %v1800_v18, %v1802_v16 }
 0x176   : > { %1695 = vmatpush1.msra.mxu1 %v1642_v43  ;;  %5359 = vmatmul.mubr.msk.f32.gmra.mxu0 %vm542_vm9, %v5353_v44 }
 0x177   : > { %1861 = vmatprep.subr.mxu0 %v1810_v63  ;;  %1728 = vmatprep.mubr.f32.mxu1 %v5611_v9 }
 0x178   : > { %5367 = vmatmul.mubr.msk.f32.vlgmr.msra.gmra.mxu1 %vm542_vm9, %v5361_v3  ;;  %v1798_v19 = vpop.permute.xlu1 %1797  ;;  %1895 = vmatprep.mubr.f32.mxu0 %v5611_v9 }
 0x179   : > { %v1809_v21 = vsel %vm471_vm1, %v1798_v19, %v1800_v18  ;;  %1734 = vmatprep.mubr.f32.mxu1 %v5611_v9 }
 0x17a   : > { %1862 = vmatpush1.msra.mxu0 %v1809_v21 }
 0x17b   : > { %5378 = vmatmul.mubr.msk.f32.vlgmr.msra.gmra.mxu0 %vm542_vm9, %v5372_v20 }
 0x17c   : > { %5368 = vmatmul.mubr.msk.f32.gmra.mxu1 %vm542_vm9, %v5362_v22  ;;  %1901 = vmatprep.mubr.f32.mxu0 %v5611_v9 }
 0x17d   : > { %1740 = vmatprep.mubr.f32.mxu1 %v5611_v9 }
 0x17f   : > { %5379 = vmatmul.mubr.msk.f32.gmra.mxu0 %vm542_vm9, %v5373_v23 }
 0x180   : > { %5369 = vmatmul.mubr.msk.f32.gmra.mxu1 %vm542_vm9, %v5363_v24  ;;  %1907 = vmatprep.mubr.f32.mxu0 %v5611_v9 }
 0x181   : > { %1746 = vmatprep.mubr.f32.mxu1 %v5611_v9  ;;  %v6224_v36 = vpop.permute.xlu0 %1949 }
 0x183   : > { %5380 = vmatmul.mubr.msk.f32.gmra.mxu0 %vm542_vm9, %v5374_v25 }
 0x184   : > { %5370 = vmatmul.mubr.msk.f32.gmra.mxu1 %vm542_vm9, %v5364_v26  ;;  %1913 = vmatprep.mubr.f32.mxu0 %v5611_v9 }
 0x185   : > { %v6208_v29 = vpop.permute.xlu1 %1944  ;;  %2204 = vmatprep.mubr.f32.mxu1 %v5611_v9  ;;  %v6229_v37 = vpop.permute.xlu0 %1934 }
 0x186   : > { %8123 = vst [vmem:[#allocation12_spill] sm:$0xff] %v6208_v29 }
 0x187   : > { %5381 = vmatmul.mubr.msk.f32.gmra.mxu0 %vm542_vm9, %v5375_v27 }
 0x188   : > { %2357 = vmatprep.mubr.f32.mxu0 %v5611_v9  ;;  %v3513_v9 = vrot.slane %v5449_v32, %v5764_v13 }
 0x189   : > { %v6213_v30 = vpop.permute.xlu1 %1939  ;;  %v6238_v39 = vpop.permute.xlu0 %2052 }
 0x18d   : > { %v6215_v31 = vpop.permute.xlu1 %2050  ;;  %v6245_v42 = vpop.permute.xlu0 %2018 }
 0x18e   : > { %v2067_v33 = vmul.f32 0.0, %v6215_v31 }
 0x190   : > { %2105 = vrot.lane.b32.xlu1 %v2067_v33, %s8122_s22  ;;  %2099 = vrot.lane.b32.xlu0 %v2067_v33, %s8122_s22 }
 0x191   : > { %v6231_v38 = vpop.permute.xlu1 %2016  ;;  %v6249_v45 = vpop.permute.xlu0 %2394 }
 0x192   : > { %v2033_v28 = vmul.f32 0.0, %v6231_v38 }
 0x194   : > { %3324 = vrot.lane.b32.xlu1 %v3321_v34, %s8122_s22  ;;  %3520 = vrot.lane.b32.xlu0 %v3517_v35, %s8124_s13 }
 0x195   : > { %v6240_v40 = vpop.permute.xlu1 %2392  ;;  %v6255_v47 = vpop.permute.xlu0 %2590 }
 0x196   : > { %v2409_v41 = vmul.f32 0.0, %v6240_v40 }
 0x198   : > { %3518 = vrot.lane.b32.xlu1 %v3513_v9, %s8124_s13  ;;  %2087 = vrot.lane.b32.xlu0 %v2067_v33, %s8122_s22 }
 0x199   : > { %v6251_v46 = vpop.permute.xlu1 %2588  ;;  %v6263_v50 = vpop.permute.xlu0 %2932 }
 0x19a   : > { %v2605_v49 = vmul.f32 %v6257_v48, %v6251_v46  ;;  %v2946_v51 = vmul.f32 %v6257_v48, %v6263_v50 }
 0x19c   : > { %2093 = vrot.lane.b32.xlu1 %v2067_v33, %s8122_s22  ;;  %2253 = vrot.lane.b32.xlu0 %v2033_v28, %s8124_s13 }
 0x19d   : > { %v6271_v52 = vpop.permute.xlu0 %3128 }
 0x19e   : > { %v6276_v53 = vmul.f32 %v6257_v48, %v6271_v52 }
 0x1a0   : > { %2259 = vrot.lane.b32.xlu1 %v2033_v28, %s8124_s13  ;;  %2247 = vrot.lane.b32.xlu0 %v2033_v28, %s8124_s13  ;;  %8126 = vst [vmem:[#allocation14_spill] sm:$0xff] %v6276_v53 }
 0x1a4   : > { %2447 = vrot.lane.b32.xlu1 %v2409_v41, %s8121_s7  ;;  %2241 = vrot.lane.b32.xlu0 %v2033_v28, %s8124_s13 }
 0x1a8   : > { %2441 = vrot.lane.b32.xlu1 %v2409_v41, %s8121_s7  ;;  %2429 = vrot.lane.b32.xlu0 %v2409_v41, %s8121_s7 }
 0x1ac   : > { %2435 = vrot.lane.b32.xlu1 %v2409_v41, %s8121_s7  ;;  %2637 = vrot.lane.b32.xlu0 %v2605_v49, %s8120_s4 }
 0x1b0   : > { %2643 = vrot.lane.b32.xlu1 %v2605_v49, %s8120_s4  ;;  %2625 = vrot.lane.b32.xlu0 %v2605_v49, %s8120_s4 }
 0x1b4   : > { %2631 = vrot.lane.b32.xlu1 %v2605_v49, %s8120_s4  ;;  %2989 = vrot.lane.b32.xlu0 %v2946_v51, %s5615_s16 }
 0x1b8   : > { %2983 = vrot.lane.b32.xlu1 %v2946_v51, %s5615_s16 }
 0x1bc   : > { %3185 = vrot.lane.b32.xlu1 %v6276_v53, %s8083_s15 }
 0x1c0   : > { %2977 = vrot.lane.b32.xlu1 %v2946_v51, %s5615_s16 }
 0x1c4   : > { %3179 = vrot.lane.b32.xlu1 %v6276_v53, %s8083_s15 }
 0x1c8   : > { %2971 = vrot.lane.b32.xlu1 %v2946_v51, %s5615_s16 }
 0x1cc   : > { %3173 = vrot.lane.b32.xlu1 %v6276_v53, %s8083_s15 }
 0x1fc   : > { %v626_v54 = vpop.f32.mrf.mxu0  ;;  %v644_v56 = vpop.f32.mrf.mxu1 }
 0x1fe   : > { %v628_v55 = vpop.f32.mrf.mxu0  ;;  %v646_v59 = vpop.f32.mrf.mxu1 }
 0x200   : > { %v632_v57 = vpop.f32.mrf.mxu0 }
 0x202   : > { %v6286_v58 = vpop.f32.mrf.mxu0 }
 0x204   : > { %v6288_v60 = vpop.f32.mrf.mxu0 }
 0x206   : > { %v640_v61 = vpop.f32.mrf.mxu0  ;;  %v756_v62 = vpop.f32.mrf.mxu1 }
 0x208   : > { %v758_v0 = vpop.f32.mrf.mxu1  ;;  %v917_v1 = vpop.f32.mrf.mxu0 }
 0x20a   : > { %v762_v2 = vpop.f32.mrf.mxu1  ;;  %v919_v4 = vpop.f32.mrf.mxu0 }
 0x20c   : > { %v6290_v5 = vpop.f32.mrf.mxu1  ;;  %v923_v6 = vpop.f32.mrf.mxu0 }
 0x20e   : > { %v6292_v7 = vpop.f32.mrf.mxu1  ;;  %v6294_v8 = vpop.f32.mrf.mxu0 }
 0x210   : > { %v770_v10 = vpop.f32.mrf.mxu1  ;;  %v6296_v11 = vpop.f32.mrf.mxu0 }
 0x211   : > { %v771_v12 = vadd.f32 %v770_v10, %v640_v61 }
 0x212   : > { %v774_v15 = vpop.f32.mrf.mxu1  ;;  %v931_v44 = vpop.f32.mrf.mxu0 }
 0x213   : > { %v775_v16 = vadd.f32 %v774_v15, %v644_v56  ;;  %v6298_v17 = vadd.f32 %v931_v44, %v771_v12  ;;  %v757_v56 = vadd.f32 %v756_v62, %v626_v54  ;;  %v759_v15 = vadd.f32 %v758_v0, %v628_v55 }
 0x214   : > { %v776_v18 = vpop.f32.mrf.mxu1  ;;  %v935_v43 = vpop.f32.mrf.mxu0 }
 0x215   : > { %v777_v63 = vadd.f32 %v776_v18, %v646_v59  ;;  %v946_v3 = vadd.f32 %v935_v43, %v775_v16  ;;  %v940_v43 = vadd.f32 %v917_v1, %v757_v56  ;;  %v941_v14 = vadd.f32 %v919_v4, %v759_v15 }
 0x216   : > { %v937_v19 = vpop.f32.mrf.mxu0 }
 0x217   : > { %v947_v20 = vadd.f32 %v937_v19, %v777_v63 }
 0x218   : > { %v1086_v21 = vpop.f32.mrf.mxu1  ;;  %v1223_v22 = vpop.f32.mrf.mxu0 }
 0x219   : > { %v1109_v13 = vadd.f32 %v1086_v21, %v940_v43 }
 0x21a   : > { %v1088_v23 = vpop.f32.mrf.mxu1  ;;  %v1225_v24 = vpop.f32.mrf.mxu0 }
 0x21b   : > { %v1110_v29 = vadd.f32 %v1088_v23, %v941_v14  ;;  %v1246_v62 = vadd.f32 %v1223_v22, %v1109_v13 }
 0x21c   : > { %v1092_v25 = vpop.f32.mrf.mxu1  ;;  %v1229_v26 = vpop.f32.mrf.mxu0 }
 0x21d   : > { %v1247_v0 = vadd.f32 %v1225_v24, %v1110_v29 }
 0x21e   : > { %v1094_v27 = vpop.f32.mrf.mxu1  ;;  %v6300_v32 = vpop.f32.mrf.mxu0 }
 0x220   : > { %v6302_v33 = vpop.f32.mrf.mxu1  ;;  %v6304_v34 = vpop.f32.mrf.mxu0 }
 0x222   : > { %v6306_v35 = vpop.f32.mrf.mxu1  ;;  %v6308_v9 = vpop.f32.mrf.mxu0 }
 0x224   : > { %v1104_v28 = vpop.f32.mrf.mxu1 }
 0x225   : > { %v1115_v41 = vadd.f32 %v1104_v28, %v946_v3  ;;  %v763_v3 = vadd.f32 %v762_v2, %v632_v57  ;;  %v765_v2 = vadd.f32 %v6290_v5, %v6286_v58 }
 0x226   : > { %v1106_v49 = vpop.f32.mrf.mxu1  ;;  %v1241_v51 = vpop.f32.mrf.mxu0 }
 0x227   : > { %v1116_v59 = vadd.f32 %v1106_v49, %v947_v20  ;;  %v1252_v61 = vadd.f32 %v1241_v51, %v1115_v41  ;;  %v942_v1 = vadd.f32 %v923_v6, %v763_v3 }
 0x228   : > { %v1243_v10 = vpop.f32.mrf.mxu0  ;;  %v1396_v12 = vpop.f32.mrf.mxu1 }
 0x229   : > { %v1253_v44 = vadd.f32 %v1243_v10, %v1116_v59  ;;  %v1419_v41 = vadd.f32 %v1396_v12, %v1246_v62  ;;  %v1111_v21 = vadd.f32 %v1092_v25, %v942_v1  ;;  %v943_v12 = vadd.f32 %v6294_v8, %v765_v2 }
 0x22a   : > { %v1398_v16 = vpop.f32.mrf.mxu1  ;;  %v1563_v18 = vpop.f32.mrf.mxu0 }
 0x22b   : > { %v1420_v4 = vadd.f32 %v1398_v16, %v1247_v0  ;;  %v1586_v23 = vadd.f32 %v1563_v18, %v1419_v41  ;;  %v1248_v24 = vadd.f32 %v1229_v26, %v1111_v21  ;;  %v1112_v62 = vadd.f32 %v1094_v27, %v943_v12 }
 0x22c   : > { %v1402_v63 = vpop.f32.mrf.mxu1  ;;  %v1565_v19 = vpop.f32.mrf.mxu0  ;;  %v6323_v0 = vstv %s1960_s30  ;;  %s8263_s30 = sadd.s32 4294967295, %s5609_s20  }
 0x22d   : > { %v1587_v59 = vadd.f32 %v1565_v19, %v1420_v4  ;;  %v1421_v43 = vadd.f32 %v1402_v63, %v1248_v24  ;;  %v769_v19 = vadd.f32 %v6292_v7, %v6288_v60  ;;  %v1249_v27 = vadd.f32 %v6300_v32, %v1112_v62 }
 0x22e   : > { %v1404_v48 = vpop.f32.mrf.mxu1  ;;  %v1569_v53 = vpop.f32.mrf.mxu0 }
 0x22f   : > { %v1588_v1 = vadd.f32 %v1569_v53, %v1421_v43 }
 0x230   : > { %v6310_v28 = vpop.f32.mrf.mxu1  ;;  %v6312_v54 = vpop.f32.mrf.mxu0 }
 0x232   : > { %v6314_v20 = vpop.f32.mrf.mxu1  ;;  %v6316_v55 = vpop.f32.mrf.mxu0 }
 0x234   : > { %v1414_v49 = vpop.f32.mrf.mxu1  ;;  %v6318_v51 = vpop.f32.mrf.mxu0 }
 0x235   : > { %v1425_v26 = vadd.f32 %v1414_v49, %v1252_v61  ;;  %v944_v49 = vadd.f32 %v6296_v11, %v769_v19  ;;  %v6359_v11 = vsel %vm471_vm1, %v6231_v38, %v6245_v42 }
 0x236   : > { %v1416_v14 = vpop.f32.mrf.mxu1  ;;  %v1581_v57 = vpop.f32.mrf.mxu0 }
 0x237   : > { %v1426_v13 = vadd.f32 %v1416_v14, %v1253_v44  ;;  %v6336_v14 = vsel %vm501_vm0, %v6215_v31, %v6238_v39  ;;  %v1592_v61 = vadd.f32 %v1581_v57, %v1425_v26  ;;  %v1113_v57 = vadd.f32 %v6302_v33, %v944_v49 }
 0x238   : > { %v1583_v22 = vpop.f32.mrf.mxu0  ;;  %v1730_v56 = vpop.f32.mrf.mxu1  ;;  %v1114_v33 = vadd.f32 %v6306_v35, %v6298_v17 }
 0x239   : > { %v1593_v10 = vadd.f32 %v1583_v22, %v1426_v13  ;;  %v1753_v29 = vadd.f32 %v1730_v56, %v1586_v23  ;;  %v1422_v23 = vadd.f32 %v1404_v48, %v1249_v27 }
 0x23a   : > { %v1732_v6 = vpop.f32.mrf.mxu1 }
 0x23b   : > { %v1754_v15 = vadd.f32 %v1732_v6, %v1587_v59  ;;  %v1897_v16 = vpop.f32.mrf.mxu0 }
 0x23c   : > { %v1920_v25 = vadd.f32 %v1897_v16, %v1753_v29  ;;  %v1736_v3 = vpop.f32.mrf.mxu1 }
 0x23d   : > { %v1899_v58 = vpop.f32.mrf.mxu0  ;;  %v1755_v60 = vadd.f32 %v1736_v3, %v1588_v1 }
 0x23e   : > { %v1952_v5 = vadd.f32 %v6229_v37, %v1920_v25  ;;  %v1921_v44 = vadd.f32 %v1899_v58, %v1754_v15  ;;  %v1738_v18 = vpop.f32.mrf.mxu1  ;;  %v1589_v15 = vadd.f32 %v6312_v54, %v1422_v23  ;;  %v1250_v25 = vadd.f32 %v6304_v34, %v1113_v57 }
 0x23f   : > { %v1903_v41 = vpop.f32.mrf.mxu0 }
 0x240   : > { %vm1961_vm10 = vcmp.gt.f32.partialorder %v1952_v5, 0.0  ;;  %v1970_v8 = vmul.f32 %v6323_v0, %v1952_v5  ;;  %v1953_v63 = vadd.f32 %v6229_v37, %v1921_v44  ;;  %v6330_v4 = vpop.f32.mrf.mxu1  ;;  %v1922_v29 = vadd.f32 %v1903_v41, %v1755_v60 }
 0x241   : > { %v1905_v21 = vpop.f32.mrf.mxu0  ;;  %v1756_v3 = vadd.f32 %v1738_v18, %v1589_v15  ;;  %v1423_v35 = vadd.f32 %v6310_v28, %v1250_v25  ;;  %v6390_v44 = vsel %vm963_vm3, %v6251_v46, %v6255_v47  ;;  %v1251_v18 = vadd.f32 %v6308_v9, %v1114_v33  ;;  %v6394_v28 = vpop.permute.xlu1 %2930 }
 0x242   : > { %v6338_v2 = vsel %vm1961_vm10, %v1952_v5, %v1970_v8  ;;  %vm1962_vm11 = vcmp.gt.f32.partialorder %v1953_v63, 0.0  ;;  %v1971_v53 = vmul.f32 %v6323_v0, %v1953_v63  ;;  %v6341_v7 = vpop.f32.mrf.mxu1  ;;  %v1954_v54 = vadd.f32 %v6213_v30, %v1922_v29 }
 0x243   : > { %v6343_v37 = vpop.f32.mrf.mxu0  ;;  %v2059_v32 = vmul.f32 %v6336_v14, %v6338_v2  ;;  %v2025_v12 = vmul.f32 %v6359_v11, %v6338_v2  ;;  %v1923_v26 = vadd.f32 %v1905_v21, %v1756_v3  ;;  %v2597_v41 = vmul.f32 %v6390_v44, %v6338_v2 }
 0x244   : > { %v6348_v13 = vsel %vm1962_vm11, %v1953_v63, %v1971_v53  ;;  %v1748_v31 = vpop.f32.mrf.mxu1  ;;  %v1972_v19 = vmul.f32 %v6323_v0, %v1954_v54  ;;  %vm1963_vm13 = vcmp.gt.f32.partialorder %v1954_v54, 0.0  ;;  %v1424_v46 = vadd.f32 %v6314_v20, %v1251_v18 }
 0x245   : > { %v1759_v22 = vadd.f32 %v1748_v31, %v1592_v61  ;;  %v6350_v56 = vpop.f32.mrf.mxu0  ;;  %2089 = vrot.lane.b32.xlu0 %v2059_v32, %s8122_s22  ;;  %v2060_v59 = vmul.f32 %v6238_v39, %v6348_v13  ;;  %v2026_v38 = vmul.f32 %v6245_v42, %v6348_v13  ;;  %v2402_v34 = vmul.f32 %v6249_v45, %v6348_v13  ;;  %v6426_v32 = vpop.permute.xlu1 %3126 }
 0x246   : > { %v1750_v24 = vpop.f32.mrf.mxu1  ;;  %v1590_v1 = vadd.f32 %v6316_v55, %v1423_v35  ;;  %v2598_v63 = vmul.f32 %v6255_v47, %v6348_v13  ;;  %v6409_v27 = vsel %vm1963_vm13, %v1954_v54, %v1972_v19  ;;  %v1955_v60 = vadd.f32 %v6213_v30, %v1923_v26 }
 0x247   : > { %v1760_v48 = vadd.f32 %v1750_v24, %v1593_v10  ;;  %v1915_v6 = vpop.f32.mrf.mxu0  ;;  %2091 = vrot.lane.b32.xlu1 %v2060_v59, %s8122_s22  ;;  %v6373_v10 = vsel %vm794_vm2, %v6240_v40, %v6249_v45  ;;  %v6416_v20 = vsel %vm997_vm4, %v6394_v28, %v6263_v50  ;;  %v1591_v53 = vadd.f32 %v6318_v51, %v1424_v46  ;;  %v8127_v59 = vld [vmem:[#allocation12_spill] sm:$0xff] }
 0x248   : > { %v1926_v16 = vadd.f32 %v1915_v6, %v1759_v22  ;;  %v2401_v17 = vmul.f32 %v6373_v10, %v6338_v2  ;;  %v1757_v21 = vadd.f32 %v6330_v4, %v1590_v1  ;;  %v2939_v55 = vmul.f32 %v6416_v20, %v6348_v13  ;;  %v6527_v1 = vpop.permute.xlu0 %3322 }
 0x249   : > { %v1917_v43 = vpop.f32.mrf.mxu0  ;;  %2243 = vrot.lane.b32.xlu0 %v2025_v12, %s8124_s13  ;;  %v2062_v30 = vmul.f32 %v6336_v14, %v6409_v27  ;;  %v1973_v50 = vmul.f32 %v6323_v0, %v1955_v60  ;;  %v1758_v4 = vadd.f32 %v6341_v7, %v1591_v53  ;;  %vm1964_vm15 = vcmp.gt.f32.partialorder %v1955_v60, 0.0  ;;  %v6457_v24 = vpop.permute.xlu1 %2105 }
 0x24a   : > { %v1958_v62 = vadd.f32 %v6224_v36, %v1926_v16  ;;  %v1927_v58 = vadd.f32 %v1917_v43, %v1760_v48  ;;  %v1924_v49 = vadd.f32 %v6343_v37, %v1757_v21  ;;  %v2028_v51 = vmul.f32 %v6359_v11, %v6409_v27 }
 0x24b   : > { %2245 = vrot.lane.b32.xlu1 %v2026_v38, %s8124_s13  ;;  %v6444_v31 = vsel %vm828_vm5, %v6426_v32, %v6271_v52  ;;  %v2600_v7 = vmul.f32 %v6390_v44, %v6409_v27  ;;  %v6453_v22 = vsel %vm1964_vm15, %v1955_v60, %v1973_v50  ;;  %v1925_v29 = vadd.f32 %v6350_v56, %v1758_v4 }
 0x24c   : > { %v1976_v5 = vmul.f32 %v6323_v0, %v1958_v62  ;;  %v1959_v40 = vadd.f32 %v6224_v36, %v1927_v58  ;;  %vm1967_vm12 = vcmp.gt.f32.partialorder %v1958_v62, 0.0  ;;  %v1956_v57 = vadd.f32 %v8127_v59, %v1924_v49 }
 0x24d   : > { %2431 = vrot.lane.b32.xlu0 %v2401_v17, %s8121_s7  ;;  %v2404_v52 = vmul.f32 %v6373_v10, %v6409_v27  ;;  %v2029_v48 = vmul.f32 %v6245_v42, %v6453_v22  ;;  %v1957_v12 = vadd.f32 %v8127_v59, %v1925_v29  ;;  %v2941_v56 = vmul.f32 %v6394_v28, %v6409_v27  ;;  %v6470_v15 = vpop.permute.xlu1 %3324 }
 0x24e   : > { %vm1968_vm14 = vcmp.gt.f32.partialorder %v1959_v40, 0.0  ;;  %v1977_v36 = vmul.f32 %v6323_v0, %v1959_v40  ;;  %v6402_v9 = vsel %vm1967_vm12, %v1958_v62, %v1976_v5  ;;  %v1974_v6 = vmul.f32 %v6323_v0, %v1956_v57 }
 0x24f   : > { %2433 = vrot.lane.b32.xlu1 %v2402_v34, %s8121_s7  ;;  %v6424_v61 = vmul.f32 %v6373_v10, %v6402_v9  ;;  %vm1965_vm8 = vcmp.gt.f32.partialorder %v1956_v57, 0.0  ;;  %v2405_v16 = vmul.f32 %v6249_v45, %v6453_v22  ;;  %v1975_v43 = vmul.f32 %v6323_v0, %v1957_v12 }
 0x250   : > { %v6404_v8 = vsel %vm1968_vm14, %v1959_v40, %v1977_v36  ;;  %v6475_v33 = vsel %vm1965_vm8, %v1956_v57, %v1974_v6  ;;  %vm1966_vm9 = vcmp.gt.f32.partialorder %v1957_v12, 0.0  ;;  %v2063_v38 = vmul.f32 %v6238_v39, %v6453_v22  ;;  %v8129_v6 = vld [vmem:[#allocation14_spill] sm:$0xff] }
 0x251   : > { %2627 = vrot.lane.b32.xlu0 %v2597_v41, %s8120_s4  ;;  %v6439_v23 = vmul.f32 %v6416_v20, %v6404_v8  ;;  %v6451_v37 = vmul.f32 %v6444_v31, %v6404_v8  ;;  %v3140_v25 = vmul.f32 %v6426_v32, %v6475_v33  ;;  %v6484_v3 = vsel %vm1966_vm9, %v1957_v12, %v1975_v43  ;;  %v6486_v54 = vpop.permute.xlu1 %3518 }
 0x252   : > { %v2601_v0 = vmul.f32 %v6255_v47, %v6453_v22  ;;  %v2066_v62 = vmul.f32 %v6238_v39, %v6484_v3  ;;  %v2942_v58 = vmul.f32 %v6416_v20, %v6453_v22  ;;  %v2032_v35 = vmul.f32 %v6245_v42, %v6484_v3 }
 0x253   : > { %2629 = vrot.lane.b32.xlu1 %v2598_v63, %s8120_s4  ;;  %v3138_v5 = vmul.f32 %v6444_v31, %v6453_v22  ;;  %v2408_v40 = vmul.f32 %v6249_v45, %v6484_v3  ;;  %v2065_v18 = vmul.f32 %v6336_v14, %v6475_v33  ;;  %v2604_v19 = vmul.f32 %v6255_v47, %v6484_v3 }
 0x254   : > { %v2031_v26 = vmul.f32 %v6359_v11, %v6475_v33  ;;  %v2068_v41 = vmul.f32 %v6336_v14, %v6402_v9  ;;  %v2407_v46 = vmul.f32 %v6373_v10, %v6475_v33  ;;  %v2034_v63 = vmul.f32 %v6359_v11, %v6402_v9  ;;  %v6540_v10 = vpop.permute.xlu0 %2099 }
 0x255   : > { %2969 = vrot.lane.b32.xlu0 %v2939_v55, %s5615_s16  ;;  %v6497_v17 = vpop.permute.xlu1 %2093  ;;  %v2603_v60 = vmul.f32 %v6390_v44, %v6475_v33  ;;  %v2606_v14 = vmul.f32 %v6390_v44, %v6402_v9  ;;  %v2944_v55 = vmul.f32 %v6394_v28, %v6475_v33  ;;  %v2947_v53 = vmul.f32 %v6394_v28, %v6402_v9 }
 0x256   : > { %v3143_v50 = vmul.f32 %v6426_v32, %v6402_v9  ;;  %v3141_v49 = vmul.f32 %v6444_v31, %v6484_v3  ;;  %v2411_v57 = vmul.f32 %v6249_v45, %v6404_v8  ;;  %v2069_v29 = vmul.f32 %v6238_v39, %v6404_v8 }
 0x257   : > { %2095 = vrot.lane.b32.xlu1 %v2062_v30, %s8122_s22  ;;  %v2945_v30 = vmul.f32 %v6416_v20, %v6484_v3  ;;  %v3137_v20 = vmul.f32 %v6426_v32, %v6409_v27  ;;  %v3339_v45 = vmul.f32 %v6527_v1, %v6402_v9  ;;  %v3135_v39 = vmul.f32 %v6444_v31, %v6348_v13 }
 0x258   : > { %v6553_v44 = vpop.permute.xlu0 %3520  ;;  %vm2127_vm10 = vcmask 261120  }
 0x259   : > { %2249 = vrot.lane.b32.xlu0 %v2028_v51, %s8124_s13  ;;  %v6508_v34 = vpop.permute.xlu1 %2259 }
 0x25b   : > { %2633 = vrot.lane.b32.xlu1 %v2600_v7, %s8120_s4 }
 0x25c   : > { %v6563_v51 = vpop.permute.xlu0 %2087 }
 0x25d   : > { %2437 = vrot.lane.b32.xlu0 %v2404_v52, %s8121_s7  ;;  %v6519_v36 = vpop.permute.xlu1 %2447 }
 0x25f   : > { %2251 = vrot.lane.b32.xlu1 %v2029_v48, %s8124_s13 }
 0x260   : > { %v6573_v59 = vpop.permute.xlu0 %2253 }
 0x261   : > { %2973 = vrot.lane.b32.xlu0 %v2941_v56, %s5615_s16  ;;  %v6532_v21 = vpop.permute.xlu1 %2441 }
 0x263   : > { %2439 = vrot.lane.b32.xlu1 %v2405_v16, %s8121_s7  ;;  %v8131_v16 = vld [vmem:[#allocation13_spill] sm:$0xff] }
 0x264   : > { %v6583_v48 = vpop.permute.xlu0 %2247  ;;  %v3338_v43 = vmul.f32 %v8131_v16, %v6470_v15 }
 0x265   : > { %2097 = vrot.lane.b32.xlu0 %v2063_v38, %s8122_s22  ;;  %v6545_v11 = vpop.permute.xlu1 %2435  ;;  %v3537_v38 = vmul.f32 %v8131_v16, %v6553_v44 }
 0x267   : > { %3175 = vrot.lane.b32.xlu1 %v3140_v25, %s8083_s15 }
 0x268   : > { %v6597_v56 = vpop.permute.xlu0 %2241 }
 0x269   : > { %2635 = vrot.lane.b32.xlu0 %v2601_v0, %s8120_s4  ;;  %v6558_v4 = vpop.permute.xlu1 %2643  ;;  %v3134_v0 = vmul.f32 %v6426_v32, %v6338_v2 }
 0x26b   : > { %2103 = vrot.lane.b32.xlu1 %v2066_v62, %s8122_s22  ;;  %v3535_v62 = vmul.f32 %v6486_v54, %v6402_v9 }
 0x26c   : > { %v6610_v25 = vpop.permute.xlu0 %2429 }
 0x26d   : > { %2975 = vrot.lane.b32.xlu0 %v2942_v58, %s5615_s16  ;;  %v6569_v7 = vpop.permute.xlu1 %2631 }
 0x26f   : > { %2257 = vrot.lane.b32.xlu1 %v2032_v35, %s8124_s13  ;;  %v3326_v35 = vsel %vm535_vm6, %v6527_v1, %v6470_v15  ;;  %v3336_v15 = vmul.f32 %v6527_v1, %v6475_v33 }
 0x270   : > { %v3337_v32 = vmul.f32 %v3326_v35, %v6484_v3 }
 0x271   : > { %3171 = vrot.lane.b32.xlu0 %v3138_v5, %s8083_s15  ;;  %v6581_v52 = vpop.permute.xlu1 %2983 }
 0x272   : > { %8128 = vst [vmem:[#allocation12_spill] sm:$0xff] %v6581_v52 }
 0x273   : > { %2445 = vrot.lane.b32.xlu1 %v2408_v40, %s8121_s7 }
 0x275   : > { %2101 = vrot.lane.b32.xlu0 %v2065_v18, %s8122_s22  ;;  %v6595_v12 = vpop.permute.xlu1 %3185  ;;  %v2607_v18 = vmul.f32 %v6255_v47, %v6404_v8  ;;  %v3334_v47 = vmul.f32 %v3326_v35, %v6453_v22 }
 0x276   : > { %8130 = vst [vmem:[#allocation14_spill] sm:$0xff] %v6595_v12 }
 0x277   : > { %2641 = vrot.lane.b32.xlu1 %v2604_v19, %s8120_s4 }
 0x279   : > { %2255 = vrot.lane.b32.xlu0 %v2031_v26, %s8124_s13  ;;  %v6608_v31 = vpop.permute.xlu1 %2977 }
 0x27a   : > { %8132 = vst [vmem:[#allocation13_spill] sm:$0xff] %v6608_v31 }
 0x27b   : > { %2107 = vrot.lane.b32.xlu1 %v2068_v41, %s8122_s22  ;;  %v3532_v41 = vmul.f32 %v6486_v54, %v6475_v33 }
 0x27d   : > { %2443 = vrot.lane.b32.xlu0 %v2407_v46, %s8121_s7  ;;  %v6621_v58 = vpop.permute.xlu1 %3179 }
 0x27e   : > { %8134 = vst [vmem:[#allocation15_spill] sm:$0xff] %v6621_v58 }
 0x27f   : > { %2261 = vrot.lane.b32.xlu1 %v2034_v63, %s8124_s13 }
 0x281   : > { %2639 = vrot.lane.b32.xlu0 %v2603_v60, %s8120_s4  ;;  %v6632_v40 = vpop.permute.xlu1 %2971 }
 0x282   : > { %8136 = vst [vmem:[#allocation17_spill] sm:$0xff] %v6632_v40 }
 0x283   : > { %2645 = vrot.lane.b32.xlu1 %v2606_v14, %s8120_s4 }
 0x285   : > { %2979 = vrot.lane.b32.xlu0 %v2944_v55, %s5615_s16  ;;  %v6644_v26 = vpop.permute.xlu1 %3173 }
 0x286   : > { %8138 = vst [vmem:[#allocation19_spill] sm:$0xff] %v6644_v26 }
 0x287   : > { %2985 = vrot.lane.b32.xlu1 %v2947_v53, %s5615_s16 }
 0x289   : > { %2981 = vrot.lane.b32.xlu0 %v2945_v30, %s5615_s16  ;;  %v3333_v30 = vmul.f32 %v6527_v1, %v6409_v27 }
 0x28b   : > { %3181 = vrot.lane.b32.xlu1 %v3143_v50, %s8083_s15  ;;  %v3340_v50 = vmul.f32 %v3326_v35, %v6404_v8 }
 0x28d   : > { %3177 = vrot.lane.b32.xlu0 %v3141_v49, %s8083_s15 }
 0x28f   : > { %3169 = vrot.lane.b32.xlu1 %v3137_v20, %s8083_s15 }
 0x291   : > { %2449 = vrot.lane.b32.xlu0 %v6424_v61, %s8121_s7  ;;  %v2938_v61 = vmul.f32 %v6394_v28, %v6338_v2  ;;  %v2035_v28 = vmul.f32 %v6245_v42, %v6404_v8  ;;  %v6618_v42 = vpop.permute.xlu0 %2637 }
 0x293   : > { %2451 = vrot.lane.b32.xlu1 %v2411_v57, %s8121_s7  ;;  %v3529_v57 = vmul.f32 %v6486_v54, %v6409_v27 }
 0x295   : > { %2109 = vrot.lane.b32.xlu0 %v2069_v29, %s8122_s22  ;;  %v6629_v5 = vpop.permute.xlu0 %2625 }
 0x296   : > { %8135 = vst [vmem:[#allocation16_spill] sm:$0xff] %v6629_v5 }
 0x297   : > { %3167 = vrot.lane.b32.xlu1 %v8129_v6, %s8083_s15  ;;  %v3331_v6 = vmul.f32 %v3326_v35, %v6348_v13 }
 0x299   : > { %2967 = vrot.lane.b32.xlu0 %v2938_v61, %s5615_s16  ;;  %v6638_v19 = vpop.permute.xlu0 %2989 }
 0x29a   : > { %8137 = vst [vmem:[#allocation18_spill] sm:$0xff] %v6638_v19  ;;  %v5477_v19 = vld [vmem:[%s5760_s11 + $0x7] ss:$8 sm:$0x3] }
 0x29b   : > { %3377 = vrot.lane.b32.xlu1 %v3339_v45, %s8081_s12 }
 0x29d   : > { %3165 = vrot.lane.b32.xlu0 %v3135_v39, %s8083_s15  ;;  %v3707_v39 = vld [vmem:[%s8052_s6 + $0x18] sm:$0xff] }
 0x29f   : > { %3375 = vrot.lane.b32.xlu1 %v3338_v43, %s8081_s12 }
 0x2a1   : > { %2263 = vrot.lane.b32.xlu0 %v2035_v28, %s8124_s13 }
 0x2a3   : > { %3577 = vrot.lane.b32.xlu1 %v3537_v38, %s8133_s14 }
 0x2a5   : > { %3163 = vrot.lane.b32.xlu0 %v3134_v0, %s8083_s15  ;;  %v3330_v0 = vmul.f32 %v6527_v1, %v6338_v2 }
 0x2a7   : > { %3573 = vrot.lane.b32.xlu1 %v3535_v62, %s8133_s14 }
 0x2a9   : > { %3381 = vrot.lane.b32.xlu0 %v3338_v43, %s8081_s12 }
 0x2ab   : > { %3369 = vrot.lane.b32.xlu1 %v3338_v43, %s8081_s12 }
 0x2ad   : > { %3373 = vrot.lane.b32.xlu0 %v3337_v32, %s8081_s12 }
 0x2af   : > { %3571 = vrot.lane.b32.xlu1 %v3537_v38, %s8133_s14 }
 0x2b1   : > { %2647 = vrot.lane.b32.xlu0 %v2607_v18, %s8120_s4 }
 0x2b3   : > { %2987 = vrot.lane.b32.xlu1 %v6439_v23, %s5615_s16  ;;  %v3522_v23 = vsel %vm667_vm7, %v6486_v54, %v6553_v44 }
 0x2b4   : > { %v3533_v14 = vmul.f32 %v3522_v23, %v6484_v3  ;;  %v3536_v32 = vmul.f32 %v3522_v23, %v6404_v8 }
 0x2b5   : > { %3371 = vrot.lane.b32.xlu0 %v3336_v15, %s8081_s12  ;;  %v3527_v15 = vmul.f32 %v3522_v23, %v6348_v13 }
 0x2b7   : > { %v6649_v46 = vpop.permute.xlu0 %2089  ;;  %3567 = vrot.lane.b32.xlu1 %v3532_v41, %s8133_s14 }
 0x2b9   : > { %3367 = vrot.lane.b32.xlu0 %v3334_v47, %s8081_s12  ;;  %v6654_v63 = vpop.permute.xlu1 %2091 }
 0x2bb   : > { %v6659_v60 = vpop.permute.xlu0 %2243  ;;  %3363 = vrot.lane.b32.xlu1 %v3338_v43, %s8081_s12 }
 0x2bd   : > { %3569 = vrot.lane.b32.xlu0 %v3533_v14, %s8133_s14  ;;  %v6664_v55 = vpop.permute.xlu1 %2245  ;;  %v3526_v14 = vmul.f32 %v6486_v54, %v6338_v2  ;;  %v3704_v54 = vld [vmem:[%s8052_s6] sm:$0xff] }
 0x2bf   : > { %v6666_v53 = vpop.permute.xlu0 %2431  ;;  %3565 = vrot.lane.b32.xlu1 %v3537_v38, %s8133_s14 }
 0x2c1   : > { %3365 = vrot.lane.b32.xlu0 %v3333_v30, %s8081_s12  ;;  %v6672_v44 = vpop.permute.xlu1 %2433 }
 0x2c3   : > { %v6675_v49 = vpop.permute.xlu0 %2627  ;;  %3379 = vrot.lane.b32.xlu1 %v3340_v50, %s8081_s12  ;;  %v3706_v50 = vld [vmem:[%s8052_s6 + $0x10] sm:$0xff] }
 0x2c4   : > { %8139 = vst [vmem:[#allocation20_spill] sm:$0xff] %v6675_v49  ;;  %v5480_v49 = vld [vmem:[%s5760_s11 + $0x10] ss:$8 sm:$0x3] }
 0x2c5   : > { %3183 = vrot.lane.b32.xlu0 %v6451_v37, %s8083_s15  ;;  %v6680_v20 = vpop.permute.xlu1 %2629  ;;  %v3530_v37 = vmul.f32 %v3522_v23, %v6453_v22 }
 0x2c7   : > { %v6684_v29 = vpop.permute.xlu0 %2969  ;;  %3561 = vrot.lane.b32.xlu1 %v3529_v57, %s8133_s14 }
 0x2c8   : > { %8140 = vst [vmem:[#allocation21_spill] sm:$0xff] %v6684_v29 }
 0x2c9   : > { %3361 = vrot.lane.b32.xlu0 %v3331_v6, %s8081_s12  ;;  %v6689_v61 = vpop.permute.xlu1 %2095  ;;  %v5458_v6 = vld [vmem:[%s5760_s11 + $0x1] ss:$8 sm:$0x3] }
 0x2cb   : > { %v6691_v45 = vpop.permute.xlu0 %2249  ;;  %3559 = vrot.lane.b32.xlu1 %v3537_v38, %s8133_s14  ;;  %v3705_v38 = vld [vmem:[%s8052_s6 + $0x8] sm:$0xff] }
 0x2cd   : > { %3563 = vrot.lane.b32.xlu0 %v3530_v37, %s8133_s14  ;;  %v6699_v43 = vpop.permute.xlu1 %2633  ;;  %v3782_v37 = vld [vmem:[%s5760_s11] ss:$8 sm:$0x3] }
 0x2cf   : > { %v6701_v28 = vpop.permute.xlu0 %2437  ;;  %3725 = vperm.xlu1 %5545, %v3707_v39   ;;  %v8144_v39 = vld [vmem:[#allocation10_spill] sm:$0xff] }
 0x2d1   : > { %3359 = vrot.lane.b32.xlu0 %v3330_v0, %s8081_s12  ;;  %v6709_v62 = vpop.permute.xlu1 %2251  ;;  %v3818_v0 = vrot.slane %v5458_v6, %v8144_v39 }
 0x2d3   : > { %v6711_v35 = vpop.permute.xlu0 %2973  ;;  %3715 = vperm.xlu1 %5545, %v3705_v38  }
 0x2d4   : > { %8141 = vst [vmem:[#allocation22_spill] sm:$0xff] %v6711_v35  ;;  %v5471_v35 = vld [vmem:[%s5760_s11 + $0x5] ss:$8 sm:$0x3] }
 0x2d5   : > { %3575 = vrot.lane.b32.xlu0 %v3536_v32, %s8133_s14  ;;  %v6715_v18 = vpop.permute.xlu1 %2439  ;;  %v3787_v32 = vrot.slane %v3782_v37, %v8144_v39 }
 0x2d7   : > { %v6717_v1 = vpop.permute.xlu0 %2097  ;;  %3823 = vrot.lane.b32.xlu1 %v3818_v0, %s8081_s12 }
 0x2d9   : > { %3557 = vrot.lane.b32.xlu0 %v3527_v15, %s8133_s14  ;;  %v6721_v41 = vpop.permute.xlu1 %3175 }
 0x2da   : > { %8142 = vst [vmem:[#allocation23_spill] sm:$0xff] %v6721_v41 }
 0x2db   : > { %v6723_v47 = vpop.permute.xlu0 %2635  ;;  %3792 = vrot.lane.b32.xlu1 %v3787_v32, %s8133_s14 }
 0x2dd   : > { %3555 = vrot.lane.b32.xlu0 %v3526_v14, %s8133_s14  ;;  %v6728_v30 = vpop.permute.xlu1 %2103  ;;  %v5462_v14 = vld [vmem:[%s5760_s11 + $0x2] ss:$8 sm:$0x3] }
 0x2de   : > { %v4102_v58 = vrot.slane %v5462_v14, %v8144_v39 }
 0x2df   : > { %v6733_v57 = vpop.permute.xlu0 %2975 }
 0x2e0   : > { %8143 = vst [vmem:[#allocation24_spill] sm:$0xff] %v6733_v57  ;;  %4107 = vrot.lane.b32.xlu1 %v4102_v58, %s8083_s15 }
 0x2e1   : > { %3720 = vperm.xlu0 %5544, %v3706_v50   ;;  %v6735_v23 = vpop.permute.xlu1 %2257  ;;  %v8146_v50 = vld [vmem:[#allocation11_spill] sm:$0xff] }
 0x2e2   : > { %v3822_v26 = vrot.slane %v5458_v6, %v8146_v50  ;;  %v3791_v0 = vrot.slane %v3782_v37, %v8146_v50  ;;  %v4106_v32 = vrot.slane %v5462_v14, %v8146_v50 }
 0x2e3   : > { %v6743_v38 = vpop.permute.xlu0 %3171 }
 0x2e4   : > { %8145 = vst [vmem:[#allocation25_spill] sm:$0xff] %v6743_v38  ;;  %v5465_v38 = vld [vmem:[%s5760_s11 + $0x3] ss:$8 sm:$0x3] }
 0x2e5   : > { %3710 = vperm.xlu0 %5544, %v3704_v54   ;;  %v6747_v15 = vpop.permute.xlu1 %2445  ;;  %v4262_v29 = vrot.slane %v5465_v38, %v8144_v39  ;;  %v4266_v58 = vrot.slane %v5465_v38, %v8146_v50  ;;  %v4852_v38 = vrot.slane %v5477_v19, %v8144_v39 }
 0x2e7   : > { %v2102_v41 = vpop.permute.xlu0 %2101  ;;  %4267 = vrot.lane.b32.xlu1 %v4262_v29, %s5615_s16  ;;  %v4536_v29 = vrot.slane %v5471_v35, %v8146_v50 }
 0x2e9   : > { %v6753_v12 = vpop.permute.xlu1 %2641  ;;  %3825 = vrot.lane.b32.xlu0 %v3822_v26, %s8081_s12  ;;  %v4532_v26 = vrot.slane %v5471_v35, %v8144_v39  ;;  %v5012_v35 = vrot.slane %v5480_v49, %v8144_v39  ;;  %s3736_s12 = sld [smem:[#allocation4]] }
 0x2eb   : > { %v6758_v54 = vpop.permute.xlu0 %2255  ;;  %4537 = vrot.lane.b32.xlu1 %v4532_v26, %s8120_s4 }
 0x2ed   : > { %v2108_v6 = vpop.permute.xlu1 %2107  ;;  %3794 = vrot.lane.b32.xlu0 %v3791_v0, %s8133_s14  ;;  %v5474_v0 = vld [vmem:[%s5760_s11 + $0x6] ss:$8 sm:$0x3] }
 0x2ee   : > { %v4692_v14 = vrot.slane %v5474_v0, %v8144_v39  ;;  %v4696_v26 = vrot.slane %v5474_v0, %v8146_v50  ;;  %v5016_v0 = vrot.slane %v5480_v49, %v8146_v50  ;;  %v2115_v49 = vsel %vm535_vm6, %v6540_v10, %v2102_v41  ;;  %v5383_v10 = vld [vmem:[%s8051_s5 + $0x20] sm:$0xff] }
 0x2ef   : > { %v6764_v40 = vpop.permute.xlu0 %2443 }
 0x2f0   : > { %4697 = vrot.lane.b32.xlu1 %v4692_v14, %s8121_s7  ;;  %v4856_v14 = vrot.slane %v5477_v19, %v8146_v50  ;;  %v2117_v19 = vsel %vm535_vm6, %v6457_v24, %v2108_v6  ;;  %v2113_v24 = vsel %vm535_vm6, %v6497_v17, %v6689_v61 }
 0x2f1   : > { %v6769_v37 = vpop.permute.xlu1 %2261  ;;  %4109 = vrot.lane.b32.xlu0 %v4106_v32, %s8083_s15 }
 0x2f3   : > { %v6773_v57 = vpop.permute.xlu0 %2639 }
 0x2f4   : > { %4857 = vrot.lane.b32.xlu1 %v4852_v38, %s8122_s22 }
 0x2f5   : > { %v6778_v31 = vpop.permute.xlu1 %2645  ;;  %4269 = vrot.lane.b32.xlu0 %v4266_v58, %s5615_s16 }
 0x2f7   : > { %v6782_v52 = vpop.permute.xlu0 %2979 }
 0x2f8   : > { %8147 = vst [vmem:[#allocation26_spill] sm:$0xff] %v6782_v52  ;;  %5017 = vrot.lane.b32.xlu1 %v5012_v35, %s8124_s13  ;;  %v2116_v35 = vsel %vm535_vm6, %v2102_v41, %v6728_v30  ;;  %v2112_v30 = vsel %vm535_vm6, %v6649_v46, %v6654_v63 }
 0x2f9   : > { %v6787_v32 = vpop.permute.xlu1 %2985  ;;  %4539 = vrot.lane.b32.xlu0 %v4536_v29, %s8120_s4 }
 0x2fa   : > { %8148 = vst [vmem:[#allocation27_spill] sm:$0xff] %v6787_v32 }
 0x2fb   : > { %v6791_v5 = vpop.permute.xlu0 %2981 }
 0x2fc   : > { %8149 = vst [vmem:[#allocation28_spill] sm:$0xff] %v6791_v5 }
 0x2fd   : > { %v6796_v58 = vpop.permute.xlu1 %3181  ;;  %4699 = vrot.lane.b32.xlu0 %v4696_v26, %s8121_s7 }
 0x2fe   : > { %8150 = vst [vmem:[#allocation29_spill] sm:$0xff] %v6796_v58 }
 0x2ff   : > { %v6800_v52 = vpop.permute.xlu0 %3177 }
 0x301   : > { %v6803_v29 = vpop.permute.xlu1 %3169  ;;  %4859 = vrot.lane.b32.xlu0 %v4856_v14, %s8122_s22 }
 0x303   : > { %v2450_v5 = vpop.permute.xlu0 %2449 }
 0x304   : > { %v2459_v63 = vsel %vm828_vm5, %v6519_v36, %v2450_v5 }
 0x305   : > { %v2452_v38 = vpop.permute.xlu1 %2451  ;;  %5019 = vrot.lane.b32.xlu0 %v5016_v0, %s8124_s13  ;;  %v2457_v0 = vsel %vm828_vm5, %v6532_v21, %v6764_v40  ;;  %v2455_v21 = vsel %vm828_vm5, %v6545_v11, %v6701_v28  ;;  %v2269_v11 = vsel %vm667_vm7, %v6573_v59, %v6758_v54  ;;  %v2267_v59 = vsel %vm667_vm7, %v6583_v48, %v6691_v45 }
 0x306   : > { %v2460_v17 = vsel %vm828_vm5, %v2450_v5, %v2452_v38  ;;  %v2456_v5 = vsel %vm828_vm5, %v6701_v28, %v6715_v18  ;;  %v2271_v38 = vsel %vm667_vm7, %v6508_v34, %v6769_v37  ;;  %v2454_v18 = vsel %vm828_vm5, %v6666_v53, %v6672_v44  ;;  %v5385_v34 = vld [vmem:[%s8051_s5 + $0x30] sm:$0xff] }
 0x307   : > { %v2110_v32 = vpop.permute.xlu0 %2109  ;;  %v2453_v28 = vsel %vm828_vm5, %v6610_v25, %v6666_v53  ;;  %v2268_v44 = vsel %vm667_vm7, %v6691_v45, %v6709_v62  ;;  %v2266_v25 = vsel %vm667_vm7, %v6659_v60, %v6664_v55  ;;  %v2036_v53 = vld [vmem:[%s8051_s5] sm:$0xff]  ;;  %v2265_v48 = vsel %vm667_vm7, %v6597_v56, %v6659_v60 }
 0x308   : > { %v2118_v58 = vsel %vm535_vm6, %v2108_v6, %v2110_v32  ;;  %v2114_v32 = vsel %vm535_vm6, %v6689_v61, %v6717_v1  ;;  %v2111_v1 = vsel %vm535_vm6, %v6563_v51, %v6649_v46  ;;  %v2458_v6 = vsel %vm828_vm5, %v6764_v40, %v6747_v15  ;;  %v5384_v51 = vld [vmem:[%s8051_s5 + $0x28] sm:$0xff]  ;;  %v6909_v62 = vld [vmem:[#allocation2] sm:$0xff] }
 0x309   : > { %2164 = vmatprep.subr.mxu1 %v2118_v58  ;;  %v6809_v26 = vpop.permute.xlu1 %3167  ;;  %v2270_v40 = vsel %vm667_vm7, %v6758_v54, %v6735_v23  ;;  %v5396_v56 = vld [vmem:[%s8051_s5 + $0x40] sm:$0xff] }
 0x30a   : > { %2165 = vmatpush1.msra.mxu1 %v2117_v19  ;;  %v5413_v19 = vld [vmem:[%s5760_s11 + $0x4] ss:$8 sm:$0x3] }
 0x30b   : > { %v6815_v14 = vpop.permute.xlu0 %2967  ;;  %2166 = vmatprep.subr.mxu1 %v2116_v35  ;;  %v2779_v55 = vrot.slane %v5413_v19, %v8144_v39 }
 0x30c   : > { %2167 = vmatpush1.msra.mxu1 %v2115_v49 }
 0x30d   : > { %2168 = vmatprep.subr.mxu1 %v2114_v32  ;;  %v6822_v58 = vpop.permute.xlu1 %3377  ;;  %v2037_v32 = vld [vmem:[%s8051_s5 + $0x8] sm:$0xff]  ;;  %v2792_v60 = vmul.f32 %v2779_v55, %v6402_v9 }
 0x30e   : > { %2169 = vmatpush1.msra.mxu1 %v2113_v24 }
 0x30f   : > { %v6833_v41 = vpop.permute.xlu0 %3165  ;;  %2170 = vmatprep.subr.mxu1 %v2112_v30 }
 0x310   : > { %2171 = vmatpush1.msra.mxu1 %v2111_v1  ;;  %v2790_v1 = vmul.f32 %v2779_v55, %v6475_v33 }
 0x311   : > { %5387 = vmatmul.mubr.msk.f32.vlgmr.msra.gmra.mxu1 %vm2127_vm10, %v5383_v10  ;;  %2505 = vmatprep.subr.mxu1 %v2460_v17  ;;  %v6840_v61 = vpop.permute.xlu1 %3375  ;;  %v2038_v17 = vld [vmem:[%s8051_s5 + $0x10] sm:$0xff] }
 0x312   : > { %2506 = vmatpush1.msra.mxu1 %v2459_v63  ;;  %2210 = vmatprep.mubr.f32.mxu1 %v8131_v16  ;;  %v5397_v63 = vld [vmem:[%s8051_s5 + $0x48] sm:$0xff] }
 0x313   : > { %v2264_v46 = vpop.permute.xlu0 %2263  ;;  %2507 = vmatprep.subr.mxu1 %v2458_v6  ;;  %v2788_v6 = vmul.f32 %v2779_v55, %v6409_v27  ;;  %v5398_v27 = vld [vmem:[%s8051_s5 + $0x50] sm:$0xff] }
 0x314   : > { %2508 = vmatpush1.msra.mxu1 %v2457_v0  ;;  %v2272_v36 = vsel %vm667_vm7, %v6769_v37, %v2264_v46  ;;  %v2783_v37 = vrot.slane %v5413_v19, %v8146_v50  ;;  %v2654_v0 = vsel %vm997_vm4, %v6773_v57, %v6753_v12  ;;  %v2652_v12 = vsel %vm997_vm4, %v6699_v43, %v6723_v47  ;;  %v5405_v47 = vld [vmem:[%s8051_s5 + $0x60] sm:$0xff] }
 0x315   : > { %5388 = vmatmul.mubr.msk.f32.gmra.mxu1 %vm2127_vm10, %v5384_v51  ;;  %2317 = vmatprep.subr.mxu0 %v2272_v36  ;;  %v6860_v15 = vpop.permute.xlu1 %3577  ;;  %v2655_v51 = vsel %vm997_vm4, %v6558_v4, %v6778_v31  ;;  %v2786_v36 = vmul.f32 %v2779_v55, %v6338_v2  ;;  %v2653_v2 = vsel %vm997_vm4, %v6618_v42, %v6773_v57  ;;  %v5399_v42 = vld [vmem:[%s8051_s5 + $0x58] sm:$0xff]  ;;  %v8151_v57 = vld [vmem:[#allocation20_spill] sm:$0xff] }
 0x316   : > { %2509 = vmatprep.subr.mxu1 %v2456_v5  ;;  %2318 = vmatpush1.msra.mxu0 %v2271_v38  ;;  %v2793_v23 = vmul.f32 %v2783_v37, %v6404_v8  ;;  %v5386_v8 = vld [vmem:[%s8051_s5 + $0x38] sm:$0xff]  ;;  %v2791_v30 = vmul.f32 %v2783_v37, %v6484_v3  ;;  %v2789_v9 = vmul.f32 %v2783_v37, %v6453_v22 }
 0x317   : > { %2510 = vmatpush1.msra.mxu1 %v2455_v21  ;;  %v6872_v35 = vpop.permute.xlu0 %3163  ;;  %2319 = vmatprep.subr.mxu0 %v2270_v40  ;;  %v2787_v22 = vmul.f32 %v2783_v37, %v6348_v13  ;;  %v2039_v13 = vld [vmem:[%s8051_s5 + $0x18] sm:$0xff]  ;;  %v2651_v5 = vsel %vm997_vm4, %v6569_v7, %v6699_v43  ;;  %v2650_v38 = vsel %vm997_vm4, %v8151_v57, %v6680_v20  ;;  %v8152_v7 = vld [vmem:[#allocation16_spill] sm:$0xff]  ;;  %v8153_v40 = vld [vmem:[#allocation18_spill] sm:$0xff] }
 0x318   : > { %2511 = vmatprep.subr.mxu1 %v2454_v18  ;;  %2216 = vmatprep.mubr.f32.mxu1 %v8131_v16  ;;  %v2649_v43 = vsel %vm997_vm4, %v8152_v7, %v8151_v57  ;;  %v8154_v18 = vld [vmem:[#allocation27_spill] sm:$0xff]  ;;  %v5414_v37 = vld [vmem:[%s8051_s5 + $0x80] sm:$0xff] }
 0x319   : > { %2320 = vmatpush1.msra.mxu0 %v2269_v11  ;;  %2512 = vmatpush1.msra.mxu1 %v2453_v28  ;;  %v6892_v49 = vpop.permute.xlu1 %3573  ;;  %v8155_v11 = vld [vmem:[#allocation12_spill] sm:$0xff]  ;;  %v5423_v57 = vld [vmem:[%s8051_s5 + $0xa0] sm:$0xff] }
 0x31a   : > { %5389 = vmatmul.mubr.msk.f32.gmra.mxu1 %vm2127_vm10, %v5385_v34  ;;  %2321 = vmatprep.subr.mxu0 %v2268_v44  ;;  %v8156_v28 = vld [vmem:[#allocation28_spill] sm:$0xff] }
 0x31b   : > { %2835 = vmatprep.subr.mxu1 %v2793_v23  ;;  %2322 = vmatpush1.msra.mxu0 %v2267_v59  ;;  %v6898_v16 = vpop.permute.xlu0 %3381  ;;  %v2996_v44 = vsel %vm963_vm3, %v8156_v28, %v8155_v11  ;;  %v5406_v23 = vld [vmem:[%s8051_s5 + $0x68] sm:$0xff] }
 0x31c   : > { %2323 = vmatprep.subr.mxu0 %v2266_v25  ;;  %2222 = vmatprep.mubr.f32.mxu1 %v6909_v62  ;;  %v8157_v25 = vld [vmem:[#allocation26_spill] sm:$0xff] }
 0x31d   : > { %2324 = vmatpush1.msra.mxu0 %v2265_v48  ;;  %v6915_v45 = vpop.permute.xlu1 %3369  ;;  %v8159_v48 = vld [vmem:[#allocation24_spill] sm:$0xff] }
 0x31e   : > { %5390 = vmatmul.mubr.msk.f32.gmra.mxu1 %vm2127_vm10, %v5386_v8  ;;  %5391 = vmatmul.mubr.msk.f32.vlgmr.msra.gmra.mxu0 %vm2127_vm10, %v2036_v53  ;;  %v2995_v8 = vsel %vm963_vm3, %v8157_v25, %v8156_v28  ;;  %v8158_v53 = vld [vmem:[#allocation13_spill] sm:$0xff] }
 0x31f   : > { %v6920_v54 = vpop.permute.xlu0 %3373  ;;  %2363 = vmatprep.mubr.f32.mxu0 %v6909_v62  ;;  %2545 = vmatprep.mubr.f32.mxu1 %v6909_v62  ;;  %v2994_v55 = vsel %vm963_vm3, %v8159_v48, %v8158_v53 }
 0x321   : > { %v6931_v24 = vpop.permute.xlu1 %3571 }
 0x322   : > { %5392 = vmatmul.mubr.msk.f32.gmra.mxu0 %vm2127_vm10, %v2037_v32  ;;  %5400 = vmatmul.mubr.msk.f32.vlgmr.msra.gmra.mxu1 %vm2127_vm10, %v5396_v56  ;;  %v8160_v56 = vld [vmem:[#allocation22_spill] sm:$0xff] }
 0x323   : > { %2836 = vmatpush1.msra.mxu1 %v2792_v60  ;;  %v2648_v10 = vpop.permute.xlu0 %2647  ;;  %2369 = vmatprep.mubr.f32.mxu0 %v6909_v62  ;;  %v2993_v60 = vsel %vm963_vm3, %v8160_v56, %v8159_v48  ;;  %v5435_v48 = vld [vmem:[%s8051_s5 + $0xd8] sm:$0xff] }
 0x324   : > { %2837 = vmatprep.subr.mxu1 %v2791_v30  ;;  %2551 = vmatprep.mubr.f32.mxu1 %v6909_v62  ;;  %v2656_v3 = vsel %vm997_vm4, %v6778_v31, %v2648_v10  ;;  %v5415_v30 = vld [vmem:[%s8051_s5 + $0x88] sm:$0xff]  ;;  %v8161_v10 = vld [vmem:[#allocation17_spill] sm:$0xff] }
 0x325   : > { %2838 = vmatpush1.msra.mxu1 %v2790_v1  ;;  %2701 = vmatprep.subr.mxu0 %v2656_v3  ;;  %v2988_v33 = vpop.permute.xlu1 %2987  ;;  %v8162_v1 = vld [vmem:[#allocation21_spill] sm:$0xff] }
 0x326   : > { %2839 = vmatprep.subr.mxu1 %v2789_v9  ;;  %5393 = vmatmul.mubr.msk.f32.gmra.mxu0 %vm2127_vm10, %v2038_v17  ;;  %v2998_v20 = vsel %vm963_vm3, %v2988_v33, %v8153_v40  ;;  %v2997_v34 = vsel %vm963_vm3, %v8154_v18, %v2988_v33  ;;  %v2992_v17 = vsel %vm963_vm3, %v8162_v1, %v8161_v10  ;;  %v5407_v9 = vld [vmem:[%s8051_s5 + $0x70] sm:$0xff] }
 0x327   : > { %5401 = vmatmul.mubr.msk.f32.gmra.mxu1 %vm2127_vm10, %v5397_v63  ;;  %2702 = vmatpush1.msra.mxu0 %v2655_v51  ;;  %v6955_v46 = vpop.permute.xlu0 %3371  ;;  %v2991_v3 = vsel %vm963_vm3, %v6815_v14, %v8162_v1  ;;  %v5416_v51 = vld [vmem:[%s8051_s5 + $0x90] sm:$0xff]  ;;  %v3187_v18 = vsel %vm794_vm2, %v6872_v35, %v6833_v41  ;;  %v5451_v1 = vld [vmem:[%s8051_s5 + $0x108] sm:$0xff] }
 0x328   : > { %2840 = vmatpush1.msra.mxu1 %v2788_v6  ;;  %2703 = vmatprep.subr.mxu0 %v2654_v0  ;;  %v8164_v0 = vld [vmem:[#allocation29_spill] sm:$0xff]  ;;  %v5443_v10 = vld [vmem:[%s8051_s5 + $0xf0] sm:$0xff] }
 0x329   : > { %2841 = vmatprep.subr.mxu1 %v2787_v22  ;;  %2375 = vmatprep.mubr.f32.mxu0 %v6909_v62  ;;  %v6968_v4 = vpop.permute.xlu1 %3567  ;;  %v8163_v22 = vld [vmem:[#allocation14_spill] sm:$0xff] }
 0x32a   : > { %2842 = vmatpush1.msra.mxu1 %v2786_v36  ;;  %2557 = vmatprep.mubr.f32.mxu1 %v6909_v62 }
 0x32b   : > { %2704 = vmatpush1.msra.mxu0 %v2653_v2  ;;  %5402 = vmatmul.mubr.msk.f32.gmra.mxu1 %vm2127_vm10, %v5398_v27  ;;  %v6978_v31 = vpop.permute.xlu0 %3367 }
 0x32c   : > { %5394 = vmatmul.mubr.msk.f32.gmra.mxu0 %vm2127_vm10, %v2039_v13  ;;  %2705 = vmatprep.subr.mxu0 %v2652_v12  ;;  %v8165_v13 = vld [vmem:[#allocation15_spill] sm:$0xff]  ;;  %v5417_v12 = vld [vmem:[%s8051_s5 + $0x98] sm:$0xff] }
 0x32d   : > { %2706 = vmatpush1.msra.mxu0 %v2651_v5  ;;  %2563 = vmatprep.mubr.f32.mxu1 %v6909_v62  ;;  %v6994_v21 = vpop.permute.xlu1 %3363  ;;  %v3192_v2 = vsel %vm794_vm2, %v6800_v52, %v8165_v13  ;;  %v8166_v5 = vld [vmem:[#allocation23_spill] sm:$0xff] }
 0x32e   : > { %2707 = vmatprep.subr.mxu0 %v2650_v38  ;;  %2741 = vmatprep.mubr.f32.mxu0 %v6909_v62  ;;  %v8167_v38 = vld [vmem:[#allocation19_spill] sm:$0xff] }
 0x32f   : > { %2708 = vmatpush1.msra.mxu0 %v2649_v43  ;;  %5403 = vmatmul.mubr.msk.f32.gmra.mxu1 %vm2127_vm10, %v5399_v42  ;;  %v7003_v19 = vpop.permute.xlu0 %3569  ;;  %v3191_v42 = vsel %vm794_vm2, %v8166_v5, %v6800_v52 }
 0x330   : > { %5409 = vmatmul.mubr.msk.f32.vlgmr.msra.gmra.mxu0 %vm2127_vm10, %v5405_v47  ;;  %3043 = vmatprep.subr.mxu0 %v2998_v20  ;;  %v8168_v47 = vld [vmem:[#allocation25_spill] sm:$0xff]  ;;  %v3188_v20 = vsel %vm794_vm2, %v6833_v41, %v6809_v26  ;;  %v5424_v26 = vld [vmem:[%s8051_s5 + $0xa8] sm:$0xff]  ;;  %v3386_v41 = vsel %vm501_vm0, %v6978_v31, %v6915_v45  ;;  %v5425_v45 = vld [vmem:[%s8051_s5 + $0xb0] sm:$0xff]  ;;  %v3583_v53 = vsel %vm471_vm1, %v6968_v4, %v7003_v19 }
 0x331   : > { %3044 = vmatpush1.msra.mxu0 %v2997_v34  ;;  %2747 = vmatprep.mubr.f32.mxu0 %v6909_v62  ;;  %v7018_v59 = vpop.permute.xlu1 %3565  ;;  %v3190_v7 = vsel %vm794_vm2, %v8168_v47, %v8167_v38  ;;  %v3189_v43 = vsel %vm794_vm2, %v6803_v29, %v8168_v47  ;;  %v3388_v29 = vsel %vm501_vm0, %v6920_v54, %v6840_v61 }
 0x332   : > { %3045 = vmatprep.subr.mxu0 %v2996_v44  ;;  %2875 = vmatprep.mubr.f32.mxu1 %v6909_v62  ;;  %v3387_v34 = vsel %vm501_vm0, %v6955_v46, %v6920_v54 }
 0x333   : > { %3046 = vmatpush1.msra.mxu0 %v2995_v8  ;;  %5418 = vmatmul.mubr.msk.f32.vlgmr.msra.gmra.mxu1 %vm2127_vm10, %v5414_v37  ;;  %v7028_v32 = vpop.permute.xlu0 %3365  ;;  %v3584_v8 = vsel %vm471_vm1, %v7003_v19, %v6931_v24 }
 0x334   : > { %5410 = vmatmul.mubr.msk.f32.gmra.mxu0 %vm2127_vm10, %v5406_v23  ;;  %3047 = vmatprep.subr.mxu0 %v2994_v55  ;;  %v3385_v54 = vsel %vm501_vm0, %v7028_v32, %v6978_v31  ;;  %v5433_v31 = vld [vmem:[%s8051_s5 + $0xc8] sm:$0xff]  ;;  %v5426_v23 = vld [vmem:[%s8051_s5 + $0xb8] sm:$0xff]  ;;  %v5441_v55 = vld [vmem:[%s8051_s5 + $0xe0] sm:$0xff] }
 0x335   : > { %3048 = vmatpush1.msra.mxu0 %v2993_v60  ;;  %2753 = vmatprep.mubr.f32.mxu0 %v6909_v62  ;;  %v3380_v63 = vpop.permute.xlu1 %3379  ;;  %v5450_v60 = vld [vmem:[%s8051_s5 + $0x100] sm:$0xff] }
 0x336   : > { %3049 = vmatprep.subr.mxu0 %v2992_v17  ;;  %2881 = vmatprep.mubr.f32.mxu1 %v6909_v62  ;;  %v3390_v33 = vsel %vm501_vm0, %v3380_v63, %v6898_v16  ;;  %v5408_v16 = vld [vmem:[%s8051_s5 + $0x78] sm:$0xff]  ;;  %v3389_v52 = vsel %vm501_vm0, %v6822_v58, %v3380_v63  ;;  %v5432_v58 = vld [vmem:[%s8051_s5 + $0xc0] sm:$0xff]  ;;  %v5452_v63 = vld [vmem:[%s8051_s5 + $0x110] sm:$0xff] }
 0x337   : > { %3050 = vmatpush1.msra.mxu0 %v2991_v3  ;;  %5419 = vmatmul.mubr.msk.f32.gmra.mxu1 %vm2127_vm10, %v5415_v30  ;;  %v3184_v6 = vpop.permute.xlu0 %3183 }
 0x338   : > { %5411 = vmatmul.mubr.msk.f32.gmra.mxu0 %vm2127_vm10, %v5407_v9  ;;  %3435 = vmatprep.subr.mxu0 %v3390_v33  ;;  %v3194_v14 = vsel %vm794_vm2, %v3184_v6, %v8163_v22  ;;  %v3193_v36 = vsel %vm794_vm2, %v8164_v0, %v3184_v6  ;;  %v5444_v9 = vld [vmem:[%s8051_s5 + $0xf8] sm:$0xff] }
 0x339   : > { %2759 = vmatprep.mubr.f32.mxu0 %v6909_v62  ;;  %2887 = vmatprep.mubr.f32.mxu1 %v6909_v62  ;;  %v3562_v61 = vpop.permute.xlu1 %3561  ;;  %v5453_v6 = vld [vmem:[%s8051_s5 + $0x118] sm:$0xff] }
 0x33a   : > { %3239 = vmatprep.subr.mxu1 %v3194_v14 }
 0x33b   : > { %5420 = vmatmul.mubr.msk.f32.gmra.mxu1 %vm2127_vm10, %v5416_v51  ;;  %v3362_v27 = vpop.permute.xlu0 %3361 }
 0x33c   : > { %5412 = vmatmul.mubr.msk.f32.gmra.mxu0 %vm2127_vm10, %v5408_v16  ;;  %3240 = vmatpush1.msra.mxu1 %v3193_v36  ;;  %v3384_v37 = vsel %vm501_vm0, %v3362_v27, %v6994_v21 }
 0x33d   : > { %3241 = vmatprep.subr.mxu1 %v3192_v2  ;;  %2893 = vmatprep.mubr.f32.mxu1 %v6909_v62  ;;  %v3560_v44 = vpop.permute.xlu1 %3559 }
 0x33e   : > { %3083 = vmatprep.mubr.f32.mxu0 %v6909_v62  ;;  %3242 = vmatpush1.msra.mxu1 %v3191_v42 }
 0x33f   : > { %5421 = vmatmul.mubr.msk.f32.gmra.mxu1 %vm2127_vm10, %v5417_v12  ;;  %3243 = vmatprep.subr.mxu1 %v3190_v7  ;;  %v7087_v40 = vpop.permute.xlu0 %3563 }
 0x340   : > { %5427 = vmatmul.mubr.msk.f32.vlgmr.msra.gmra.mxu0 %vm2127_vm10, %v5423_v57  ;;  %3244 = vmatpush1.msra.mxu1 %v3189_v43  ;;  %v3582_v24 = vsel %vm471_vm1, %v7087_v40, %v7018_v59  ;;  %v3581_v4 = vsel %vm471_vm1, %v3562_v61, %v7087_v40  ;;  %v5442_v59 = vld [vmem:[%s8051_s5 + $0xe8] sm:$0xff] }
 0x341   : > { %3436 = vmatpush1.msra.mxu0 %v3389_v52  ;;  %3245 = vmatprep.subr.mxu1 %v3188_v20 }
 0x342   : > { %3437 = vmatprep.subr.mxu0 %v3388_v29  ;;  %3089 = vmatprep.mubr.f32.mxu0 %v6909_v62 }
 0x343   : > { %3438 = vmatpush1.msra.mxu0 %v3387_v34  ;;  %3246 = vmatpush1.msra.mxu1 %v3187_v18  ;;  %v3360_v35 = vpop.permute.xlu0 %3359 }
 0x344   : > { %3279 = vmatprep.mubr.f32.mxu1 %v6909_v62  ;;  %3439 = vmatprep.subr.mxu0 %v3386_v41  ;;  %v3383_v46 = vsel %vm501_vm0, %v3360_v35, %v3362_v27 }
 0x345   : > { %5428 = vmatmul.mubr.msk.f32.gmra.mxu0 %vm2127_vm10, %v5424_v26  ;;  %5436 = vmatmul.mubr.msk.f32.vlgmr.msra.gmra.mxu1 %vm2127_vm10, %v5432_v58 }
 0x346   : > { %3440 = vmatpush1.msra.mxu0 %v3385_v54  ;;  %3095 = vmatprep.mubr.f32.mxu0 %v6909_v62 }
 0x347   : > { %3441 = vmatprep.subr.mxu0 %v3384_v37  ;;  %3285 = vmatprep.mubr.f32.mxu1 %v6909_v62  ;;  %v3576_v11 = vpop.permute.xlu0 %3575 }
 0x348   : > { %3442 = vmatpush1.msra.mxu0 %v3383_v46  ;;  %v3586_v28 = vsel %vm471_vm1, %v3576_v11, %v6860_v15  ;;  %v3585_v21 = vsel %vm471_vm1, %v6892_v49, %v3576_v11  ;;  %v5434_v15 = vld [vmem:[%s8051_s5 + $0xd0] sm:$0xff] }
 0x349   : > { %5429 = vmatmul.mubr.msk.f32.gmra.mxu0 %vm2127_vm10, %v5425_v45  ;;  %5437 = vmatmul.mubr.msk.f32.gmra.mxu1 %vm2127_vm10, %v5433_v31 }
 0x34a   : > { %3101 = vmatprep.mubr.f32.mxu0 %v6909_v62  ;;  %3291 = vmatprep.mubr.f32.mxu1 %v6909_v62  ;;  %v7147_v49 = vpop.permute.xlu1 %3725 }
 0x34b   : > { %3631 = vmatprep.subr.mxu1 %v3586_v28  ;;  %v3558_v25 = vpop.permute.xlu0 %3557  ;;  %8169 = vst [vmem:[#allocation20_spill] sm:$0xff] %v7147_v49 }
 0x34c   : > { %3632 = vmatpush1.msra.mxu1 %v3585_v21  ;;  %v3580_v56 = vsel %vm471_vm1, %v3558_v25, %v3560_v44 }
 0x34d   : > { %5430 = vmatmul.mubr.msk.f32.gmra.mxu0 %vm2127_vm10, %v5426_v23  ;;  %5438 = vmatmul.mubr.msk.f32.gmra.mxu1 %vm2127_vm10, %v5434_v15 }
 0x34e   : > { %3633 = vmatprep.subr.mxu1 %v3584_v8  ;;  %3297 = vmatprep.mubr.f32.mxu1 %v6909_v62  ;;  %v7179_v30 = vpop.permute.xlu1 %3715 }
 0x34f   : > { %3475 = vmatprep.mubr.f32.mxu0 %v6909_v62  ;;  %3634 = vmatpush1.msra.mxu1 %v3583_v53  ;;  %v3556_v32 = vpop.permute.xlu0 %3555  ;;  %8170 = vst [vmem:[#allocation16_spill] sm:$0xff] %v7179_v30 }
 0x350   : > { %3635 = vmatprep.subr.mxu1 %v3582_v24  ;;  %v3579_v19 = vsel %vm471_vm1, %v3556_v32, %v3558_v25 }
 0x351   : > { %5439 = vmatmul.mubr.msk.f32.gmra.mxu1 %vm2127_vm10, %v5435_v48  ;;  %5445 = vmatmul.mubr.msk.f32.vlgmr.msra.gmra.mxu0 %vm2127_vm10, %v5441_v55 }
 0x352   : > { %3636 = vmatpush1.msra.mxu1 %v3581_v4  ;;  %3481 = vmatprep.mubr.f32.mxu0 %v6909_v62  ;;  %v7192_v17 = vpop.permute.xlu1 %3823 }
 0x353   : > { %3637 = vmatprep.subr.mxu1 %v3580_v56  ;;  %3671 = vmatprep.mubr.f32.mxu1 %v6909_v62  ;;  %v3840_v3 = vmul.f32 %v6909_v62, %v7192_v17 }
 0x354   : > { %3638 = vmatpush1.msra.mxu1 %v3579_v19 }
 0x355   : > { %5446 = vmatmul.mubr.msk.f32.gmra.mxu0 %vm2127_vm10, %v5442_v59  ;;  %5454 = vmatmul.mubr.msk.f32.vlgmr.msra.gmra.mxu1 %vm2127_vm10, %v5450_v60 }
 0x356   : > { %3487 = vmatprep.mubr.f32.mxu0 %v6909_v62  ;;  %3677 = vmatprep.mubr.f32.mxu1 %v6909_v62  ;;  %v7220_v51 = vpop.permute.xlu1 %3792 }
 0x357   : > { %3875 = vrot.lane.b32.xlu1 %v3840_v3, %s8122_s22  ;;  %3869 = vrot.lane.b32.xlu0 %v3840_v3, %s8122_s22  ;;  %v3809_v22 = vmul.f32 %v6909_v62, %v7220_v51 }
 0x359   : > { %5447 = vmatmul.mubr.msk.f32.gmra.mxu0 %vm2127_vm10, %v5443_v10  ;;  %5455 = vmatmul.mubr.msk.f32.gmra.mxu1 %vm2127_vm10, %v5451_v1 }
 0x35a   : > { %3493 = vmatprep.mubr.f32.mxu0 %v6909_v62  ;;  %3683 = vmatprep.mubr.f32.mxu1 %v6909_v62  ;;  %v7228_v16 = vpop.permute.xlu1 %4107 }
 0x35b   : > { %3863 = vrot.lane.b32.xlu1 %v3840_v3, %s8122_s22  ;;  %3857 = vrot.lane.b32.xlu0 %v3840_v3, %s8122_s22  ;;  %8173 = vst [vmem:[#allocation12_spill] sm:$0xff] %v7228_v16  ;;  %v4124_v0 = vmul.f32 %v6909_v62, %v7228_v16 }
 0x35c   : > { %v7210_v33 = vpop.permute.xlu0 %3720 }
 0x35d   : > { %5448 = vmatmul.mubr.msk.f32.gmra.mxu0 %vm2127_vm10, %v5444_v9  ;;  %5456 = vmatmul.mubr.msk.f32.gmra.mxu1 %vm2127_vm10, %v5452_v63  ;;  %8171 = vst [vmem:[#allocation18_spill] sm:$0xff] %v7210_v33 }
 0x35e   : > { %3689 = vmatprep.mubr.f32.mxu1 %v6909_v62  ;;  %3964 = vmatprep.mubr.f32.mxu0 %v6909_v62  ;;  %v7245_v2 = vpop.permute.xlu1 %4267 }
 0x35f   : > { %4001 = vrot.lane.b32.xlu1 %v3809_v22, %s8124_s13  ;;  %3995 = vrot.lane.b32.xlu0 %v3809_v22, %s8124_s13  ;;  %8175 = vst [vmem:[#allocation26_spill] sm:$0xff] %v7245_v2  ;;  %v4284_v12 = vmul.f32 %v6909_v62, %v7245_v2 }
 0x360   : > { %v7225_v14 = vpop.permute.xlu0 %3710 }
 0x361   : > { %5457 = vmatmul.mubr.msk.f32.gmra.mxu1 %vm2127_vm10, %v5453_v6  ;;  %8172 = vst [vmem:[#allocation27_spill] sm:$0xff] %v7225_v14 }
 0x362   : > { %4090 = vmatprep.mubr.f32.mxu1 %v6909_v62 }
 0x363   : > { %3989 = vrot.lane.b32.xlu0 %v3809_v22, %s8124_s13  ;;  %4159 = vrot.lane.b32.xlu1 %v4124_v0, %s8121_s7 }
 0x364   : > { %v7233_v36 = vpop.permute.xlu0 %3825 }
 0x367   : > { %3983 = vrot.lane.b32.xlu0 %v3809_v22, %s8124_s13  ;;  %4153 = vrot.lane.b32.xlu1 %v4124_v0, %s8121_s7 }
 0x368   : > { %v7237_v27 = vpop.permute.xlu0 %3794 }
 0x36b   : > { %4141 = vrot.lane.b32.xlu0 %v4124_v0, %s8121_s7  ;;  %4147 = vrot.lane.b32.xlu1 %v4124_v0, %s8121_s7 }
 0x36c   : > { %v7241_v13 = vpop.permute.xlu0 %4109 }
 0x36d   : > { %8174 = vst [vmem:[#allocation28_spill] sm:$0xff] %v7241_v13 }
 0x36f   : > { %4319 = vrot.lane.b32.xlu1 %v4284_v12, %s8120_s4  ;;  %4313 = vrot.lane.b32.xlu0 %v4284_v12, %s8120_s4 }
 0x370   : > { %v7249_v5 = vpop.permute.xlu0 %4269 }
 0x371   : > { %8176 = vst [vmem:[#allocation13_spill] sm:$0xff] %v7249_v5 }
 0x373   : > { %4307 = vrot.lane.b32.xlu1 %v4284_v12, %s8120_s4  ;;  %4301 = vrot.lane.b32.xlu0 %v4284_v12, %s8120_s4 }
 0x374   : > { %v7253_v42 = vpop.permute.xlu0 %4539 }
 0x375   : > { %8177 = vst [vmem:[#allocation24_spill] sm:$0xff] %v7253_v42  ;;  %v4553_v57 = vmul.f32 %v6909_v62, %v7253_v42  ;;  %v7319_v42 = vpop.permute.xlu1 %4537 }
 0x377   : > { %4587 = vrot.lane.b32.xlu1 %v4553_v57, %s5615_s16  ;;  %4593 = vrot.lane.b32.xlu0 %v4553_v57, %s5615_s16 }
 0x378   : > { %v7259_v38 = vpop.permute.xlu0 %4699 }
 0x379   : > { %8178 = vst [vmem:[#allocation22_spill] sm:$0xff] %v7259_v38  ;;  %v4716_v47 = vmul.f32 %v6909_v62, %v7259_v38 }
 0x37b   : > { %4753 = vrot.lane.b32.xlu1 %v4716_v47, %s8179_s23 }
 0x37c   : > { %v7271_v7 = vpop.permute.xlu0 %4859 }
 0x37d   : > { %8180 = vst [vmem:[#allocation17_spill] sm:$0xff] %v7271_v7  ;;  %v7275_v43 = vmul.f32 %v6909_v62, %v7271_v7 }
 0x37f   : > { %4581 = vrot.lane.b32.xlu1 %v4553_v57, %s5615_s16  ;;  %8181 = vst [vmem:[#allocation21_spill] sm:$0xff] %v7275_v43 }
 0x380   : > { %v7279_v40 = vpop.permute.xlu0 %5019 }
 0x381   : > { %8183 = vst [vmem:[#allocation14_spill] sm:$0xff] %v7279_v40  ;;  %v7285_v52 = vmul.f32 %v6909_v62, %v7279_v40 }
 0x383   : > { %4747 = vrot.lane.b32.xlu1 %v4716_v47, %s8179_s23  ;;  %8184 = vst [vmem:[#allocation29_spill] sm:$0xff] %v7285_v52 }
 0x387   : > { %4575 = vrot.lane.b32.xlu1 %v4553_v57, %s5615_s16 }
 0x38b   : > { %4741 = vrot.lane.b32.xlu1 %v4716_v47, %s8179_s23 }
 0x38f   : > { %4735 = vrot.lane.b32.xlu1 %v4716_v47, %s8179_s23 }
 0x393   : > { %4913 = vrot.lane.b32.xlu1 %v7275_v43, %s8182_s28 }
 0x397   : > { %4907 = vrot.lane.b32.xlu1 %v7275_v43, %s8182_s28 }
 0x39b   : > { %5073 = vrot.lane.b32.xlu1 %v7285_v52, %s8133_s14 }
 0x39f   : > { %4901 = vrot.lane.b32.xlu1 %v7275_v43, %s8182_s28 }
 0x3d1   : > { %v2206_v20 = vpop.f32.mrf.mxu1 }
 0x3d3   : > { %v2208_v29 = vpop.f32.mrf.mxu1 }
 0x3d5   : > { %v2212_v18 = vpop.f32.mrf.mxu1 }
 0x3d7   : > { %v2214_v34 = vpop.f32.mrf.mxu1 }
 0x3da   : > { %v7291_v26 = vpop.f32.mrf.mxu1 }
 0x3dc   : > { %v7293_v58 = vpop.f32.mrf.mxu1 }
 0x3de   : > { %v7295_v61 = vpop.f32.mrf.mxu1  ;;  %v2359_v41 = vpop.f32.mrf.mxu0 }
 0x3df   : > { %v2360_v43 = vadd.f32 %v2359_v41, %v2206_v20 }
 0x3e0   : > { %v7297_v35 = vpop.f32.mrf.mxu1  ;;  %v2361_v62 = vpop.f32.mrf.mxu0 }
 0x3e1   : > { %v2362_v7 = vadd.f32 %v2361_v62, %v2208_v29 }
 0x3e2   : > { %v2365_v54 = vpop.f32.mrf.mxu0  ;;  %v2547_v46 = vpop.f32.mrf.mxu1 }
 0x3e3   : > { %v2570_v38 = vadd.f32 %v2547_v46, %v2360_v43  ;;  %v2366_v13 = vadd.f32 %v2365_v54, %v2212_v18  ;;  %v7328_v43 = vsel %vm501_vm0, %v7192_v17, %v7233_v36  ;;  %v7331_v18 = vpop.permute.xlu1 %4697  ;;  %v7341_v17 = vstv %s3736_s12 }
 0x3e4   : > { %v2367_v37 = vpop.f32.mrf.mxu0  ;;  %v2549_v45 = vpop.f32.mrf.mxu1 }
 0x3e5   : > { %v2571_v49 = vadd.f32 %v2549_v45, %v2362_v7 }
 0x3e6   : > { %v2371_v31 = vpop.f32.mrf.mxu0 }
 0x3e7   : > { %v2553_v11 = vpop.f32.mrf.mxu1  ;;  %v2372_v29 = vadd.f32 %v2371_v31, %v7291_v26 }
 0x3e8   : > { %v2373_v28 = vpop.f32.mrf.mxu0  ;;  %v2572_v20 = vadd.f32 %v2553_v11, %v2366_v13 }
 0x3e9   : > { %v2555_v44 = vpop.f32.mrf.mxu1 }
 0x3eb   : > { %v2559_v21 = vpop.f32.mrf.mxu1 }
 0x3ec   : > { %v2377_v23 = vpop.f32.mrf.mxu0  ;;  %v2574_v46 = vadd.f32 %v2559_v21, %v2372_v29 }
 0x3ed   : > { %v7299_v15 = vpop.f32.mrf.mxu1  ;;  %v2378_v26 = vadd.f32 %v2377_v23, %v7295_v61 }
 0x3ee   : > { %v2379_v25 = vpop.f32.mrf.mxu0 }
 0x3ef   : > { %v7301_v8 = vpop.f32.mrf.mxu1  ;;  %v2380_v45 = vadd.f32 %v2379_v25, %v7297_v35 }
 0x3f0   : > { %v2743_v53 = vpop.f32.mrf.mxu0 }
 0x3f1   : > { %v7303_v48 = vpop.f32.mrf.mxu1  ;;  %v2766_v16 = vadd.f32 %v2743_v53, %v2570_v38 }
 0x3f2   : > { %v2745_v55 = vpop.f32.mrf.mxu0 }
 0x3f3   : > { %v2877_v24 = vpop.f32.mrf.mxu1 }
 0x3f4   : > { %v2749_v32 = vpop.f32.mrf.mxu0  ;;  %v2900_v14 = vadd.f32 %v2877_v24, %v2766_v16  ;;  %v2374_v16 = vadd.f32 %v2373_v28, %v7293_v58  ;;  %v2576_v28 = vadd.f32 %v7301_v8, %v2378_v26 }
 0x3f5   : > { %v2879_v4 = vpop.f32.mrf.mxu1 }
 0x3f6   : > { %v2751_v19 = vpop.f32.mrf.mxu0  ;;  %v2575_v31 = vadd.f32 %v7299_v15, %v2374_v16 }
 0x3f7   : > { %v2883_v56 = vpop.f32.mrf.mxu1 }
 0x3f8   : > { %v2755_v59 = vpop.f32.mrf.mxu0 }
 0x3f9   : > { %v2885_v60 = vpop.f32.mrf.mxu1 }
 0x3fa   : > { %v2757_v10 = vpop.f32.mrf.mxu0 }
 0x3fb   : > { %v7305_v1 = vpop.f32.mrf.mxu1  ;;  %v2771_v61 = vadd.f32 %v2757_v10, %v2575_v31 }
 0x3fc   : > { %v7307_v9 = vpop.f32.mrf.mxu0 }
 0x3fd   : > { %v7309_v63 = vpop.f32.mrf.mxu1  ;;  %v2772_v35 = vadd.f32 %v7307_v9, %v2576_v28 }
 0x3fe   : > { %v7311_v3 = vpop.f32.mrf.mxu0 }
 0x3ff   : > { %v7313_v6 = vpop.f32.mrf.mxu1 }
 0x400   : > { %8185 = vst [vmem:[#allocation15_spill] sm:$0xff] %v7313_v6  ;;  %v3085_v22 = vpop.f32.mrf.mxu0  ;;  %v2368_v6 = vadd.f32 %v2367_v37, %v2214_v34  ;;  %v2768_v34 = vadd.f32 %v2749_v32, %v2572_v20  ;;  %v2577_v32 = vadd.f32 %v7303_v48, %v2380_v45 }
 0x401   : > { %v7315_v0 = vpop.f32.mrf.mxu1  ;;  %v3108_v38 = vadd.f32 %v3085_v22, %v2900_v14 }
 0x402   : > { %8186 = vst [vmem:[#allocation23_spill] sm:$0xff] %v7315_v0  ;;  %v3087_v12 = vpop.f32.mrf.mxu0  ;;  %v2767_v0 = vadd.f32 %v2745_v55, %v2571_v49  ;;  %v7336_v49 = vsel %vm471_vm1, %v7220_v51, %v7237_v27  ;;  %v2573_v13 = vadd.f32 %v2555_v44, %v2368_v6  ;;  %v2902_v11 = vadd.f32 %v2883_v56, %v2768_v34  ;;  %v7352_v56 = vpop.permute.xlu1 %4857 }
 0x403   : > { %v2770_v44 = vadd.f32 %v2755_v59, %v2574_v46  ;;  %v2773_v8 = vadd.f32 %v7311_v3, %v2577_v32 }
 0x404   : > { %v2901_v7 = vadd.f32 %v2879_v4, %v2767_v0  ;;  %v2769_v51 = vadd.f32 %v2751_v19, %v2573_v13 }
 0x405   : > { %v3091_v57 = vpop.f32.mrf.mxu0  ;;  %v3281_v47 = vpop.f32.mrf.mxu1  ;;  %v2904_v15 = vadd.f32 %v7305_v1, %v2770_v44 }
 0x406   : > { %v3109_v14 = vadd.f32 %v3087_v12, %v2901_v7  ;;  %v3304_v37 = vadd.f32 %v3281_v47, %v3108_v38  ;;  %v2903_v21 = vadd.f32 %v2885_v60, %v2769_v51  ;;  %v3110_v23 = vadd.f32 %v3091_v57, %v2902_v11  ;;  %v8190_v47 = vld [vmem:[#allocation27_spill] sm:$0xff]  ;;  %v7366_v31 = vpop.permute.xlu1 %5017  ;;  %v8193_v51 = vld [vmem:[#allocation16_spill] sm:$0xff] }
 0x407   : > { %v3093_v39 = vpop.f32.mrf.mxu0  ;;  %v3283_v50 = vpop.f32.mrf.mxu1  ;;  %v8188_v60 = vld [vmem:[#allocation15_spill] sm:$0xff] }
 0x408   : > { %v3305_v55 = vadd.f32 %v3283_v50, %v3109_v14  ;;  %v2905_v50 = vadd.f32 %v7309_v63, %v2771_v61  ;;  %v3111_v59 = vadd.f32 %v3093_v39, %v2903_v21  ;;  %v2906_v0 = vadd.f32 %v8188_v60, %v2772_v35  ;;  %v8195_v35 = vld [vmem:[#allocation18_spill] sm:$0xff] }
 0x409   : > { %v7317_v52 = vpop.f32.mrf.mxu0  ;;  %v3287_v40 = vpop.f32.mrf.mxu1  ;;  %v8191_v1 = vld [vmem:[#allocation23_spill] sm:$0xff] }
 0x40a   : > { %8187 = vst [vmem:[#allocation19_spill] sm:$0xff] %v7317_v52  ;;  %v3306_v22 = vadd.f32 %v3287_v40, %v3110_v23  ;;  %v2907_v29 = vadd.f32 %v8191_v1, %v2773_v8 }
 0x40b   : > { %v3099_v2 = vpop.f32.mrf.mxu0  ;;  %v3289_v5 = vpop.f32.mrf.mxu1 }
 0x40c   : > { %v3113_v7 = vadd.f32 %v3099_v2, %v2905_v50  ;;  %v3307_v38 = vadd.f32 %v3289_v5, %v3111_v59 }
 0x40d   : > { %v7321_v33 = vpop.f32.mrf.mxu0  ;;  %v3293_v30 = vpop.f32.mrf.mxu1 }
 0x40e   : > { %v3114_v63 = vadd.f32 %v7321_v33, %v2906_v0 }
 0x40f   : > { %v7323_v41 = vpop.f32.mrf.mxu0  ;;  %v3295_v52 = vpop.f32.mrf.mxu1 }
 0x411   : > { %v7339_v62 = vpop.f32.mrf.mxu1  ;;  %v3477_v54 = vpop.f32.mrf.mxu0  ;;  %v8189_v12 = vld [vmem:[#allocation19_spill] sm:$0xff] }
 0x412   : > { %v3500_v24 = vadd.f32 %v3477_v54, %v3304_v37  ;;  %v3112_v57 = vadd.f32 %v8189_v12, %v2904_v15  ;;  %v3309_v54 = vadd.f32 %v3295_v52, %v3113_v7  ;;  %v3310_v44 = vadd.f32 %v7339_v62, %v3114_v63  ;;  %v8201_v7 = vld [vmem:[#allocation20_spill] sm:$0xff] }
 0x413   : > { %v7346_v53 = vpop.f32.mrf.mxu1  ;;  %v3479_v58 = vpop.f32.mrf.mxu0 }
 0x414   : > { %v3501_v25 = vadd.f32 %v3479_v58, %v3305_v55  ;;  %v3308_v34 = vadd.f32 %v3293_v30, %v3112_v57  ;;  %v3115_v30 = vadd.f32 %v7323_v41, %v2907_v29 }
 0x415   : > { %v3483_v4 = vpop.f32.mrf.mxu0  ;;  %v3673_v6 = vpop.f32.mrf.mxu1 }
 0x416   : > { %v3696_v19 = vadd.f32 %v3673_v6, %v3500_v24  ;;  %v3502_v16 = vadd.f32 %v3483_v4, %v3306_v22  ;;  %v3311_v4 = vadd.f32 %v7346_v53, %v3115_v30  ;;  %v7388_v22 = vpop.permute.xlu1 %3875 }
 0x417   : > { %v3485_v48 = vpop.f32.mrf.mxu0  ;;  %v3675_v10 = vpop.f32.mrf.mxu1 }
 0x418   : > { %v3728_v9 = vadd.f32 %v8190_v47, %v3696_v19  ;;  %v3697_v20 = vadd.f32 %v3675_v10, %v3501_v25  ;;  %v3503_v26 = vadd.f32 %v3485_v48, %v3307_v38 }
 0x419   : > { %v3489_v13 = vpop.f32.mrf.mxu0  ;;  %v3679_v3 = vpop.f32.mrf.mxu1 }
 0x41a   : > { %vm3737_vm11 = vcmp.gt.f32.partialorder %v3728_v9, 0.0  ;;  %v3746_v39 = vmul.f32 %v7341_v17, %v3728_v9  ;;  %v3729_v40 = vadd.f32 %v8190_v47, %v3697_v20  ;;  %v3698_v46 = vadd.f32 %v3679_v3, %v3502_v16  ;;  %v8198_v47 = vld [vmem:[#allocation28_spill] sm:$0xff]  ;;  %v7418_v63 = vpop.permute.xlu1 %3863 }
 0x41b   : > { %v3491_v14 = vpop.f32.mrf.mxu0  ;;  %v3681_v37 = vpop.f32.mrf.mxu1  ;;  %v3504_v5 = vadd.f32 %v3489_v13, %v3308_v34 }
 0x41c   : > { %v7363_v45 = vsel %vm3737_vm11, %v3728_v9, %v3746_v39  ;;  %vm3738_vm12 = vcmp.gt.f32.partialorder %v3729_v40, 0.0  ;;  %v3747_v2 = vmul.f32 %v7341_v17, %v3729_v40  ;;  %v3730_v11 = vadd.f32 %v8193_v51, %v3698_v46  ;;  %v8199_v9 = vld [vmem:[#allocation12_spill] sm:$0xff]  ;;  %v8205_v46 = vld [vmem:[#allocation26_spill] sm:$0xff] }
 0x41d   : > { %8192 = vst [vmem:[#allocation25_spill] sm:$0xff] %v7363_v45  ;;  %v3699_v58 = vadd.f32 %v3681_v37, %v3503_v26  ;;  %v3495_v28 = vpop.f32.mrf.mxu0  ;;  %v3685_v33 = vpop.f32.mrf.mxu1  ;;  %v3832_v52 = vmul.f32 %v7328_v43, %v7363_v45  ;;  %v3505_v24 = vadd.f32 %v3491_v14, %v3309_v54  ;;  %v3801_v59 = vmul.f32 %v7336_v49, %v7363_v45  ;;  %v8204_v26 = vld [vmem:[#allocation13_spill] sm:$0xff] }
 0x41e   : > { %v7373_v55 = vsel %vm3738_vm12, %v3729_v40, %v3747_v2  ;;  %v3700_v32 = vadd.f32 %v3685_v33, %v3504_v5  ;;  %vm3739_vm13 = vcmp.gt.f32.partialorder %v3730_v11, 0.0  ;;  %v3748_v61 = vmul.f32 %v7341_v17, %v3730_v11 }
 0x41f   : > { %8194 = vst [vmem:[#allocation15_spill] sm:$0xff] %v7373_v55  ;;  %v3731_v21 = vadd.f32 %v8193_v51, %v3699_v58  ;;  %v3687_v41 = vpop.f32.mrf.mxu1  ;;  %3859 = vrot.lane.b32.xlu0 %v3832_v52, %s8122_s22  ;;  %v3833_v23 = vmul.f32 %v7233_v36, %v7373_v55  ;;  %v3506_v6 = vadd.f32 %v3495_v28, %v3310_v44  ;;  %v3497_v15 = vpop.f32.mrf.mxu0  ;;  %v8207_v58 = vld [vmem:[#allocation24_spill] sm:$0xff]  ;;  %v8208_v44 = vld [vmem:[#allocation22_spill] sm:$0xff] }
 0x420   : > { %v3732_v62 = vadd.f32 %v8195_v35, %v3700_v32  ;;  %v3701_v25 = vadd.f32 %v3687_v41, %v3505_v24  ;;  %v7382_v19 = vsel %vm3739_vm13, %v3730_v11, %v3748_v61  ;;  %v3507_v0 = vadd.f32 %v3497_v15, %v3311_v4  ;;  %v7436_v11 = vpop.permute.xlu1 %4001  ;;  %v8210_v4 = vld [vmem:[#allocation14_spill] sm:$0xff] }
 0x421   : > { %8196 = vst [vmem:[#allocation19_spill] sm:$0xff] %v7382_v19  ;;  %vm3740_vm14 = vcmp.gt.f32.partialorder %v3731_v21, 0.0  ;;  %v3749_v8 = vmul.f32 %v7341_v17, %v3731_v21  ;;  %v3691_v50 = vpop.f32.mrf.mxu1  ;;  %3861 = vrot.lane.b32.xlu1 %v3833_v23, %s8122_s22  ;;  %3764 = vst [vmem:[#allocation2 + $0x40] sm:$0xff] %v7382_v19  ;;  %v3802_v57 = vmul.f32 %v7237_v27, %v7373_v55 }
 0x422   : > { %vm3741_vm15 = vcmp.gt.f32.partialorder %v3732_v62, 0.0  ;;  %v3750_v53 = vmul.f32 %v7341_v17, %v3732_v62  ;;  %v3733_v48 = vadd.f32 %v8195_v35, %v3701_v25  ;;  %v3702_v10 = vadd.f32 %v3691_v50, %v3506_v6 }
 0x423   : > { %v7393_v60 = vsel %vm3740_vm14, %v3731_v21, %v3749_v8  ;;  %v3693_v12 = vpop.f32.mrf.mxu1  ;;  %3985 = vrot.lane.b32.xlu0 %v3801_v59, %s8124_s13  ;;  %v7401_v20 = vsel %vm794_vm2, %v8199_v9, %v8198_v47  ;;  %v4117_v40 = vmul.f32 %v8198_v47, %v7373_v55  ;;  %v4271_v14 = vsel %vm963_vm3, %v8205_v46, %v8204_v26  ;;  %v8209_v21 = vld [vmem:[#allocation17_spill] sm:$0xff] }
 0x424   : > { %8197 = vst [vmem:[#allocation27_spill] sm:$0xff] %v7393_v60  ;;  %3765 = vst [vmem:[#allocation2 + $0x78] sm:$0xff] %v7393_v60  ;;  %v7404_v1 = vsel %vm3741_vm15, %v3732_v62, %v3750_v53  ;;  %vm3742_vm8 = vcmp.gt.f32.partialorder %v3733_v48, 0.0  ;;  %v3751_v29 = vmul.f32 %v7341_v17, %v3733_v48  ;;  %v3734_v38 = vadd.f32 %v8201_v7, %v3702_v10  ;;  %v7490_v59 = vpop.permute.xlu1 %4159 }
 0x425   : > { %8200 = vst [vmem:[#allocation23_spill] sm:$0xff] %v7404_v1  ;;  %v3703_v16 = vadd.f32 %v3693_v12, %v3507_v0  ;;  %3987 = vrot.lane.b32.xlu1 %v3802_v57, %s8124_s13  ;;  %v4116_v13 = vmul.f32 %v7401_v20, %v7363_v45  ;;  %v4276_v2 = vmul.f32 %v4271_v14, %v7363_v45 }
 0x426   : > { %v7411_v3 = vsel %vm3742_vm8, %v3733_v48, %v3751_v29  ;;  %vm3743_vm9 = vcmp.gt.f32.partialorder %v3734_v38, 0.0  ;;  %v3752_v34 = vmul.f32 %v7341_v17, %v3734_v38  ;;  %v4277_v30 = vmul.f32 %v8204_v26, %v7373_v55 }
 0x427   : > { %8202 = vst [vmem:[#allocation16_spill] sm:$0xff] %v7411_v3  ;;  %v3735_v39 = vadd.f32 %v8201_v7, %v3703_v16  ;;  %4143 = vrot.lane.b32.xlu0 %v4116_v13, %s8121_s7  ;;  %v4545_v51 = vmul.f32 %v7319_v42, %v7363_v45  ;;  %v7443_v28 = vmul.f32 %v7401_v20, %v7404_v1 }
 0x428   : > { %v7420_v54 = vsel %vm3743_vm9, %v3734_v38, %v3752_v34  ;;  %v7446_v33 = vmul.f32 %v4271_v14, %v7404_v1  ;;  %v3835_v52 = vmul.f32 %v7328_v43, %v7382_v19  ;;  %v4701_v24 = vsel %vm828_vm5, %v7331_v18, %v8208_v44  ;;  %v7519_v38 = vpop.permute.xlu1 %4153 }
 0x429   : > { %8203 = vst [vmem:[#allocation18_spill] sm:$0xff] %v7420_v54  ;;  %vm3744_vm11 = vcmp.gt.f32.partialorder %v3735_v39, 0.0  ;;  %v3753_v37 = vmul.f32 %v7341_v17, %v3735_v39  ;;  %4145 = vrot.lane.b32.xlu1 %v4117_v40, %s8121_s7  ;;  %v4541_v17 = vsel %vm997_vm4, %v7319_v42, %v8207_v58  ;;  %v4705_v61 = vmul.f32 %v7331_v18, %v7363_v45 }
 0x42a   : > { %v7455_v32 = vmul.f32 %v4541_v17, %v7411_v3  ;;  %v7462_v41 = vsel %vm535_vm6, %v7352_v56, %v8209_v21  ;;  %v7465_v23 = vmul.f32 %v4701_v24, %v7411_v3  ;;  %v5021_v6 = vsel %vm667_vm7, %v7366_v31, %v8210_v4 }
 0x42b   : > { %v7428_v5 = vsel %vm3744_vm11, %v3735_v39, %v3753_v37  ;;  %4303 = vrot.lane.b32.xlu0 %v4276_v2, %s8120_s4  ;;  %v7476_v62 = vmul.f32 %v7336_v49, %v7420_v54  ;;  %v7480_v15 = vmul.f32 %v7401_v20, %v7420_v54  ;;  %v7483_v25 = vmul.f32 %v4271_v14, %v7420_v54 }
 0x42c   : > { %8206 = vst [vmem:[#allocation28_spill] sm:$0xff] %v7428_v5  ;;  %v7472_v35 = vmul.f32 %v4541_v17, %v7428_v5  ;;  %v7486_v8 = vmul.f32 %v5021_v6, %v7411_v3  ;;  %v4279_v50 = vmul.f32 %v4271_v14, %v7382_v19  ;;  %v7494_v53 = vmul.f32 %v7462_v41, %v7373_v55  ;;  %v7530_v39 = vpop.permute.xlu1 %4147 }
 0x42d   : > { %4305 = vrot.lane.b32.xlu1 %v4277_v30, %s8120_s4  ;;  %v7497_v48 = vmul.f32 %v5021_v6, %v7393_v60  ;;  %v7500_v10 = vmul.f32 %v4701_v24, %v7428_v5  ;;  %v7504_v0 = vmul.f32 %v7462_v41, %v7428_v5  ;;  %v7507_v12 = vmul.f32 %v5021_v6, %v7428_v5 }
 0x42e   : > { %v7510_v57 = vmul.f32 %v5021_v6, %v7373_v55  ;;  %v4546_v9 = vmul.f32 %v4541_v17, %v7373_v55  ;;  %v4708_v29 = vmul.f32 %v7331_v18, %v7382_v19  ;;  %v4706_v7 = vmul.f32 %v4701_v24, %v7373_v55 }
 0x42f   : > { %4571 = vrot.lane.b32.xlu0 %v4545_v51, %s5615_s16  ;;  %v3805_v16 = vmul.f32 %v7237_v27, %v7393_v60  ;;  %v3804_v13 = vmul.f32 %v7336_v49, %v7382_v19  ;;  %v4120_v34 = vmul.f32 %v8198_v47, %v7393_v60  ;;  %v4119_v40 = vmul.f32 %v7401_v20, %v7382_v19 }
 0x430   : > { %v4711_v46 = vmul.f32 %v7331_v18, %v7404_v1  ;;  %v4548_v14 = vmul.f32 %v7319_v42, %v7382_v19  ;;  %v7541_v37 = vpop.permute.xlu1 %4319  ;;  %v3839_v2 = vmul.f32 %v7233_v36, %v7411_v3  ;;  %v3836_v20 = vmul.f32 %v7233_v36, %v7393_v60 }
 0x431   : > { %3865 = vrot.lane.b32.xlu1 %v3835_v52, %s8122_s22  ;;  %v3808_v30 = vmul.f32 %v7237_v27, %v7411_v3  ;;  %v4280_v58 = vmul.f32 %v8204_v26, %v7393_v60  ;;  %v4123_v52 = vmul.f32 %v8198_v47, %v7411_v3  ;;  %v4549_v44 = vmul.f32 %v4541_v17, %v7393_v60 }
 0x432   : > { %v4283_v21 = vmul.f32 %v8204_v26, %v7411_v3  ;;  %v4709_v4 = vmul.f32 %v4701_v24, %v7393_v60  ;;  %v3841_v6 = vmul.f32 %v7328_v43, %v7420_v54  ;;  %v4869_v17 = vmul.f32 %v7462_v41, %v7393_v60 }
 0x433   : > { %4731 = vrot.lane.b32.xlu0 %v4705_v61, %s8179_s23  ;;  %v3838_v24 = vmul.f32 %v7328_v43, %v7404_v1 }
 0x434   : > { %v7552_v51 = vpop.permute.xlu1 %4307 }
 0x435   : > { %4309 = vrot.lane.b32.xlu1 %v4279_v50, %s8120_s4 }
 0x437   : > { %4573 = vrot.lane.b32.xlu0 %v4546_v9, %s5615_s16  ;;  %v4554_v9 = vmul.f32 %v7319_v42, %v7420_v54 }
 0x438   : > { %v7562_v61 = vpop.permute.xlu1 %4587 }
 0x439   : > { %4737 = vrot.lane.b32.xlu1 %v4708_v29, %s8179_s23 }
 0x43b   : > { %4733 = vrot.lane.b32.xlu0 %v4706_v7, %s8179_s23  ;;  %v4714_v7 = vmul.f32 %v7331_v18, %v7420_v54  ;;  %v5034_v18 = vmul.f32 %v7366_v31, %v7420_v54 }
 0x43c   : > { %v7572_v50 = vpop.permute.xlu1 %4753 }
 0x43d   : > { %3993 = vrot.lane.b32.xlu1 %v3805_v16, %s8124_s13  ;;  %8211 = vst [vmem:[#allocation12_spill] sm:$0xff] %v7572_v50  ;;  %v7588_v16 = vpop.permute.xlu0 %3869 }
 0x43f   : > { %3991 = vrot.lane.b32.xlu0 %v3804_v13, %s8124_s13  ;;  %v3807_v13 = vmul.f32 %v7336_v49, %v7404_v1 }
 0x440   : > { %v7583_v29 = vpop.permute.xlu1 %4581 }
 0x441   : > { %4151 = vrot.lane.b32.xlu1 %v4120_v34, %s8121_s7  ;;  %v4874_v34 = vmul.f32 %v7352_v56, %v7420_v54 }
 0x443   : > { %4149 = vrot.lane.b32.xlu0 %v4119_v40, %s8121_s7  ;;  %v7599_v40 = vpop.permute.xlu0 %3857 }
 0x444   : > { %v7596_v43 = vpop.permute.xlu1 %4747 }
 0x445   : > { %4743 = vrot.lane.b32.xlu1 %v4711_v46, %s8179_s23  ;;  %8212 = vst [vmem:[#allocation20_spill] sm:$0xff] %v7596_v43  ;;  %v3811_v46 = vmul.f32 %v7237_v27, %v7428_v5 }
 0x447   : > { %4577 = vrot.lane.b32.xlu0 %v4548_v14, %s5615_s16  ;;  %v7612_v14 = vpop.permute.xlu0 %3995 }
 0x448   : > { %v7606_v49 = vpop.permute.xlu1 %4575 }
 0x449   : > { %3873 = vrot.lane.b32.xlu1 %v3839_v2, %s8122_s22  ;;  %v4126_v2 = vmul.f32 %v8198_v47, %v7428_v5 }
 0x44b   : > { %3867 = vrot.lane.b32.xlu0 %v3836_v20, %s8122_s22  ;;  %v7625_v27 = vpop.permute.xlu0 %3989 }
 0x44c   : > { %v7620_v20 = vpop.permute.xlu1 %4741 }
 0x44d   : > { %3999 = vrot.lane.b32.xlu1 %v3808_v30, %s8124_s13  ;;  %8213 = vst [vmem:[#allocation13_spill] sm:$0xff] %v7620_v20  ;;  %v8214_v30 = vld [vmem:[#allocation29_spill] sm:$0xff] }
 0x44f   : > { %4311 = vrot.lane.b32.xlu0 %v4280_v58, %s8120_s4  ;;  %v7634_v47 = vpop.permute.xlu0 %3983  ;;  %v4286_v58 = vmul.f32 %v8204_v26, %v7428_v5 }
 0x451   : > { %4157 = vrot.lane.b32.xlu1 %v4123_v52, %s8121_s7  ;;  %v5031_v52 = vmul.f32 %v7366_v31, %v7404_v1 }
 0x453   : > { %4579 = vrot.lane.b32.xlu0 %v4549_v44, %s5615_s16 }
 0x455   : > { %4317 = vrot.lane.b32.xlu1 %v4283_v21, %s8120_s4  ;;  %v7646_v21 = vpop.permute.xlu0 %4141 }
 0x457   : > { %4739 = vrot.lane.b32.xlu0 %v4709_v4, %s8179_s23  ;;  %v8218_v4 = vld [vmem:[#allocation21_spill] sm:$0xff] }
 0x459   : > { %3877 = vrot.lane.b32.xlu1 %v3841_v6, %s8122_s22  ;;  %v7653_v26 = vpop.permute.xlu0 %4313 }
 0x45b   : > { %4899 = vrot.lane.b32.xlu0 %v4869_v17, %s8182_s28 }
 0x45d   : > { %4589 = vrot.lane.b32.xlu1 %v4554_v9, %s5615_s16  ;;  %v7663_v6 = vpop.permute.xlu0 %4301 }
 0x45f   : > { %3871 = vrot.lane.b32.xlu0 %v3838_v24, %s8122_s22 }
 0x461   : > { %4749 = vrot.lane.b32.xlu1 %v4714_v7, %s8179_s23 }
 0x463   : > { %3997 = vrot.lane.b32.xlu0 %v3807_v13, %s8124_s13  ;;  %v4868_v13 = vmul.f32 %v7352_v56, %v7382_v19 }
 0x465   : > { %4909 = vrot.lane.b32.xlu1 %v4874_v34, %s8182_s28 }
 0x467   : > { %4155 = vrot.lane.b32.xlu0 %v7443_v28, %s8121_s7  ;;  %v4551_v28 = vmul.f32 %v7319_v42, %v7404_v1  ;;  %v7630_v42 = vpop.permute.xlu1 %4735 }
 0x468   : > { %8215 = vst [vmem:[#allocation26_spill] sm:$0xff] %v7630_v42 }
 0x469   : > { %5069 = vrot.lane.b32.xlu1 %v5034_v18, %s8133_s14 }
 0x46b   : > { %4315 = vrot.lane.b32.xlu0 %v7446_v33, %s8120_s4  ;;  %v4871_v33 = vmul.f32 %v7352_v56, %v7404_v1  ;;  %v7643_v44 = vpop.permute.xlu1 %4913 }
 0x46c   : > { %8216 = vst [vmem:[#allocation24_spill] sm:$0xff] %v7643_v44 }
 0x46d   : > { %4005 = vrot.lane.b32.xlu1 %v3811_v46, %s8124_s13 }
 0x46f   : > { %4583 = vrot.lane.b32.xlu0 %v4551_v28, %s5615_s16 }
 0x471   : > { %4163 = vrot.lane.b32.xlu1 %v4126_v2, %s8121_s7 }
 0x473   : > { %4903 = vrot.lane.b32.xlu0 %v4871_v33, %s8182_s28 }
 0x475   : > { %5067 = vrot.lane.b32.xlu1 %v8214_v30, %s8133_s14 }
 0x477   : > { %4585 = vrot.lane.b32.xlu0 %v7455_v32, %s5615_s16  ;;  %v4872_v32 = vmul.f32 %v7462_v41, %v7411_v3 }
 0x479   : > { %4323 = vrot.lane.b32.xlu1 %v4286_v58, %s8120_s4 }
 0x47b   : > { %4745 = vrot.lane.b32.xlu0 %v7465_v23, %s8179_s23  ;;  %v7655_v23 = vpop.permute.xlu1 %4907 }
 0x47c   : > { %8217 = vst [vmem:[#allocation22_spill] sm:$0xff] %v7655_v23 }
 0x47d   : > { %5063 = vrot.lane.b32.xlu1 %v5031_v52, %s8133_s14  ;;  %v4865_v52 = vmul.f32 %v7352_v56, %v7363_v45 }
 0x47f   : > { %4905 = vrot.lane.b32.xlu0 %v4872_v32, %s8182_s28  ;;  %v7665_v41 = vpop.permute.xlu1 %5073 }
 0x480   : > { %8219 = vst [vmem:[#allocation17_spill] sm:$0xff] %v7665_v41 }
 0x481   : > { %4591 = vrot.lane.b32.xlu1 %v7472_v35, %s5615_s16  ;;  %v7671_v35 = vpop.permute.xlu0 %4593 }
 0x483   : > { %4003 = vrot.lane.b32.xlu0 %v7476_v62, %s8124_s13  ;;  %v5028_v62 = vmul.f32 %v7366_v31, %v7382_v19  ;;  %v4902_v17 = vpop.permute.xlu1 %4901  ;;  %s5621_s13 = smov [#allocation7]  }
 0x485   : > { %4895 = vrot.lane.b32.xlu1 %v8218_v4, %s8182_s28 }
 0x487   : > { %4161 = vrot.lane.b32.xlu0 %v7480_v15, %s8121_s7  ;;  %v3842_v15 = vmul.f32 %v7233_v36, %v7428_v5  ;;  %s5178_s7 = scalar_lea.sflag [#allocation8], %s5753_s25 }
 0x489   : > { %5061 = vrot.lane.b32.xlu1 %v8214_v30, %s8133_s14 }
 0x48b   : > { %4321 = vrot.lane.b32.xlu0 %v7483_v25, %s8120_s4  ;;  %v5167_v25 = vld [vmem:[%s8055_s9] sm:$0xff] }
 0x48d   : > { %5057 = vrot.lane.b32.xlu1 %v5028_v62, %s8133_s14 }
 0x48f   : > { %3879 = vrot.lane.b32.xlu0 %v3842_v15, %s8122_s22 }
 0x491   : > { %v7679_v9 = vpop.permute.xlu0 %3859  ;;  %5055 = vrot.lane.b32.xlu1 %v8214_v30, %s8133_s14 }
 0x493   : > { %5065 = vrot.lane.b32.xlu0 %v7486_v8, %s8133_s14  ;;  %v3862_v24 = vpop.permute.xlu1 %3861 }
 0x494   : > { %v7690_v7 = vsel %vm535_vm6, %v7679_v9, %v3862_v24 }
 0x495   : > { %v7692_v36 = vpop.permute.xlu0 %3985  ;;  %5170 = vperm.xlu1 %5545, %v5167_v25  }
 0x497   : > { %4897 = vrot.lane.b32.xlu0 %v4868_v13, %s8182_s28  ;;  %v3988_v34 = vpop.permute.xlu1 %3987 }
 0x498   : > { %v7699_v18 = vsel %vm667_vm7, %v7692_v36, %v3988_v34 }
 0x499   : > { %v7701_v46 = vpop.permute.xlu0 %4143 }
 0x49b   : > { %4893 = vrot.lane.b32.xlu0 %v7494_v53, %s8182_s28  ;;  %v4146_v8 = vpop.permute.xlu1 %4145 }
 0x49c   : > { %v7707_v28 = vsel %vm828_vm5, %v7701_v46, %v4146_v8 }
 0x49d   : > { %v7709_v2 = vpop.permute.xlu0 %4303 }
 0x49f   : > { %5059 = vrot.lane.b32.xlu0 %v7497_v48, %s8133_s14  ;;  %v4306_v33 = vpop.permute.xlu1 %4305 }
 0x4a0   : > { %v7715_v30 = vsel %vm997_vm4, %v7709_v2, %v4306_v33 }
 0x4a1   : > { %v4572_v58 = vpop.permute.xlu0 %4571 }
 0x4a3   : > { %4891 = vrot.lane.b32.xlu0 %v4865_v52, %s8182_s28  ;;  %v7720_v53 = vpop.permute.xlu1 %3865 }
 0x4a5   : > { %v4732_v32 = vpop.permute.xlu0 %4731 }
 0x4a7   : > { %4751 = vrot.lane.b32.xlu0 %v7500_v10, %s8179_s23  ;;  %v7724_v4 = vpop.permute.xlu1 %4309  ;;  %s5490_s23 = sshll.u32 %s8263_s30, 8 }
 0x4a8   : > { %s5190_s4 = scalar_lea.hbm %s8056_s10, %s5490_s23 }
 0x4a9   : > { %v7726_v48 = vpop.permute.xlu0 %4573 }
 0x4aa   : > { %v7730_v62 = vsel %vm963_vm3, %v4572_v58, %v7726_v48 }
 0x4ab   : > { %4911 = vrot.lane.b32.xlu0 %v7504_v0, %s8182_s28  ;;  %v4738_v56 = vpop.permute.xlu1 %4737  ;;  %v5025_v0 = vmul.f32 %v7366_v31, %v7363_v45 }
 0x4ad   : > { %v7734_v15 = vpop.permute.xlu0 %4733 }
 0x4ae   : > { %8220 = vst [vmem:[#allocation14_spill] sm:$0xff] %v7734_v15  ;;  %v7738_v25 = vsel %vm794_vm2, %v4732_v32, %v7734_v15 }
 0x4af   : > { %8221 = vst [vmem:[#allocation29_spill] sm:$0xff] %v7738_v25  ;;  %5071 = vrot.lane.b32.xlu0 %v7507_v12, %s8133_s14  ;;  %v3994_v10 = vpop.permute.xlu1 %3993 }
 0x4b1   : > { %v3992_v24 = vpop.permute.xlu0 %3991 }
 0x4b3   : > { %5053 = vrot.lane.b32.xlu0 %v7510_v57, %s8133_s14  ;;  %v4152_v13 = vpop.permute.xlu1 %4151 }
 0x4b5   : > { %v7744_v34 = vpop.permute.xlu0 %4149 }
 0x4b6   : > { %v7750_v8 = vsel %vm828_vm5, %v7744_v34, %v4152_v13 }
 0x4b7   : > { %5051 = vrot.lane.b32.xlu0 %v5025_v0, %s8133_s14  ;;  %v7753_v33 = vpop.permute.xlu1 %4743  ;;  %s5553_s14 = sshll.u32 %s5621_s13, 4  ;;  %s5554_s14 = int_to_ptr.vmem [resolvable:$false] %s5553_s14 }
 0x4b8   : > { %8222 = vst [vmem:[#allocation21_spill] sm:$0xff] %v7753_v33  ;;  %s5555_s15 = scalar_lea.vmem %s5554_s14, 512 }
 0x4b9   : > { %v4578_v12 = vpop.permute.xlu0 %4577 }
 0x4bb   : > { %v7755_v58 = vpop.permute.xlu1 %3873 }
 0x4bd   : > { %v3868_v52 = vpop.permute.xlu0 %3867 }
 0x4be   : > { %v7759_v57 = vsel %vm535_vm6, %v7720_v53, %v3868_v52 }
 0x4bf   : > { %v4000_v32 = vpop.permute.xlu1 %3999 }
 0x4c1   : > { %v4312_v25 = vpop.permute.xlu0 %4311 }
 0x4c2   : > { %v7763_v31 = vsel %vm997_vm4, %v7724_v4, %v4312_v25 }
 0x4c3   : > { %v7765_v13 = vpop.permute.xlu1 %4157 }
 0x4c5   : > { %v7767_v41 = vpop.permute.xlu0 %4579 }
 0x4c6   : > { %v7771_v0 = vsel %vm963_vm3, %v4578_v12, %v7767_v41 }
 0x4c7   : > { %v4318_v15 = vpop.permute.xlu1 %4317 }
 0x4c9   : > { %v7773_v42 = vpop.permute.xlu0 %4739 }
 0x4ca   : > { %8223 = vst [vmem:[#allocation30_spill] sm:$0xff] %v7773_v42  ;;  %v7777_v52 = vsel %vm794_vm2, %v4738_v56, %v7773_v42 }
 0x4cb   : > { %8224 = vst [vmem:[#allocation31_spill] sm:$0xff] %v7777_v52  ;;  %v3878_v23 = vpop.permute.xlu1 %3877 }
 0x4cd   : > { %v7779_v20 = vpop.permute.xlu0 %4899 }
 0x4ce   : > { %8225 = vst [vmem:[#allocation32_spill] sm:$0xff] %v7779_v20  ;;  %v7783_v25 = vsel %vm501_vm0, %v7779_v20, %v4902_v17 }
 0x4cf   : > { %8226 = vst [vmem:[#allocation33_spill] sm:$0xff] %v7783_v25  ;;  %v7785_v44 = vpop.permute.xlu1 %4589 }
 0x4d1   : > { %v3872_v33 = vpop.permute.xlu0 %3871 }
 0x4d3   : > { %v7787_v43 = vpop.permute.xlu1 %4749 }
 0x4d4   : > { %8227 = vst [vmem:[#allocation34_spill] sm:$0xff] %v7787_v43 }
 0x4d5   : > { %v3998_v12 = vpop.permute.xlu0 %3997 }
 0x4d6   : > { %v4011_v54 = vsel %vm667_vm7, %v7612_v14, %v3998_v12 }
 0x4d7   : > { %v7789_v50 = vpop.permute.xlu1 %4909 }
 0x4d8   : > { %8228 = vst [vmem:[#allocation35_spill] sm:$0xff] %v7789_v50 }
 0x4d9   : > { %v7791_v45 = vpop.permute.xlu0 %4155 }
 0x4db   : > { %v7793_v56 = vpop.permute.xlu1 %5069 }
 0x4dc   : > { %8229 = vst [vmem:[#allocation36_spill] sm:$0xff] %v7793_v56 }
 0x4dd   : > { %v4316_v55 = vpop.permute.xlu0 %4315 }
 0x4df   : > { %v4006_v42 = vpop.permute.xlu1 %4005 }
 0x4e1   : > { %v7795_v52 = vpop.permute.xlu0 %4583 }
 0x4e3   : > { %v7801_v20 = vpop.permute.xlu1 %4163 }
 0x4e5   : > { %v7797_v19 = vpop.permute.xlu0 %4903 }
 0x4e6   : > { %8230 = vst [vmem:[#allocation37_spill] sm:$0xff] %v7797_v19  ;;  %v4012_v19 = vsel %vm667_vm7, %v3998_v12, %v4000_v32 }
 0x4e7   : > { %v7805_v43 = vpop.permute.xlu1 %5067 }
 0x4e8   : > { %8231 = vst [vmem:[#allocation38_spill] sm:$0xff] %v7805_v43  ;;  %v4010_v43 = vsel %vm667_vm7, %v3992_v24, %v3994_v10 }
 0x4e9   : > { %v7799_v17 = vpop.permute.xlu0 %4585 }
 0x4eb   : > { %v4324_v3 = vpop.permute.xlu1 %4323 }
 0x4ed   : > { %v7803_v25 = vpop.permute.xlu0 %4745 }
 0x4f1   : > { %v7807_v60 = vpop.permute.xlu0 %4905 }
 0x4f2   : > { %8232 = vst [vmem:[#allocation39_spill] sm:$0xff] %v7807_v60  ;;  %v4009_v60 = vsel %vm667_vm7, %v7625_v27, %v3992_v24  ;;  %v4329_v27 = vsel %vm997_vm4, %v7653_v26, %v4316_v55  ;;  %v4325_v26 = vsel %vm997_vm4, %v7663_v6, %v7709_v2  ;;  %v3883_v6 = vsel %vm535_vm6, %v7418_v63, %v7720_v53  ;;  %v8236_v24 = vld [vmem:[#allocation18_spill] sm:$0xff] }
 0x4f3   : > { %v3881_v2 = vsel %vm535_vm6, %v7599_v40, %v7679_v9  ;;  %v4600_v63 = vsel %vm963_vm3, %v7799_v17, %v7562_v61  ;;  %v4598_v61 = vsel %vm963_vm3, %v7767_v41, %v7583_v29  ;;  %v4596_v29 = vsel %vm963_vm3, %v7726_v48, %v7606_v49  ;;  %v5472_v41 = vld [vmem:[%s8054_s8 + $0x28] sm:$0xff] }
 0x4f4   : > { %v4167_v53 = vsel %vm828_vm5, %v7530_v39, %v7744_v34  ;;  %v8233_v49 = vld [vmem:[#allocation11_spill] sm:$0xff]  ;;  %v4165_v39 = vsel %vm828_vm5, %v7646_v21, %v7701_v46 }
 0x4f5   : > { %v4004_v50 = vpop.permute.xlu0 %4003 }
 0x4f6   : > { %v4013_v1 = vsel %vm667_vm7, %v7436_v11, %v4004_v50  ;;  %v4014_v56 = vsel %vm667_vm7, %v4004_v50, %v4006_v42  ;;  %v4007_v11 = vsel %vm667_vm7, %v7634_v47, %v7692_v36  ;;  %v7826_v50 = vpop.permute.xlu1 %5063  ;;  %v3887_v47 = vsel %vm535_vm6, %v7388_v22, %v3878_v23  ;;  %v5466_v22 = vld [vmem:[%s8054_s8 + $0x18] sm:$0xff] }
 0x4f7   : > { %4050 = vmatprep.subr.mxu1 %v4014_v56  ;;  %v8242_v56 = vld [vmem:[#allocation25_spill] sm:$0xff] }
 0x4f8   : > { %4051 = vmatpush1.msra.mxu1 %v4013_v1  ;;  %v3812_v1 = vld [vmem:[%s8054_s8] sm:$0xff] }
 0x4f9   : > { %v7815_v5 = vpop.permute.xlu0 %4161  ;;  %4052 = vmatprep.subr.mxu1 %v4012_v19 }
 0x4fa   : > { %4053 = vmatpush1.msra.mxu1 %v4011_v54  ;;  %v4592_v36 = vpop.permute.xlu1 %4591  ;;  %v4172_v40 = vsel %vm828_vm5, %v7815_v5, %v7801_v20  ;;  %v4171_v9 = vsel %vm828_vm5, %v7490_v59, %v7815_v5  ;;  %v4170_v20 = vsel %vm828_vm5, %v7791_v45, %v7765_v13  ;;  %v4169_v5 = vsel %vm828_vm5, %v7519_v38, %v7791_v45  ;;  %v5468_v59 = vld [vmem:[%s5760_s11 + $0x4] ss:$8 sm:$0x3]  ;;  %s431_s11 = scalar_lea.vmem [#allocation7], %s5287_s29 }
 0x4fb   : > { %4054 = vmatprep.subr.mxu1 %v4010_v43  ;;  %v7834_v43 = vld [vmem:[#allocation2] sm:$0xff]  ;;  %v4426_v45 = vrot.slane %v5468_v59, %v8233_v49  ;;  %s5192_s28 = sshll.u32 %s431_s11, 4  ;;  %s5193_s28 = int_to_ptr.vmem [resolvable:$true] %s5192_s28 }
 0x4fc   : > { %4055 = vmatpush1.msra.mxu1 %v4009_v60  ;;  %v4330_v60 = vsel %vm997_vm4, %v4316_v55, %v4318_v15  ;;  %v3886_v55 = vsel %vm535_vm6, %v3872_v33, %v7755_v58  ;;  %v8235_v15 = vld [vmem:[#allocation28_spill] sm:$0xff]  ;;  %s5549_s22 = scalar_lea.vmem %s5193_s28, 256  ;;  %p5556_p2 = scmp.lt.s32.totalorder %s5193_s28, %s5554_s14 }
 0x4fd   : > { %v4322_v14 = vpop.permute.xlu0 %4321  ;;  %4056 = vmatprep.subr.mxu1 %v7699_v18  ;;  %v3885_v18 = vsel %vm535_vm6, %v7588_v16, %v3872_v33  ;;  %v4601_v16 = vsel %vm963_vm3, %v7785_v44, %v4592_v36  ;;  %v5459_v44 = vld [vmem:[%s8054_s8 + $0x8] sm:$0xff]  ;;  %v4436_v10 = vmul.f32 %v4426_v45, %v8235_v15  ;;  %p5550_p13 = scmp.ne.s32.totalorder %s5193_s28, %s5549_s22  ;;  %p5557_p3 = scmp.lt.s32.totalorder %s5555_s15, %s5549_s22 }
 0x4fe   : > { %v4331_v19 = vsel %vm997_vm4, %v7541_v37, %v4322_v14  ;;  %4057 = vmatpush1.msra.mxu1 %v4007_v11  ;;  %v4332_v54 = vsel %vm997_vm4, %v4322_v14, %v4324_v3  ;;  %v4327_v3 = vsel %vm997_vm4, %v7552_v51, %v7724_v4  ;;  %v8234_v4 = vld [vmem:[#allocation10_spill] sm:$0xff]  ;;  %v4896_v46 = vpop.permute.xlu1 %4895 }
 0x4ff   : > { %4368 = vmatprep.subr.mxu1 %v4332_v54  ;;  %5461 = vmatmul.mubr.msk.f32.vlgmr.msra.gmra.mxu1 %vm2127_vm10, %v3812_v1  ;;  %v4422_v48 = vrot.slane %v5468_v59, %v8234_v4  ;;  %v5469_v1 = vld [vmem:[%s8054_s8 + $0x20] sm:$0xff]  ;;  %v8257_v59 = vld [vmem:[#allocation36_spill] sm:$0xff]  ;;  %v8260_v4 = vld [vmem:[#allocation33_spill] sm:$0xff]  ;;  %p5551_p0 = pnand %p5550_p13, %p5725_p6  ;;  %p5558_p4 = por %p5557_p3, %p5556_p2 }
 0x500   : > { %4369 = vmatpush1.msra.mxu1 %v4331_v19  ;;  %4408 = vmatprep.mubr.f32.mxu1 %v7834_v43  ;;  %v8243_v11 = vld [vmem:[#allocation34_spill] sm:$0xff]  ;;  %v8244_v19 = vld [vmem:[#allocation12_spill] sm:$0xff] }
 0x501   : > { %v3880_v42 = vpop.permute.xlu0 %3879  ;;  %4370 = vmatprep.subr.mxu1 %v4330_v60  ;;  %v4435_v34 = vmul.f32 %v4422_v48, %v8236_v24  ;;  %p5552_p1 = pneg %p5551_p0 }
 0x502   : > { %4371 = vmatpush1.msra.mxu1 %v4329_v27  ;;  %v3888_v37 = vsel %vm535_vm6, %v3878_v23, %v3880_v42  ;;  %v4602_v23 = vsel %vm963_vm3, %v4592_v36, %v7671_v35  ;;  %v4599_v35 = vsel %vm963_vm3, %v7795_v52, %v7799_v17  ;;  %v4429_v17 = vmul.f32 %v4422_v48, %v8242_v56  ;;  %v5062_v60 = vpop.permute.xlu1 %5061  ;;  %v8245_v42 = vld [vmem:[#allocation20_spill] sm:$0xff]  ;;  %v8247_v36 = vld [vmem:[#allocation35_spill] sm:$0xff] }
 0x503   : > { %3924 = vmatprep.subr.mxu0 %v3888_v37  ;;  %4372 = vmatprep.subr.mxu1 %v7763_v31  ;;  %v8240_v31 = vld [vmem:[#allocation19_spill] sm:$0xff]  ;;  %v4760_v37 = vsel %vm794_vm2, %v7803_v25, %v8245_v42  ;;  %p5559_p5 = pnand %p5558_p4, %p5552_p1 }
 0x504   : > { %3925 = vmatpush1.msra.mxu0 %v3887_v47  ;;  %4373 = vmatpush1.msra.mxu1 %v4327_v3  ;;  %v4431_v13 = vmul.f32 %v4422_v48, %v8240_v31  ;;  %v8246_v3 = vld [vmem:[#allocation21_spill] sm:$0xff] }
 0x505   : > { %v7853_v51 = vpop.permute.xlu0 %5065  ;;  %3926 = vmatprep.subr.mxu0 %v3886_v55  ;;  %4374 = vmatprep.subr.mxu1 %v7715_v30  ;;  %v4759_v47 = vsel %vm794_vm2, %v8246_v3, %v7803_v25  ;;  %v8253_v25 = vld [vmem:[#allocation37_spill] sm:$0xff] }
 0x506   : > { %3927 = vmatpush1.msra.mxu0 %v3885_v18  ;;  %4375 = vmatpush1.msra.mxu1 %v4325_v26  ;;  %v8248_v26 = vld [vmem:[#allocation24_spill] sm:$0xff] }
 0x507   : > { %3928 = vmatprep.subr.mxu0 %v7759_v57  ;;  %4638 = vmatprep.subr.mxu1 %v4602_v23  ;;  %v8238_v57 = vld [vmem:[#allocation23_spill] sm:$0xff]  ;;  %v8250_v23 = vld [vmem:[#allocation30_spill] sm:$0xff] }
 0x508   : > { %3929 = vmatpush1.msra.mxu0 %v3883_v6  ;;  %5467 = vmatmul.mubr.msk.f32.vlgmr.msra.gmra.mxu1 %vm2127_vm10, %v5466_v22  ;;  %v4433_v21 = vmul.f32 %v4422_v48, %v8238_v57  ;;  %v8249_v22 = vld [vmem:[#allocation13_spill] sm:$0xff]  ;;  %v8261_v48 = vld [vmem:[#allocation32_spill] sm:$0xff] }
 0x509   : > { %4639 = vmatpush1.msra.mxu1 %v4601_v16  ;;  %v7871_v30 = vpop.permute.xlu0 %4897  ;;  %3930 = vmatprep.subr.mxu0 %v7690_v7  ;;  %v4758_v6 = vsel %vm794_vm2, %v8250_v23, %v8249_v22  ;;  %v8251_v16 = vld [vmem:[#allocation22_spill] sm:$0xff] }
 0x50a   : > { %4640 = vmatprep.subr.mxu1 %v4600_v63  ;;  %3931 = vmatpush1.msra.mxu0 %v3881_v2  ;;  %v8252_v2 = vld [vmem:[#allocation39_spill] sm:$0xff] }
 0x50b   : > { %4641 = vmatpush1.msra.mxu1 %v4599_v35  ;;  %4208 = vmatprep.subr.mxu0 %v4172_v40  ;;  %v4920_v63 = vsel %vm501_vm0, %v8252_v2, %v8251_v16  ;;  %v8254_v35 = vld [vmem:[#allocation31_spill] sm:$0xff] }
 0x50c   : > { %4642 = vmatprep.subr.mxu1 %v4598_v61  ;;  %5460 = vmatmul.mubr.msk.f32.vlgmr.msra.gmra.mxu0 %vm2127_vm10, %v5459_v44  ;;  %v4919_v44 = vsel %vm501_vm0, %v8253_v25, %v8252_v2  ;;  %v8255_v61 = vld [vmem:[#allocation26_spill] sm:$0xff] }
 0x50d   : > { %4209 = vmatpush1.msra.mxu0 %v4171_v9  ;;  %4643 = vmatpush1.msra.mxu1 %v7771_v0  ;;  %v7894_v7 = vpop.permute.xlu0 %4893  ;;  %v8241_v0 = vld [vmem:[#allocation15_spill] sm:$0xff]  ;;  %v8256_v9 = vld [vmem:[#allocation14_spill] sm:$0xff] }
 0x50e   : > { %4210 = vmatprep.subr.mxu0 %v4170_v20  ;;  %4644 = vmatprep.subr.mxu1 %v4596_v29  ;;  %v4430_v52 = vmul.f32 %v4426_v45, %v8241_v0  ;;  %v4756_v20 = vsel %vm794_vm2, %v8256_v9, %v8255_v61  ;;  %v5475_v29 = vld [vmem:[%s8054_s8 + $0x30] sm:$0xff]  ;;  %v4916_v15 = vsel %vm501_vm0, %v7894_v7, %v4896_v46 }
 0x50f   : > { %4211 = vmatpush1.msra.mxu0 %v4169_v5  ;;  %4645 = vmatpush1.msra.mxu1 %v7730_v62  ;;  %v5463_v62 = vld [vmem:[%s8054_s8 + $0x10] sm:$0xff]  ;;  %v5058_v5 = vpop.permute.xlu1 %5057 }
 0x510   : > { %4212 = vmatprep.subr.mxu0 %v7750_v8  ;;  %4248 = vmatprep.mubr.f32.mxu0 %v7834_v43  ;;  %v8237_v8 = vld [vmem:[#allocation16_spill] sm:$0xff] }
 0x511   : > { %4213 = vmatpush1.msra.mxu0 %v4167_v53  ;;  %v7916_v38 = vpop.permute.xlu0 %5059  ;;  %4678 = vmatprep.mubr.f32.mxu1 %v7834_v43  ;;  %v4434_v33 = vmul.f32 %v4426_v45, %v8237_v8  ;;  %v8258_v53 = vld [vmem:[#allocation17_spill] sm:$0xff] }
 0x512   : > { %4214 = vmatprep.subr.mxu0 %v7707_v28  ;;  %5473 = vmatmul.mubr.msk.f32.vlgmr.msra.gmra.mxu1 %vm2127_vm10, %v5472_v41  ;;  %v8239_v28 = vld [vmem:[#allocation27_spill] sm:$0xff] }
 0x513   : > { %4215 = vmatpush1.msra.mxu0 %v4165_v39  ;;  %4998 = vmatprep.mubr.f32.mxu1 %v7834_v43  ;;  %v4432_v32 = vmul.f32 %v4426_v45, %v8239_v28  ;;  %v8259_v45 = vld [vmem:[#allocation29_spill] sm:$0xff]  ;;  %v5056_v57 = vpop.permute.xlu1 %5055 }
 0x514   : > { %4466 = vmatprep.subr.mxu0 %v4436_v10  ;;  %5464 = vmatmul.mubr.msk.f32.vlgmr.msra.gmra.mxu0 %vm2127_vm10, %v5463_v62  ;;  %v4917_v62 = vsel %vm501_vm0, %v7871_v30, %v8261_v48  ;;  %v8262_v10 = vld [vmem:[#allocation38_spill] sm:$0xff]  ;;  %v5079_v30 = vsel %vm471_vm1, %v7826_v50, %v7853_v51 }
 0x515   : > { %4467 = vmatpush1.msra.mxu0 %v4435_v34  ;;  %v4892_v58 = vpop.permute.xlu0 %4891  ;;  %4506 = vmatprep.mubr.f32.mxu0 %v7834_v43  ;;  %v5080_v24 = vsel %vm471_vm1, %v7853_v51, %v8262_v10  ;;  %v5478_v34 = vld [vmem:[%s8054_s8 + $0x38] sm:$0xff]  ;;  %v5481_v51 = vld [vmem:[%s8054_s8 + $0x40] sm:$0xff] }
 0x516   : > { %4468 = vmatprep.subr.mxu0 %v4434_v33  ;;  %v4915_v8 = vsel %vm501_vm0, %v4892_v58, %v7894_v7  ;;  %v5078_v33 = vsel %vm471_vm1, %v7916_v38, %v5062_v60 }
 0x517   : > { %4469 = vmatpush1.msra.mxu0 %v4433_v21  ;;  %v5077_v21 = vsel %vm471_vm1, %v5058_v5, %v7916_v38 }
 0x518   : > { %4470 = vmatprep.subr.mxu0 %v4432_v32 }
 0x519   : > { %4471 = vmatpush1.msra.mxu0 %v4431_v13  ;;  %v4752_v12 = vpop.permute.xlu0 %4751 }
 0x51a   : > { %v4761_v14 = vsel %vm794_vm2, %v8243_v11, %v4752_v12  ;;  %4472 = vmatprep.subr.mxu0 %v4430_v52  ;;  %v4762_v54 = vsel %vm794_vm2, %v4752_v12, %v8244_v19 }
 0x51b   : > { %4473 = vmatpush1.msra.mxu0 %v4429_v17 }
 0x51c   : > { %5470 = vmatmul.mubr.msk.f32.vlgmr.msra.gmra.mxu0 %vm2127_vm10, %v5469_v1  ;;  %4798 = vmatprep.subr.mxu0 %v4762_v54 }
 0x51d   : > { %4799 = vmatpush1.msra.mxu0 %v4761_v14  ;;  %v4912_v27 = vpop.permute.xlu0 %4911  ;;  %4838 = vmatprep.mubr.f32.mxu0 %v7834_v43 }
 0x51e   : > { %v4921_v55 = vsel %vm501_vm0, %v8247_v36, %v4912_v27  ;;  %4800 = vmatprep.subr.mxu0 %v4760_v37  ;;  %v4922_v18 = vsel %vm501_vm0, %v4912_v27, %v8248_v26 }
 0x51f   : > { %4801 = vmatpush1.msra.mxu0 %v4759_v47  ;;  %4958 = vmatprep.subr.mxu1 %v4922_v18 }
 0x520   : > { %4802 = vmatprep.subr.mxu0 %v4758_v6  ;;  %4959 = vmatpush1.msra.mxu1 %v4921_v55 }
 0x521   : > { %4803 = vmatpush1.msra.mxu0 %v8254_v35  ;;  %v5072_v40 = vpop.permute.xlu0 %5071  ;;  %4960 = vmatprep.subr.mxu1 %v4920_v63  ;;  %v5171_v63 = vpop.permute.xlu1 %5170 }
 0x522   : > { %v5081_v41 = vsel %vm471_vm1, %v8257_v59, %v5072_v40  ;;  %4804 = vmatprep.subr.mxu0 %v4756_v20  ;;  %4961 = vmatpush1.msra.mxu1 %v4919_v44  ;;  %v5082_v49 = vsel %vm471_vm1, %v5072_v40, %v8258_v53 }
 0x523   : > { %4805 = vmatpush1.msra.mxu0 %v8259_v45  ;;  %4962 = vmatprep.subr.mxu1 %v8260_v4 }
 0x524   : > { %5476 = vmatmul.mubr.msk.f32.vlgmr.msra.gmra.mxu0 %vm2127_vm10, %v5475_v29  ;;  %5118 = vmatprep.subr.mxu0 %v5082_v49 }
 0x525   : > { %4963 = vmatpush1.msra.mxu1 %v4917_v62  ;;  %5119 = vmatpush1.msra.mxu0 %v5081_v41  ;;  %v5054_v39 = vpop.permute.xlu0 %5053 }
 0x526   : > { %4964 = vmatprep.subr.mxu1 %v4916_v15  ;;  %5120 = vmatprep.subr.mxu0 %v5080_v24  ;;  %v5076_v50 = vsel %vm471_vm1, %v5054_v39, %v5056_v57 }
 0x527   : > { %4965 = vmatpush1.msra.mxu1 %v4915_v8  ;;  %5121 = vmatpush1.msra.mxu0 %v5079_v30 }
 0x528   : > { %5479 = vmatmul.mubr.msk.f32.vlgmr.msra.gmra.mxu1 %vm2127_vm10, %v5478_v34  ;;  %5122 = vmatprep.subr.mxu0 %v5078_v33 }
 0x529   : > { %5123 = vmatpush1.msra.mxu0 %v5077_v21  ;;  %v5052_v46 = vpop.permute.xlu0 %5051  ;;  %5158 = vmatprep.mubr.f32.mxu0 %v7834_v43 }
 0x52a   : > { %v5075_v7 = vsel %vm471_vm1, %v5052_v46, %v5054_v39  ;;  %5124 = vmatprep.subr.mxu0 %v5076_v50 }
 0x52b   : > { %5125 = vmatpush1.msra.mxu0 %v5075_v7 }
 0x52c   : > { %5482 = vmatmul.mubr.msk.f32.vlgmr.msra.gmra.mxu0 %vm2127_vm10, %v5481_v51 }
 0x5bf   : > { %v4092_v28 = vpop.f32.mrf.mxu1 }
 0x5c1   : > { %v4094_v31 = vpop.f32.mrf.mxu1 }
 0x5c8   : > { %v4410_v52 = vpop.f32.mrf.mxu1 }
 0x5ca   : > { %v4412_v1 = vpop.f32.mrf.mxu1 }
 0x5cc   : > { %v3966_v38 = vpop.f32.mrf.mxu0 }
 0x5cd   : > { %v4093_v13 = vadd.f32 %v4092_v28, %v3966_v38 }
 0x5ce   : > { %v3968_v58 = vpop.f32.mrf.mxu0 }
 0x5cf   : > { %v4095_v12 = vadd.f32 %v4094_v31, %v3968_v58 }
 0x5d2   : > { %v4680_v19 = vpop.f32.mrf.mxu1 }
 0x5d4   : > { %v4250_v32 = vpop.f32.mrf.mxu0  ;;  %v4682_v37 = vpop.f32.mrf.mxu1 }
 0x5d5   : > { %v4255_v43 = vadd.f32 %v4250_v32, %v4093_v13 }
 0x5d6   : > { %v4252_v0 = vpop.f32.mrf.mxu0 }
 0x5d7   : > { %v4256_v17 = vadd.f32 %v4252_v0, %v4095_v12  ;;  %v4415_v11 = vadd.f32 %v4410_v52, %v4255_v43 }
 0x5d9   : > { %v4416_v54 = vadd.f32 %v4412_v1, %v4256_v17 }
 0x5dc   : > { %v4508_v56 = vpop.f32.mrf.mxu0 }
 0x5dd   : > { %v4513_v60 = vadd.f32 %v4508_v56, %v4415_v11 }
 0x5de   : > { %v4510_v14 = vpop.f32.mrf.mxu0 }
 0x5df   : > { %v4514_v42 = vadd.f32 %v4510_v14, %v4416_v54  ;;  %v4685_v3 = vadd.f32 %v4680_v19, %v4513_v60 }
 0x5e1   : > { %v4686_v55 = vadd.f32 %v4682_v37, %v4514_v42 }
 0x5e4   : > { %v4840_v27 = vpop.f32.mrf.mxu0 }
 0x5e5   : > { %v4845_v26 = vadd.f32 %v4840_v27, %v4685_v3 }
 0x5e6   : > { %v4842_v47 = vpop.f32.mrf.mxu0 }
 0x5e7   : > { %v4846_v22 = vadd.f32 %v4842_v47, %v4686_v55 }
 0x5e8   : > { %v5000_v36 = vpop.f32.mrf.mxu1 }
 0x5e9   : > { %v5005_v23 = vadd.f32 %v5000_v36, %v4845_v26 }
 0x5ea   : > { %v5002_v18 = vpop.f32.mrf.mxu1 }
 0x5eb   : > { %v5006_v16 = vadd.f32 %v5002_v18, %v4846_v22 }
 0x5ec   : > { %v5160_v6 = vpop.f32.mrf.mxu0 }
 0x5ed   : > { %v5165_v2 = vadd.f32 %v5160_v6, %v5005_v23 }
 0x5ee   : > { %v5162_v25 = vpop.f32.mrf.mxu0 }
 0x5ef   : > { %v5173_v44 = vadd.f32 %v5171_v63, %v5165_v2  ;;  %v5166_v35 = vadd.f32 %v5162_v25, %v5006_v16 }
 0x5f1   : > { %5175 = vst [vmem:[%s431_s11] sm:$0xff] %v5173_v44  ;;  %v5174_v40 = vadd.f32 %v5171_v63, %v5166_v35 }
 0x5f3   : > { %5176 = vst [vmem:[%s431_s11 + $0x8] sm:$0xff] %v5174_v40 }
 0x5f4   : > { %5562 = shalt.err (!%p5559_p5)
}
 0x5f5   : > { %s5563_s29 = scalar_lea.hbm %s5190_s4, 256  ;;  %s5567_s23 = scalar_lea.hbm %s8056_s10, 512 }
 0x5f6   : > { %p5564_p7 = scmp.ne.s32.totalorder %s5190_s4, %s5563_s29  ;;  %p5568_p12 = scmp.lt.s32.totalorder %s5190_s4, %s8056_s10 }
 0x5f7   : > { %p5569_p13 = scmp.lt.s32.totalorder %s5567_s23, %s5563_s29 }
 0x5f8   : > { %p5565_p10 = pnand %p5564_p7, %p5725_p6 }
 0x5f9   : > { %p5570_p0 = por %p5569_p13, %p5568_p12 }
 0x5fa   : > { %p5566_p11 = pneg %p5565_p10 }
 0x5fc   : > { %p5571_p9 = pnand %p5570_p0, %p5566_p11 }
 0x5fe   : > { %5574 = shalt.err (!%p5571_p9)
}
 0x5ff   : > { %5495 = dma.vmem_to_hbm [thread:$0]  (%p5725_p6), %s5193_s28, 256, %s5190_s4, %s5178_s7  }
 0x600 PF: > { %s5204_s16 = sand.u32 1, %s5597_s17   ;;  %p8264_p1 = scmp.ge.s32.totalorder %s5609_s20, 2 }
 0x601   : > { %s5205_s22 = scalar_lea.sflag [#allocation8], %s5204_s16 }
 0x602   : > { %p5498_p2 = pnand %p8264_p1, %p5729_p8 }
 0x604   : > { %p5499_p3 = pneg %p5498_p2 }
 0x606   : > { %5592 = dma.done.wait (%p5499_p3), %s5205_s22, 256  }
 0x607   : > { %5594 = vsyncadd (%p5499_p3), %s5205_s22, 4294967040  ;;  %p22_p9 = scmp.ge.s32.totalorder %s5706_s21, 4   ;;  %s8265_s17 = smov %s5601_s18 }
 0x608   : > { %s8266_s18 = smov %s5605_s19  ;;  %s8267_s19 = smov %s5719_s24 }
 0x609   : > { %s8268_s20 = smov %s5706_s21  ;;  %24 = sbr.rel (!%p22_p9) target bundleno = 6 (0x6), region = 186 }
 0x60e   :  { %5210 = vsyncpa [#allocation8], 1 }
 0x60f   :  { %5212 = vsyncpa [#allocation8 + $0x1], 1 }

</bundles_post_ra>
